<compile_context>
chip_gen: v6e
topology: v6e:2x2x1
jax: 0.10.0
libtpu: 0.0.40
codegen_flags: <defaults>
</compile_context>

<pallas_src>
import functools
import math

import jax
import jax.numpy as jnp
from jax.experimental import pallas as pl
from jax.experimental.pallas import tpu as pltpu

LN_EPS = 1e-5  # PyTorch nn.LayerNorm default


def _layernorm_f32(x, w, b):
    # x: (N, C) f32, w/b: (1, C) f32
    mu = jnp.mean(x, axis=-1, keepdims=True)
    xc = x - mu
    var = jnp.mean(xc * xc, axis=-1, keepdims=True)
    return xc * jax.lax.rsqrt(var + LN_EPS) * w + b


def _gelu_exact(x):
    # PyTorch nn.GELU default (erf-based, exact).  Kept exact for parity with
    # the reference module; switch to tanh-approx if parity allows (EUP path).
    return 0.5 * x * (1.0 + jax.lax.erf(x * (1.0 / math.sqrt(2.0))))


def _block_kernel(num_heads, head_dim, heads_per_group, scale, n_valid,
                  x_ref,
                  ln1w_ref, ln1b_ref,
                  wq_ref, wk_ref, wv_ref, wp_ref,
                  ln2w_ref, ln2b_ref,
                  w1_ref, b1_ref, w2_ref, b2_ref,
                  o_ref,
                  attn_scratch):
    x = x_ref[0].astype(jnp.float32)                        # (Np, C) f32
    n_pad = x.shape[0]

    # ---------------- norm1 (f32) ----------------
    xn = _layernorm_f32(x, ln1w_ref[...], ln1b_ref[...])     # (Np, C)
    xn_bf = xn.astype(jnp.bfloat16)

    # q/k/v projections: bf16 operands, f32 accumulation on the MXU.
    q = jnp.dot(xn_bf, wq_ref[...], preferred_element_type=jnp.float32)
    k = jnp.dot(xn_bf, wk_ref[...], preferred_element_type=jnp.float32)
    v = jnp.dot(xn_bf, wv_ref[...], preferred_element_type=jnp.float32)

    # Fold the softmax scale into q once.
    q_bf = (q * scale).astype(jnp.bfloat16)
    k_bf = k.astype(jnp.bfloat16)
    v_bf = v.astype(jnp.bfloat16)

    # Additive key-padding bias: (1, Np), 0 for valid keys, -1e30 for padding.
    # Broadcast-added to each (Np, Np) score matrix (cheap vadd, no full mask).
    if n_valid < n_pad:
        key_ids = jax.lax.broadcasted_iota(jnp.int32, (1, n_pad), 1)
        key_bias = jnp.where(key_ids < n_valid,
                             jnp.float32(0.0), jnp.float32(-1e30))
    else:
        key_bias = None

    group_width = heads_per_group * head_dim
    num_groups = num_heads // heads_per_group

    # ---------------- attention, heads in lane-aligned groups ----------------
    for g in range(num_groups):                              # static unroll
        g_lo = g * group_width
        outs = []
        for hh in range(heads_per_group):
            lo = g_lo + hh * head_dim
            qh = q_bf[:, lo:lo + head_dim]                    # (Np, D)
            kh = k_bf[:, lo:lo + head_dim]
            vh = v_bf[:, lo:lo + head_dim]
            # q @ k^T without materializing a transpose.
            s = jax.lax.dot_general(qh, kh, (((1,), (1,)), ((), ())),
                                    preferred_element_type=jnp.float32)
            if key_bias is not None:
                s = s + key_bias
            s = s - jnp.max(s, axis=-1, keepdims=True)
            p = jnp.exp(s)                                    # unnormalized
            denom = jnp.sum(p, axis=-1, keepdims=True)
            oh = jnp.dot(p.astype(jnp.bfloat16), vh,
                         preferred_element_type=jnp.float32)  # (Np, D)
            # Normalize the small (Np, D) output, not the (Np, Np) probs.
            outs.append(oh * pl.reciprocal(denom, approx=True))
        blk = outs[0] if heads_per_group == 1 else jnp.concatenate(outs, axis=-1)
        # One contiguous, lane-aligned store per group (no vst.msk partials).
        attn_scratch[:, g_lo:g_lo + group_width] = blk

    attn_bf = attn_scratch[...].astype(jnp.bfloat16)          # (Np, C)
    proj = jnp.dot(attn_bf, wp_ref[...], preferred_element_type=jnp.float32)

    y1 = x + proj                                              # residual 1 (f32)

    # ---------------- norm2 + MLP + residual ----------------
    yn = _layernorm_f32(y1, ln2w_ref[...], ln2b_ref[...])      # (Np, C)
    h1 = jnp.dot(yn.astype(jnp.bfloat16), w1_ref[...],
                 preferred_element_type=jnp.float32) + b1_ref[...]
    h1 = _gelu_exact(h1)                                        # f32
    m = jnp.dot(h1.astype(jnp.bfloat16), w2_ref[...],
                preferred_element_type=jnp.float32) + b2_ref[...]

    o_ref[0] = (y1 + m).astype(o_ref.dtype)


def _physical_vmem_bytes():
    """Per-core VMEM capacity; conservative 64 MiB (v7x) if query unavailable."""
    try:
        info = pltpu.get_tpu_info()
        cap = getattr(info, "vmem_capacity_bytes", None)
        if cap:
            return int(cap)
    except Exception:
        pass
    return 64 << 20


def _buffered_single_supported():
    """Feature-detect pipeline_mode=pl.Buffered(1) at BlockSpec construction."""
    try:
        buffered = getattr(pl, "Buffered", None)
        if buffered is None:
            return False
        pl.BlockSpec((8, 128), lambda b: (0, 0), pipeline_mode=buffered(1))
        return True
    except Exception:
        return False


def vit_block(x, params, num_heads):
    """x: (B, N, C) float32.  params: dict of pre-transposed weights (in, out)."""
    B, N, C = x.shape
    head_dim = C // num_heads
    scale = head_dim ** (-0.5)
    hid = params["w1"].shape[1]

    # Pad the token axis to a multiple of 16 (bf16 packs 16 sublanes per vreg),
    # e.g. N=197 -> 208.  Padded keys masked, padded query rows sliced off.
    n_pad = ((N + 15) // 16) * 16
    x_p = jnp.pad(x, ((0, 0), (0, n_pad - N), (0, 0))) if n_pad != N else x

    # Group heads into 128-lane slabs for lane-aligned scratch stores.
    if head_dim <= 128:
        heads_per_group = max(1, min(num_heads, 128 // head_dim))
        while num_heads % heads_per_group:
            heads_per_group -= 1
    else:
        heads_per_group = 1

    # bf16 weights in HBM: halves weight DMA/VMEM, feeds the bf16 MXU directly.
    wq = params["wq"].astype(jnp.bfloat16)
    wk = params["wk"].astype(jnp.bfloat16)
    wv = params["wv"].astype(jnp.bfloat16)
    wp = params["wp"].astype(jnp.bfloat16)
    w1 = params["w1"].astype(jnp.bfloat16)
    w2 = params["w2"].astype(jnp.bfloat16)

    kernel = functools.partial(
        _block_kernel, num_heads, head_dim, heads_per_group, scale, N)

    # --- VMEM budget, clamped to the physical per-core capacity ---
    itemsize = x.dtype.itemsize
    w_bytes = (4 * C * C + 2 * C * hid) * 2 + (5 * C + hid) * 4
    io_bytes = 2 * 2 * n_pad * C * itemsize
    act_bytes = (12 * n_pad * C
                 + 2 * heads_per_group * n_pad * n_pad
                 + 3 * n_pad * hid) * 4
    computed = 2 * w_bytes + io_bytes + act_bytes + (8 << 20)
    cap = int(0.85 * _physical_vmem_bytes())
    vmem_limit = max(16 << 20, min(computed, cap))

    # --- advisory cost estimate for XLA scheduling around the custom call ---
    flops = B * (8 * n_pad * C * C + 4 * n_pad * n_pad * C + 4 * n_pad * C * hid)
    transcendentals = B * n_pad * (num_heads * n_pad + hid)
    bytes_accessed = w_bytes + 2 * B * n_pad * C * itemsize
    cost = pl.CostEstimate(flops=int(flops),
                           transcendentals=int(transcendentals),
                           bytes_accessed=int(bytes_accessed))

    def _build(single_buffer_weights):
        def wspec(shape):
            idx = lambda b: tuple(0 for _ in shape)
            if single_buffer_weights:
                # Weights are grid-invariant: one VMEM buffer is enough.
                return pl.BlockSpec(shape, idx, pipeline_mode=pl.Buffered(1))
            return pl.BlockSpec(shape, idx)

        in_specs = [
            pl.BlockSpec((1, n_pad, C), lambda b: (b, 0, 0)),   # x
            wspec((1, C)), wspec((1, C)),                        # ln1 w, b
            wspec((C, C)), wspec((C, C)),                        # Wq, Wk
            wspec((C, C)), wspec((C, C)),                        # Wv, Wproj
            wspec((1, C)), wspec((1, C)),                        # ln2 w, b
            wspec((C, hid)), wspec((1, hid)),                    # fc1 W, b
            wspec((hid, C)), wspec((1, C)),                      # fc2 W, b
        ]
        return pl.pallas_call(
            kernel,
            out_shape=jax.ShapeDtypeStruct((B, n_pad, C), x.dtype),
            grid_spec=pltpu.PrefetchScalarGridSpec(
                num_scalar_prefetch=0,
                grid=(B,),
                in_specs=in_specs,
                out_specs=pl.BlockSpec((1, n_pad, C), lambda b: (b, 0, 0)),
                scratch_shapes=[pltpu.VMEM((n_pad, C), jnp.float32)],
            ),
            compiler_params=pltpu.CompilerParams(
                dimension_semantics=("parallel",),
                vmem_limit_bytes=vmem_limit),
            cost_estimate=cost,
        )

    args = (x_p,
            params["ln1_w"], params["ln1_b"],
            wq, wk, wv, wp,
            params["ln2_w"], params["ln2_b"],
            w1, params["b1"], w2, params["b2"])

    use_buffered = _buffered_single_supported()
    try:
        out = _build(use_buffered)(*args)
    except Exception as first_err:
        if not use_buffered:
            raise
        # Retry with default (double-buffered) weight specs; if that also
        # fails, surface the original error rather than the secondary one.
        try:
            out = _build(False)(*args)
        except Exception:
            raise first_err

    return out[:, :N, :] if n_pad != N else out


# ----------------------- pure-JAX reference (for checking) -----------------------
def vit_block_ref(x, params, num_heads):
    B, N, C = x.shape
    D = C // num_heads
    scale = D ** (-0.5)

    def ln(v, w, b):
        mu = jnp.mean(v, -1, keepdims=True)
        var = jnp.mean((v - mu) ** 2, -1, keepdims=True)
        return (v - mu) / jnp.sqrt(var + LN_EPS) * w + b

    xn = ln(x, params["ln1_w"][0], params["ln1_b"][0])
    q = (xn @ params["wq"]).reshape(B, N, num_heads, D).transpose(0, 2, 1, 3)
    k = (xn @ params["wk"]).reshape(B, N, num_heads, D).transpose(0, 2, 1, 3)
    v = (xn @ params["wv"]).reshape(B, N, num_heads, D).transpose(0, 2, 1, 3)
    attn = jax.nn.softmax(q @ k.transpose(0, 1, 3, 2) * scale, axis=-1)
    o = (attn @ v).transpose(0, 2, 1, 3).reshape(B, N, C) @ params["wp"]
    y1 = x + o
    yn = ln(y1, params["ln2_w"][0], params["ln2_b"][0])
    h = jax.nn.gelu(yn @ params["w1"] + params["b1"][0], approximate=False)
    return y1 + (h @ params["w2"] + params["b2"][0])


if __name__ == "__main__":
    B, N, C = 2, 8, 64
    num_heads = 8
    mlp_ratio = 4.0
    hid = int(C * mlp_ratio)

    key = jax.random.PRNGKey(0)
    ks = jax.random.split(key, 16)
    f32 = jnp.float32

    x = jax.random.normal(ks[0], (B, N, C), dtype=f32)

    # Deterministic synthetic parameters (Linear weights stored as (in, out),
    # i.e. already transposed relative to PyTorch's (out, in)).
    params = {
        "ln1_w": 1.0 + 0.1 * jax.random.normal(ks[1], (1, C), dtype=f32),
        "ln1_b": 0.1 * jax.random.normal(ks[2], (1, C), dtype=f32),
        "wq": 0.05 * jax.random.normal(ks[3], (C, C), dtype=f32),
        "wk": 0.05 * jax.random.normal(ks[4], (C, C), dtype=f32),
        "wv": 0.05 * jax.random.normal(ks[5], (C, C), dtype=f32),
        "wp": 0.05 * jax.random.normal(ks[6], (C, C), dtype=f32),
        "ln2_w": 1.0 + 0.1 * jax.random.normal(ks[7], (1, C), dtype=f32),
        "ln2_b": 0.1 * jax.random.normal(ks[8], (1, C), dtype=f32),
        "w1": 0.05 * jax.random.normal(ks[9], (C, hid), dtype=f32),
        "b1": 0.05 * jax.random.normal(ks[10], (1, hid), dtype=f32),
        "w2": 0.05 * jax.random.normal(ks[11], (hid, C), dtype=f32),
        "b2": 0.05 * jax.random.normal(ks[12], (1, C), dtype=f32),
    }

    out = vit_block(x, params, num_heads)
    out = jax.block_until_ready(out)

    ref = vit_block_ref(x, params, num_heads)
    assert out.shape == (B, N, C)
    # Tolerance accounts for bf16 MXU operands + approx-reciprocal softmax;
    # statistics / softmax / residuals are kept in f32 inside the kernel.
    err = jnp.max(jnp.abs(out - ref))
    assert jnp.allclose(out, ref, rtol=2e-2, atol=2e-2), f"max abs err = {err}"

    print("KERNEL_OK")
</pallas_src>

<mosaic_0001>
module attributes {stable_mosaic.version = 11 : i64} {
  func.func @_block_kernel(%arg0: i32, %arg1: memref<1x16x64xf32, #tpu.memory_space<vmem>>, %arg2: memref<1x64xf32, #tpu.memory_space<vmem>>, %arg3: memref<1x64xf32, #tpu.memory_space<vmem>>, %arg4: memref<64x64xbf16, #tpu.memory_space<vmem>>, %arg5: memref<64x64xbf16, #tpu.memory_space<vmem>>, %arg6: memref<64x64xbf16, #tpu.memory_space<vmem>>, %arg7: memref<64x64xbf16, #tpu.memory_space<vmem>>, %arg8: memref<1x64xf32, #tpu.memory_space<vmem>>, %arg9: memref<1x64xf32, #tpu.memory_space<vmem>>, %arg10: memref<64x256xbf16, #tpu.memory_space<vmem>>, %arg11: memref<1x256xf32, #tpu.memory_space<vmem>>, %arg12: memref<256x64xbf16, #tpu.memory_space<vmem>>, %arg13: memref<1x64xf32, #tpu.memory_space<vmem>>, %arg14: memref<1x16x64xf32, #tpu.memory_space<vmem>>, %arg15: memref<16x64xf32, #tpu.memory_space<vmem>>) attributes {dimension_semantics = [#tpu.dimension_semantics<parallel>], iteration_bounds = array<i64: 2>, scalar_prefetch = 0 : i64, scratch_operands = 1 : i64, tpu.core_type = #tpu.core_type<tc>, window_params = [{transform_indices = @transform_0, window_bounds = array<i64: 1, 16, 64>}, {pipeline_mode = #tpu.pipeline_mode<synchronous>, transform_indices = @transform_1, window_bounds = array<i64: 1, 64>}, {pipeline_mode = #tpu.pipeline_mode<synchronous>, transform_indices = @transform_2, window_bounds = array<i64: 1, 64>}, {pipeline_mode = #tpu.pipeline_mode<synchronous>, transform_indices = @transform_3, window_bounds = array<i64: 64, 64>}, {pipeline_mode = #tpu.pipeline_mode<synchronous>, transform_indices = @transform_4, window_bounds = array<i64: 64, 64>}, {pipeline_mode = #tpu.pipeline_mode<synchronous>, transform_indices = @transform_5, window_bounds = array<i64: 64, 64>}, {pipeline_mode = #tpu.pipeline_mode<synchronous>, transform_indices = @transform_6, window_bounds = array<i64: 64, 64>}, {pipeline_mode = #tpu.pipeline_mode<synchronous>, transform_indices = @transform_7, window_bounds = array<i64: 1, 64>}, {pipeline_mode = #tpu.pipeline_mode<synchronous>, transform_indices = @transform_8, window_bounds = array<i64: 1, 64>}, {pipeline_mode = #tpu.pipeline_mode<synchronous>, transform_indices = @transform_9, window_bounds = array<i64: 64, 256>}, {pipeline_mode = #tpu.pipeline_mode<synchronous>, transform_indices = @transform_10, window_bounds = array<i64: 1, 256>}, {pipeline_mode = #tpu.pipeline_mode<synchronous>, transform_indices = @transform_11, window_bounds = array<i64: 256, 64>}, {pipeline_mode = #tpu.pipeline_mode<synchronous>, transform_indices = @transform_12, window_bounds = array<i64: 1, 64>}, {transform_indices = @transform_13, window_bounds = array<i64: 1, 16, 64>}]} {
    %c0 = arith.constant 0 : index
    %c0_0 = arith.constant 0 : index
    %c0_1 = arith.constant 0 : index
    %0 = vector.load %arg1[%c0, %c0_0, %c0_1] : memref<1x16x64xf32, #tpu.memory_space<vmem>>, vector<1x16x64xf32>
    %1 = vector.shape_cast %0 : vector<1x16x64xf32> to vector<16x64xf32>
    %c0_2 = arith.constant 0 : index
    %c0_3 = arith.constant 0 : index
    %2 = vector.load %arg2[%c0_2, %c0_3] : memref<1x64xf32, #tpu.memory_space<vmem>>, vector<1x64xf32>
    %c0_4 = arith.constant 0 : index
    %c0_5 = arith.constant 0 : index
    %3 = vector.load %arg3[%c0_4, %c0_5] : memref<1x64xf32, #tpu.memory_space<vmem>>, vector<1x64xf32>
    %cst = arith.constant dense<0.000000e+00> : vector<16xf32>
    %4 = vector.multi_reduction <add>, %1, %cst [1] : vector<16x64xf32> to vector<16xf32>
    %5 = vector.shape_cast %4 : vector<16xf32> to vector<16x1xf32>
    %cst_6 = arith.constant 6.400000e+01 : f32
    %6 = vector.broadcast %cst_6 : f32 to vector<16x1xf32>
    %7 = arith.divf %5, %6 : vector<16x1xf32>
    %8 = vector.broadcast %7 : vector<16x1xf32> to vector<16x64xf32>
    %9 = arith.subf %1, %8 : vector<16x64xf32>
    %10 = arith.mulf %9, %9 : vector<16x64xf32>
    %cst_7 = arith.constant dense<0.000000e+00> : vector<16xf32>
    %11 = vector.multi_reduction <add>, %10, %cst_7 [1] : vector<16x64xf32> to vector<16xf32>
    %12 = vector.shape_cast %11 : vector<16xf32> to vector<16x1xf32>
    %cst_8 = arith.constant 6.400000e+01 : f32
    %13 = vector.broadcast %cst_8 : f32 to vector<16x1xf32>
    %14 = arith.divf %12, %13 : vector<16x1xf32>
    %cst_9 = arith.constant 9.99999974E-6 : f32
    %15 = vector.broadcast %cst_9 : f32 to vector<16x1xf32>
    %16 = arith.addf %14, %15 : vector<16x1xf32>
    %17 = math.rsqrt %16 : vector<16x1xf32>
    %18 = vector.broadcast %17 : vector<16x1xf32> to vector<16x64xf32>
    %19 = arith.mulf %9, %18 : vector<16x64xf32>
    %20 = vector.broadcast %2 : vector<1x64xf32> to vector<16x64xf32>
    %21 = arith.mulf %19, %20 : vector<16x64xf32>
    %22 = vector.broadcast %3 : vector<1x64xf32> to vector<16x64xf32>
    %23 = arith.addf %21, %22 : vector<16x64xf32>
    %24 = arith.truncf %23 : vector<16x64xf32> to vector<16x64xbf16>
    %c0_10 = arith.constant 0 : index
    %c0_11 = arith.constant 0 : index
    %25 = vector.load %arg4[%c0_10, %c0_11] : memref<64x64xbf16, #tpu.memory_space<vmem>>, vector<64x64xbf16>
    %cst_12 = arith.constant dense<0.000000e+00> : vector<16x64xf32>
    %26 = tpu.matmul %24, %25, %cst_12 {dimension_numbers = #tpu.dot_dimension_numbers<[1], [0], [0], [1], [0, 0, 1, 1], [], []>} : vector<16x64xbf16>, vector<64x64xbf16>, vector<16x64xf32> -> vector<16x64xf32>
    %c0_13 = arith.constant 0 : index
    %c0_14 = arith.constant 0 : index
    %27 = vector.load %arg5[%c0_13, %c0_14] : memref<64x64xbf16, #tpu.memory_space<vmem>>, vector<64x64xbf16>
    %cst_15 = arith.constant dense<0.000000e+00> : vector<16x64xf32>
    %28 = tpu.matmul %24, %27, %cst_15 {dimension_numbers = #tpu.dot_dimension_numbers<[1], [0], [0], [1], [0, 0, 1, 1], [], []>} : vector<16x64xbf16>, vector<64x64xbf16>, vector<16x64xf32> -> vector<16x64xf32>
    %c0_16 = arith.constant 0 : index
    %c0_17 = arith.constant 0 : index
    %29 = vector.load %arg6[%c0_16, %c0_17] : memref<64x64xbf16, #tpu.memory_space<vmem>>, vector<64x64xbf16>
    %cst_18 = arith.constant dense<0.000000e+00> : vector<16x64xf32>
    %30 = tpu.matmul %24, %29, %cst_18 {dimension_numbers = #tpu.dot_dimension_numbers<[1], [0], [0], [1], [0, 0, 1, 1], [], []>} : vector<16x64xbf16>, vector<64x64xbf16>, vector<16x64xf32> -> vector<16x64xf32>
    %cst_19 = arith.constant 0.353553385 : f32
    %31 = vector.broadcast %cst_19 : f32 to vector<16x64xf32>
    %32 = arith.mulf %26, %31 : vector<16x64xf32>
    %33 = arith.truncf %32 : vector<16x64xf32> to vector<16x64xbf16>
    %34 = arith.truncf %28 : vector<16x64xf32> to vector<16x64xbf16>
    %35 = arith.truncf %30 : vector<16x64xf32> to vector<16x64xbf16>
    %36 = tpu.iota {dimensions = array<i32: 1>} : vector<1x16xi32>
    %c8_i32 = arith.constant 8 : i32
    %37 = vector.broadcast %c8_i32 : i32 to vector<1x16xi32>
    %38 = arith.cmpi slt, %36, %37 : vector<1x16xi32>
    %cst_20 = arith.constant 0.000000e+00 : f32
    %cst_21 = arith.constant -1.000000e+30 : f32
    %39 = vector.broadcast %cst_20 : f32 to vector<1x16xf32>
    %40 = vector.broadcast %cst_21 : f32 to vector<1x16xf32>
    %41 = arith.select %38, %39, %40 : vector<1x16xi1>, vector<1x16xf32>
    %42 = vector.extract_strided_slice %33 {offsets = [0, 0], sizes = [16, 8], strides = [1, 1]} : vector<16x64xbf16> to vector<16x8xbf16>
    %43 = vector.extract_strided_slice %34 {offsets = [0, 0], sizes = [16, 8], strides = [1, 1]} : vector<16x64xbf16> to vector<16x8xbf16>
    %44 = vector.extract_strided_slice %35 {offsets = [0, 0], sizes = [16, 8], strides = [1, 1]} : vector<16x64xbf16> to vector<16x8xbf16>
    %cst_22 = arith.constant dense<0.000000e+00> : vector<16x16xf32>
    %45 = tpu.matmul %42, %43, %cst_22 {dimension_numbers = #tpu.dot_dimension_numbers<[1], [1], [0], [0], [0, 0, 1, 0], [], []>} : vector<16x8xbf16>, vector<16x8xbf16>, vector<16x16xf32> -> vector<16x16xf32>
    %46 = vector.broadcast %41 : vector<1x16xf32> to vector<16x16xf32>
    %47 = arith.addf %45, %46 : vector<16x16xf32>
    %cst_23 = arith.constant dense<0xFF800000> : vector<16xf32>
    %48 = vector.multi_reduction <maximumf>, %47, %cst_23 [1] : vector<16x16xf32> to vector<16xf32>
    %49 = vector.shape_cast %48 : vector<16xf32> to vector<16x1xf32>
    %50 = vector.broadcast %49 : vector<16x1xf32> to vector<16x16xf32>
    %51 = arith.subf %47, %50 : vector<16x16xf32>
    %52 = math.exp %51 : vector<16x16xf32>
    %cst_24 = arith.constant dense<0.000000e+00> : vector<16xf32>
    %53 = vector.multi_reduction <add>, %52, %cst_24 [1] : vector<16x16xf32> to vector<16xf32>
    %54 = vector.shape_cast %53 : vector<16xf32> to vector<16x1xf32>
    %55 = arith.truncf %52 : vector<16x16xf32> to vector<16x16xbf16>
    %cst_25 = arith.constant dense<0.000000e+00> : vector<16x8xf32>
    %56 = tpu.matmul %55, %44, %cst_25 {dimension_numbers = #tpu.dot_dimension_numbers<[1], [0], [0], [1], [0, 0, 1, 1], [], []>} : vector<16x16xbf16>, vector<16x8xbf16>, vector<16x8xf32> -> vector<16x8xf32>
    %57 = tpu.reciprocal %54 {approx = true} : vector<16x1xf32> -> vector<16x1xf32>
    %58 = vector.broadcast %57 : vector<16x1xf32> to vector<16x8xf32>
    %59 = arith.mulf %56, %58 : vector<16x8xf32>
    %60 = vector.extract_strided_slice %33 {offsets = [0, 8], sizes = [16, 8], strides = [1, 1]} : vector<16x64xbf16> to vector<16x8xbf16>
    %61 = vector.extract_strided_slice %34 {offsets = [0, 8], sizes = [16, 8], strides = [1, 1]} : vector<16x64xbf16> to vector<16x8xbf16>
    %62 = vector.extract_strided_slice %35 {offsets = [0, 8], sizes = [16, 8], strides = [1, 1]} : vector<16x64xbf16> to vector<16x8xbf16>
    %cst_26 = arith.constant dense<0.000000e+00> : vector<16x16xf32>
    %63 = tpu.matmul %60, %61, %cst_26 {dimension_numbers = #tpu.dot_dimension_numbers<[1], [1], [0], [0], [0, 0, 1, 0], [], []>} : vector<16x8xbf16>, vector<16x8xbf16>, vector<16x16xf32> -> vector<16x16xf32>
    %64 = vector.broadcast %41 : vector<1x16xf32> to vector<16x16xf32>
    %65 = arith.addf %63, %64 : vector<16x16xf32>
    %cst_27 = arith.constant dense<0xFF800000> : vector<16xf32>
    %66 = vector.multi_reduction <maximumf>, %65, %cst_27 [1] : vector<16x16xf32> to vector<16xf32>
    %67 = vector.shape_cast %66 : vector<16xf32> to vector<16x1xf32>
    %68 = vector.broadcast %67 : vector<16x1xf32> to vector<16x16xf32>
    %69 = arith.subf %65, %68 : vector<16x16xf32>
    %70 = math.exp %69 : vector<16x16xf32>
    %cst_28 = arith.constant dense<0.000000e+00> : vector<16xf32>
    %71 = vector.multi_reduction <add>, %70, %cst_28 [1] : vector<16x16xf32> to vector<16xf32>
    %72 = vector.shape_cast %71 : vector<16xf32> to vector<16x1xf32>
    %73 = arith.truncf %70 : vector<16x16xf32> to vector<16x16xbf16>
    %cst_29 = arith.constant dense<0.000000e+00> : vector<16x8xf32>
    %74 = tpu.matmul %73, %62, %cst_29 {dimension_numbers = #tpu.dot_dimension_numbers<[1], [0], [0], [1], [0, 0, 1, 1], [], []>} : vector<16x16xbf16>, vector<16x8xbf16>, vector<16x8xf32> -> vector<16x8xf32>
    %75 = tpu.reciprocal %72 {approx = true} : vector<16x1xf32> -> vector<16x1xf32>
    %76 = vector.broadcast %75 : vector<16x1xf32> to vector<16x8xf32>
    %77 = arith.mulf %74, %76 : vector<16x8xf32>
    %78 = vector.extract_strided_slice %33 {offsets = [0, 16], sizes = [16, 8], strides = [1, 1]} : vector<16x64xbf16> to vector<16x8xbf16>
    %79 = vector.extract_strided_slice %34 {offsets = [0, 16], sizes = [16, 8], strides = [1, 1]} : vector<16x64xbf16> to vector<16x8xbf16>
    %80 = vector.extract_strided_slice %35 {offsets = [0, 16], sizes = [16, 8], strides = [1, 1]} : vector<16x64xbf16> to vector<16x8xbf16>
    %cst_30 = arith.constant dense<0.000000e+00> : vector<16x16xf32>
    %81 = tpu.matmul %78, %79, %cst_30 {dimension_numbers = #tpu.dot_dimension_numbers<[1], [1], [0], [0], [0, 0, 1, 0], [], []>} : vector<16x8xbf16>, vector<16x8xbf16>, vector<16x16xf32> -> vector<16x16xf32>
    %82 = vector.broadcast %41 : vector<1x16xf32> to vector<16x16xf32>
    %83 = arith.addf %81, %82 : vector<16x16xf32>
    %cst_31 = arith.constant dense<0xFF800000> : vector<16xf32>
    %84 = vector.multi_reduction <maximumf>, %83, %cst_31 [1] : vector<16x16xf32> to vector<16xf32>
    %85 = vector.shape_cast %84 : vector<16xf32> to vector<16x1xf32>
    %86 = vector.broadcast %85 : vector<16x1xf32> to vector<16x16xf32>
    %87 = arith.subf %83, %86 : vector<16x16xf32>
    %88 = math.exp %87 : vector<16x16xf32>
    %cst_32 = arith.constant dense<0.000000e+00> : vector<16xf32>
    %89 = vector.multi_reduction <add>, %88, %cst_32 [1] : vector<16x16xf32> to vector<16xf32>
    %90 = vector.shape_cast %89 : vector<16xf32> to vector<16x1xf32>
    %91 = arith.truncf %88 : vector<16x16xf32> to vector<16x16xbf16>
    %cst_33 = arith.constant dense<0.000000e+00> : vector<16x8xf32>
    %92 = tpu.matmul %91, %80, %cst_33 {dimension_numbers = #tpu.dot_dimension_numbers<[1], [0], [0], [1], [0, 0, 1, 1], [], []>} : vector<16x16xbf16>, vector<16x8xbf16>, vector<16x8xf32> -> vector<16x8xf32>
    %93 = tpu.reciprocal %90 {approx = true} : vector<16x1xf32> -> vector<16x1xf32>
    %94 = vector.broadcast %93 : vector<16x1xf32> to vector<16x8xf32>
    %95 = arith.mulf %92, %94 : vector<16x8xf32>
    %96 = vector.extract_strided_slice %33 {offsets = [0, 24], sizes = [16, 8], strides = [1, 1]} : vector<16x64xbf16> to vector<16x8xbf16>
    %97 = vector.extract_strided_slice %34 {offsets = [0, 24], sizes = [16, 8], strides = [1, 1]} : vector<16x64xbf16> to vector<16x8xbf16>
    %98 = vector.extract_strided_slice %35 {offsets = [0, 24], sizes = [16, 8], strides = [1, 1]} : vector<16x64xbf16> to vector<16x8xbf16>
    %cst_34 = arith.constant dense<0.000000e+00> : vector<16x16xf32>
    %99 = tpu.matmul %96, %97, %cst_34 {dimension_numbers = #tpu.dot_dimension_numbers<[1], [1], [0], [0], [0, 0, 1, 0], [], []>} : vector<16x8xbf16>, vector<16x8xbf16>, vector<16x16xf32> -> vector<16x16xf32>
    %100 = vector.broadcast %41 : vector<1x16xf32> to vector<16x16xf32>
    %101 = arith.addf %99, %100 : vector<16x16xf32>
    %cst_35 = arith.constant dense<0xFF800000> : vector<16xf32>
    %102 = vector.multi_reduction <maximumf>, %101, %cst_35 [1] : vector<16x16xf32> to vector<16xf32>
    %103 = vector.shape_cast %102 : vector<16xf32> to vector<16x1xf32>
    %104 = vector.broadcast %103 : vector<16x1xf32> to vector<16x16xf32>
    %105 = arith.subf %101, %104 : vector<16x16xf32>
    %106 = math.exp %105 : vector<16x16xf32>
    %cst_36 = arith.constant dense<0.000000e+00> : vector<16xf32>
    %107 = vector.multi_reduction <add>, %106, %cst_36 [1] : vector<16x16xf32> to vector<16xf32>
    %108 = vector.shape_cast %107 : vector<16xf32> to vector<16x1xf32>
    %109 = arith.truncf %106 : vector<16x16xf32> to vector<16x16xbf16>
    %cst_37 = arith.constant dense<0.000000e+00> : vector<16x8xf32>
    %110 = tpu.matmul %109, %98, %cst_37 {dimension_numbers = #tpu.dot_dimension_numbers<[1], [0], [0], [1], [0, 0, 1, 1], [], []>} : vector<16x16xbf16>, vector<16x8xbf16>, vector<16x8xf32> -> vector<16x8xf32>
    %111 = tpu.reciprocal %108 {approx = true} : vector<16x1xf32> -> vector<16x1xf32>
    %112 = vector.broadcast %111 : vector<16x1xf32> to vector<16x8xf32>
    %113 = arith.mulf %110, %112 : vector<16x8xf32>
    %114 = vector.extract_strided_slice %33 {offsets = [0, 32], sizes = [16, 8], strides = [1, 1]} : vector<16x64xbf16> to vector<16x8xbf16>
    %115 = vector.extract_strided_slice %34 {offsets = [0, 32], sizes = [16, 8], strides = [1, 1]} : vector<16x64xbf16> to vector<16x8xbf16>
    %116 = vector.extract_strided_slice %35 {offsets = [0, 32], sizes = [16, 8], strides = [1, 1]} : vector<16x64xbf16> to vector<16x8xbf16>
    %cst_38 = arith.constant dense<0.000000e+00> : vector<16x16xf32>
    %117 = tpu.matmul %114, %115, %cst_38 {dimension_numbers = #tpu.dot_dimension_numbers<[1], [1], [0], [0], [0, 0, 1, 0], [], []>} : vector<16x8xbf16>, vector<16x8xbf16>, vector<16x16xf32> -> vector<16x16xf32>
    %118 = vector.broadcast %41 : vector<1x16xf32> to vector<16x16xf32>
    %119 = arith.addf %117, %118 : vector<16x16xf32>
    %cst_39 = arith.constant dense<0xFF800000> : vector<16xf32>
    %120 = vector.multi_reduction <maximumf>, %119, %cst_39 [1] : vector<16x16xf32> to vector<16xf32>
    %121 = vector.shape_cast %120 : vector<16xf32> to vector<16x1xf32>
    %122 = vector.broadcast %121 : vector<16x1xf32> to vector<16x16xf32>
    %123 = arith.subf %119, %122 : vector<16x16xf32>
    %124 = math.exp %123 : vector<16x16xf32>
    %cst_40 = arith.constant dense<0.000000e+00> : vector<16xf32>
    %125 = vector.multi_reduction <add>, %124, %cst_40 [1] : vector<16x16xf32> to vector<16xf32>
    %126 = vector.shape_cast %125 : vector<16xf32> to vector<16x1xf32>
    %127 = arith.truncf %124 : vector<16x16xf32> to vector<16x16xbf16>
    %cst_41 = arith.constant dense<0.000000e+00> : vector<16x8xf32>
    %128 = tpu.matmul %127, %116, %cst_41 {dimension_numbers = #tpu.dot_dimension_numbers<[1], [0], [0], [1], [0, 0, 1, 1], [], []>} : vector<16x16xbf16>, vector<16x8xbf16>, vector<16x8xf32> -> vector<16x8xf32>
    %129 = tpu.reciprocal %126 {approx = true} : vector<16x1xf32> -> vector<16x1xf32>
    %130 = vector.broadcast %129 : vector<16x1xf32> to vector<16x8xf32>
    %131 = arith.mulf %128, %130 : vector<16x8xf32>
    %132 = vector.extract_strided_slice %33 {offsets = [0, 40], sizes = [16, 8], strides = [1, 1]} : vector<16x64xbf16> to vector<16x8xbf16>
    %133 = vector.extract_strided_slice %34 {offsets = [0, 40], sizes = [16, 8], strides = [1, 1]} : vector<16x64xbf16> to vector<16x8xbf16>
    %134 = vector.extract_strided_slice %35 {offsets = [0, 40], sizes = [16, 8], strides = [1, 1]} : vector<16x64xbf16> to vector<16x8xbf16>
    %cst_42 = arith.constant dense<0.000000e+00> : vector<16x16xf32>
    %135 = tpu.matmul %132, %133, %cst_42 {dimension_numbers = #tpu.dot_dimension_numbers<[1], [1], [0], [0], [0, 0, 1, 0], [], []>} : vector<16x8xbf16>, vector<16x8xbf16>, vector<16x16xf32> -> vector<16x16xf32>
    %136 = vector.broadcast %41 : vector<1x16xf32> to vector<16x16xf32>
    %137 = arith.addf %135, %136 : vector<16x16xf32>
    %cst_43 = arith.constant dense<0xFF800000> : vector<16xf32>
    %138 = vector.multi_reduction <maximumf>, %137, %cst_43 [1] : vector<16x16xf32> to vector<16xf32>
    %139 = vector.shape_cast %138 : vector<16xf32> to vector<16x1xf32>
    %140 = vector.broadcast %139 : vector<16x1xf32> to vector<16x16xf32>
    %141 = arith.subf %137, %140 : vector<16x16xf32>
    %142 = math.exp %141 : vector<16x16xf32>
    %cst_44 = arith.constant dense<0.000000e+00> : vector<16xf32>
    %143 = vector.multi_reduction <add>, %142, %cst_44 [1] : vector<16x16xf32> to vector<16xf32>
    %144 = vector.shape_cast %143 : vector<16xf32> to vector<16x1xf32>
    %145 = arith.truncf %142 : vector<16x16xf32> to vector<16x16xbf16>
    %cst_45 = arith.constant dense<0.000000e+00> : vector<16x8xf32>
    %146 = tpu.matmul %145, %134, %cst_45 {dimension_numbers = #tpu.dot_dimension_numbers<[1], [0], [0], [1], [0, 0, 1, 1], [], []>} : vector<16x16xbf16>, vector<16x8xbf16>, vector<16x8xf32> -> vector<16x8xf32>
    %147 = tpu.reciprocal %144 {approx = true} : vector<16x1xf32> -> vector<16x1xf32>
    %148 = vector.broadcast %147 : vector<16x1xf32> to vector<16x8xf32>
    %149 = arith.mulf %146, %148 : vector<16x8xf32>
    %150 = vector.extract_strided_slice %33 {offsets = [0, 48], sizes = [16, 8], strides = [1, 1]} : vector<16x64xbf16> to vector<16x8xbf16>
    %151 = vector.extract_strided_slice %34 {offsets = [0, 48], sizes = [16, 8], strides = [1, 1]} : vector<16x64xbf16> to vector<16x8xbf16>
    %152 = vector.extract_strided_slice %35 {offsets = [0, 48], sizes = [16, 8], strides = [1, 1]} : vector<16x64xbf16> to vector<16x8xbf16>
    %cst_46 = arith.constant dense<0.000000e+00> : vector<16x16xf32>
    %153 = tpu.matmul %150, %151, %cst_46 {dimension_numbers = #tpu.dot_dimension_numbers<[1], [1], [0], [0], [0, 0, 1, 0], [], []>} : vector<16x8xbf16>, vector<16x8xbf16>, vector<16x16xf32> -> vector<16x16xf32>
    %154 = vector.broadcast %41 : vector<1x16xf32> to vector<16x16xf32>
    %155 = arith.addf %153, %154 : vector<16x16xf32>
    %cst_47 = arith.constant dense<0xFF800000> : vector<16xf32>
    %156 = vector.multi_reduction <maximumf>, %155, %cst_47 [1] : vector<16x16xf32> to vector<16xf32>
    %157 = vector.shape_cast %156 : vector<16xf32> to vector<16x1xf32>
    %158 = vector.broadcast %157 : vector<16x1xf32> to vector<16x16xf32>
    %159 = arith.subf %155, %158 : vector<16x16xf32>
    %160 = math.exp %159 : vector<16x16xf32>
    %cst_48 = arith.constant dense<0.000000e+00> : vector<16xf32>
    %161 = vector.multi_reduction <add>, %160, %cst_48 [1] : vector<16x16xf32> to vector<16xf32>
    %162 = vector.shape_cast %161 : vector<16xf32> to vector<16x1xf32>
    %163 = arith.truncf %160 : vector<16x16xf32> to vector<16x16xbf16>
    %cst_49 = arith.constant dense<0.000000e+00> : vector<16x8xf32>
    %164 = tpu.matmul %163, %152, %cst_49 {dimension_numbers = #tpu.dot_dimension_numbers<[1], [0], [0], [1], [0, 0, 1, 1], [], []>} : vector<16x16xbf16>, vector<16x8xbf16>, vector<16x8xf32> -> vector<16x8xf32>
    %165 = tpu.reciprocal %162 {approx = true} : vector<16x1xf32> -> vector<16x1xf32>
    %166 = vector.broadcast %165 : vector<16x1xf32> to vector<16x8xf32>
    %167 = arith.mulf %164, %166 : vector<16x8xf32>
    %168 = vector.extract_strided_slice %33 {offsets = [0, 56], sizes = [16, 8], strides = [1, 1]} : vector<16x64xbf16> to vector<16x8xbf16>
    %169 = vector.extract_strided_slice %34 {offsets = [0, 56], sizes = [16, 8], strides = [1, 1]} : vector<16x64xbf16> to vector<16x8xbf16>
    %170 = vector.extract_strided_slice %35 {offsets = [0, 56], sizes = [16, 8], strides = [1, 1]} : vector<16x64xbf16> to vector<16x8xbf16>
    %cst_50 = arith.constant dense<0.000000e+00> : vector<16x16xf32>
    %171 = tpu.matmul %168, %169, %cst_50 {dimension_numbers = #tpu.dot_dimension_numbers<[1], [1], [0], [0], [0, 0, 1, 0], [], []>} : vector<16x8xbf16>, vector<16x8xbf16>, vector<16x16xf32> -> vector<16x16xf32>
    %172 = vector.broadcast %41 : vector<1x16xf32> to vector<16x16xf32>
    %173 = arith.addf %171, %172 : vector<16x16xf32>
    %cst_51 = arith.constant dense<0xFF800000> : vector<16xf32>
    %174 = vector.multi_reduction <maximumf>, %173, %cst_51 [1] : vector<16x16xf32> to vector<16xf32>
    %175 = vector.shape_cast %174 : vector<16xf32> to vector<16x1xf32>
    %176 = vector.broadcast %175 : vector<16x1xf32> to vector<16x16xf32>
    %177 = arith.subf %173, %176 : vector<16x16xf32>
    %178 = math.exp %177 : vector<16x16xf32>
    %cst_52 = arith.constant dense<0.000000e+00> : vector<16xf32>
    %179 = vector.multi_reduction <add>, %178, %cst_52 [1] : vector<16x16xf32> to vector<16xf32>
    %180 = vector.shape_cast %179 : vector<16xf32> to vector<16x1xf32>
    %181 = arith.truncf %178 : vector<16x16xf32> to vector<16x16xbf16>
    %cst_53 = arith.constant dense<0.000000e+00> : vector<16x8xf32>
    %182 = tpu.matmul %181, %170, %cst_53 {dimension_numbers = #tpu.dot_dimension_numbers<[1], [0], [0], [1], [0, 0, 1, 1], [], []>} : vector<16x16xbf16>, vector<16x8xbf16>, vector<16x8xf32> -> vector<16x8xf32>
    %183 = tpu.reciprocal %180 {approx = true} : vector<16x1xf32> -> vector<16x1xf32>
    %184 = vector.broadcast %183 : vector<16x1xf32> to vector<16x8xf32>
    %185 = arith.mulf %182, %184 : vector<16x8xf32>
    %186 = tpu.concatenate %59, %77, %95, %113, %131, %149, %167, %185 in 1 : vector<16x8xf32>, vector<16x8xf32>, vector<16x8xf32>, vector<16x8xf32>, vector<16x8xf32>, vector<16x8xf32>, vector<16x8xf32>, vector<16x8xf32> -> vector<16x64xf32>
    %c0_54 = arith.constant 0 : index
    %c0_55 = arith.constant 0 : index
    %187 = vector.load %arg15[%c0_54, %c0_55] : memref<16x64xf32, #tpu.memory_space<vmem>>, vector<16x64xf32>
    tpu.vector_store %arg15[%c0_54, %c0_55], %186 {strides = array<i32>} : memref<16x64xf32, #tpu.memory_space<vmem>>, vector<16x64xf32>,
    %c0_56 = arith.constant 0 : index
    %c0_57 = arith.constant 0 : index
    %188 = vector.load %arg15[%c0_56, %c0_57] : memref<16x64xf32, #tpu.memory_space<vmem>>, vector<16x64xf32>
    %189 = arith.truncf %188 : vector<16x64xf32> to vector<16x64xbf16>
    %c0_58 = arith.constant 0 : index
    %c0_59 = arith.constant 0 : index
    %190 = vector.load %arg7[%c0_58, %c0_59] : memref<64x64xbf16, #tpu.memory_space<vmem>>, vector<64x64xbf16>
    %cst_60 = arith.constant dense<0.000000e+00> : vector<16x64xf32>
    %191 = tpu.matmul %189, %190, %cst_60 {dimension_numbers = #tpu.dot_dimension_numbers<[1], [0], [0], [1], [0, 0, 1, 1], [], []>} : vector<16x64xbf16>, vector<64x64xbf16>, vector<16x64xf32> -> vector<16x64xf32>
    %192 = arith.addf %1, %191 : vector<16x64xf32>
    %c0_61 = arith.constant 0 : index
    %c0_62 = arith.constant 0 : index
    %193 = vector.load %arg8[%c0_61, %c0_62] : memref<1x64xf32, #tpu.memory_space<vmem>>, vector<1x64xf32>
    %c0_63 = arith.constant 0 : index
    %c0_64 = arith.constant 0 : index
    %194 = vector.load %arg9[%c0_63, %c0_64] : memref<1x64xf32, #tpu.memory_space<vmem>>, vector<1x64xf32>
    %cst_65 = arith.constant dense<0.000000e+00> : vector<16xf32>
    %195 = vector.multi_reduction <add>, %192, %cst_65 [1] : vector<16x64xf32> to vector<16xf32>
    %196 = vector.shape_cast %195 : vector<16xf32> to vector<16x1xf32>
    %cst_66 = arith.constant 6.400000e+01 : f32
    %197 = vector.broadcast %cst_66 : f32 to vector<16x1xf32>
    %198 = arith.divf %196, %197 : vector<16x1xf32>
    %199 = vector.broadcast %198 : vector<16x1xf32> to vector<16x64xf32>
    %200 = arith.subf %192, %199 : vector<16x64xf32>
    %201 = arith.mulf %200, %200 : vector<16x64xf32>
    %cst_67 = arith.constant dense<0.000000e+00> : vector<16xf32>
    %202 = vector.multi_reduction <add>, %201, %cst_67 [1] : vector<16x64xf32> to vector<16xf32>
    %203 = vector.shape_cast %202 : vector<16xf32> to vector<16x1xf32>
    %cst_68 = arith.constant 6.400000e+01 : f32
    %204 = vector.broadcast %cst_68 : f32 to vector<16x1xf32>
    %205 = arith.divf %203, %204 : vector<16x1xf32>
    %cst_69 = arith.constant 9.99999974E-6 : f32
    %206 = vector.broadcast %cst_69 : f32 to vector<16x1xf32>
    %207 = arith.addf %205, %206 : vector<16x1xf32>
    %208 = math.rsqrt %207 : vector<16x1xf32>
    %209 = vector.broadcast %208 : vector<16x1xf32> to vector<16x64xf32>
    %210 = arith.mulf %200, %209 : vector<16x64xf32>
    %211 = vector.broadcast %193 : vector<1x64xf32> to vector<16x64xf32>
    %212 = arith.mulf %210, %211 : vector<16x64xf32>
    %213 = vector.broadcast %194 : vector<1x64xf32> to vector<16x64xf32>
    %214 = arith.addf %212, %213 : vector<16x64xf32>
    %215 = arith.truncf %214 : vector<16x64xf32> to vector<16x64xbf16>
    %c0_70 = arith.constant 0 : index
    %c0_71 = arith.constant 0 : index
    %216 = vector.load %arg10[%c0_70, %c0_71] : memref<64x256xbf16, #tpu.memory_space<vmem>>, vector<64x256xbf16>
    %cst_72 = arith.constant dense<0.000000e+00> : vector<16x256xf32>
    %217 = tpu.matmul %215, %216, %cst_72 {dimension_numbers = #tpu.dot_dimension_numbers<[1], [0], [0], [1], [0, 0, 1, 1], [], []>} : vector<16x64xbf16>, vector<64x256xbf16>, vector<16x256xf32> -> vector<16x256xf32>
    %c0_73 = arith.constant 0 : index
    %c0_74 = arith.constant 0 : index
    %218 = vector.load %arg11[%c0_73, %c0_74] : memref<1x256xf32, #tpu.memory_space<vmem>>, vector<1x256xf32>
    %219 = vector.broadcast %218 : vector<1x256xf32> to vector<16x256xf32>
    %220 = arith.addf %217, %219 : vector<16x256xf32>
    %cst_75 = arith.constant 5.000000e-01 : f32
    %221 = vector.broadcast %cst_75 : f32 to vector<16x256xf32>
    %222 = arith.mulf %221, %220 : vector<16x256xf32>
    %cst_76 = arith.constant 0.707106769 : f32
    %223 = vector.broadcast %cst_76 : f32 to vector<16x256xf32>
    %224 = arith.mulf %220, %223 : vector<16x256xf32>
    %225 = math.erf %224 : vector<16x256xf32>
    %cst_77 = arith.constant 1.000000e+00 : f32
    %226 = vector.broadcast %cst_77 : f32 to vector<16x256xf32>
    %227 = arith.addf %226, %225 : vector<16x256xf32>
    %228 = arith.mulf %222, %227 : vector<16x256xf32>
    %229 = arith.truncf %228 : vector<16x256xf32> to vector<16x256xbf16>
    %c0_78 = arith.constant 0 : index
    %c0_79 = arith.constant 0 : index
    %230 = vector.load %arg12[%c0_78, %c0_79] : memref<256x64xbf16, #tpu.memory_space<vmem>>, vector<256x64xbf16>
    %cst_80 = arith.constant dense<0.000000e+00> : vector<16x64xf32>
    %231 = tpu.matmul %229, %230, %cst_80 {dimension_numbers = #tpu.dot_dimension_numbers<[1], [0], [0], [1], [0, 0, 1, 1], [], []>} : vector<16x256xbf16>, vector<256x64xbf16>, vector<16x64xf32> -> vector<16x64xf32>
    %c0_81 = arith.constant 0 : index
    %c0_82 = arith.constant 0 : index
    %232 = vector.load %arg13[%c0_81, %c0_82] : memref<1x64xf32, #tpu.memory_space<vmem>>, vector<1x64xf32>
    %233 = vector.broadcast %232 : vector<1x64xf32> to vector<16x64xf32>
    %234 = arith.addf %231, %233 : vector<16x64xf32>
    %235 = arith.addf %192, %234 : vector<16x64xf32>
    %c0_83 = arith.constant 0 : index
    %c0_84 = arith.constant 0 : index
    %c0_85 = arith.constant 0 : index
    %236 = vector.load %arg14[%c0_83, %c0_84, %c0_85] : memref<1x16x64xf32, #tpu.memory_space<vmem>>, vector<1x16x64xf32>
    %237 = vector.shape_cast %236 : vector<1x16x64xf32> to vector<16x64xf32>
    %238 = vector.shape_cast %235 : vector<16x64xf32> to vector<1x16x64xf32>
    tpu.vector_store %arg14[%c0_83, %c0_84, %c0_85], %238 {strides = array<i32>} : memref<1x16x64xf32, #tpu.memory_space<vmem>>, vector<1x16x64xf32>,
    return
  }
  func.func @transform_0(%arg0: i32) -> (i32, i32, i32) {
    %c0_i32 = arith.constant 0 : i32
    %c0_i32_0 = arith.constant 0 : i32
    %c0_i32_1 = arith.constant 0 : i32
    return %arg0, %c0_i32, %c0_i32_0 : i32, i32, i32
  }
  func.func @transform_1(%arg0: i32) -> (i32, i32) {
    %c0_i32 = arith.constant 0 : i32
    %c0_i32_0 = arith.constant 0 : i32
    %c0_i32_1 = arith.constant 0 : i32
    return %c0_i32, %c0_i32_0 : i32, i32
  }
  func.func @transform_2(%arg0: i32) -> (i32, i32) {
    %c0_i32 = arith.constant 0 : i32
    %c0_i32_0 = arith.constant 0 : i32
    %c0_i32_1 = arith.constant 0 : i32
    return %c0_i32, %c0_i32_0 : i32, i32
  }
  func.func @transform_3(%arg0: i32) -> (i32, i32) {
    %c0_i32 = arith.constant 0 : i32
    %c0_i32_0 = arith.constant 0 : i32
    %c0_i32_1 = arith.constant 0 : i32
    return %c0_i32, %c0_i32_0 : i32, i32
  }
  func.func @transform_4(%arg0: i32) -> (i32, i32) {
    %c0_i32 = arith.constant 0 : i32
    %c0_i32_0 = arith.constant 0 : i32
    %c0_i32_1 = arith.constant 0 : i32
    return %c0_i32, %c0_i32_0 : i32, i32
  }
  func.func @transform_5(%arg0: i32) -> (i32, i32) {
    %c0_i32 = arith.constant 0 : i32
    %c0_i32_0 = arith.constant 0 : i32
    %c0_i32_1 = arith.constant 0 : i32
    return %c0_i32, %c0_i32_0 : i32, i32
  }
  func.func @transform_6(%arg0: i32) -> (i32, i32) {
    %c0_i32 = arith.constant 0 : i32
    %c0_i32_0 = arith.constant 0 : i32
    %c0_i32_1 = arith.constant 0 : i32
    return %c0_i32, %c0_i32_0 : i32, i32
  }
  func.func @transform_7(%arg0: i32) -> (i32, i32) {
    %c0_i32 = arith.constant 0 : i32
    %c0_i32_0 = arith.constant 0 : i32
    %c0_i32_1 = arith.constant 0 : i32
    return %c0_i32, %c0_i32_0 : i32, i32
  }
  func.func @transform_8(%arg0: i32) -> (i32, i32) {
    %c0_i32 = arith.constant 0 : i32
    %c0_i32_0 = arith.constant 0 : i32
    %c0_i32_1 = arith.constant 0 : i32
    return %c0_i32, %c0_i32_0 : i32, i32
  }
  func.func @transform_9(%arg0: i32) -> (i32, i32) {
    %c0_i32 = arith.constant 0 : i32
    %c0_i32_0 = arith.constant 0 : i32
    %c0_i32_1 = arith.constant 0 : i32
    return %c0_i32, %c0_i32_0 : i32, i32
  }
  func.func @transform_10(%arg0: i32) -> (i32, i32) {
    %c0_i32 = arith.constant 0 : i32
    %c0_i32_0 = arith.constant 0 : i32
    %c0_i32_1 = arith.constant 0 : i32
    return %c0_i32, %c0_i32_0 : i32, i32
  }
  func.func @transform_11(%arg0: i32) -> (i32, i32) {
    %c0_i32 = arith.constant 0 : i32
    %c0_i32_0 = arith.constant 0 : i32
    %c0_i32_1 = arith.constant 0 : i32
    return %c0_i32, %c0_i32_0 : i32, i32
  }
  func.func @transform_12(%arg0: i32) -> (i32, i32) {
    %c0_i32 = arith.constant 0 : i32
    %c0_i32_0 = arith.constant 0 : i32
    %c0_i32_1 = arith.constant 0 : i32
    return %c0_i32, %c0_i32_0 : i32, i32
  }
  func.func @transform_13(%arg0: i32) -> (i32, i32, i32) {
    %c0_i32 = arith.constant 0 : i32
    %c0_i32_0 = arith.constant 0 : i32
    %c0_i32_1 = arith.constant 0 : i32
    return %arg0, %c0_i32, %c0_i32_0 : i32, i32, i32
  }
}

module attributes {stable_mosaic.version = 11 : i64} {
  func.func @_block_kernel(%arg0: i32, %arg1: memref<1x16x64xf32, #tpu.memory_space<vmem>>, %arg2: memref<1x64xf32, #tpu.memory_space<vmem>>, %arg3: memref<1x64xf32, #tpu.memory_space<vmem>>, %arg4: memref<64x64xbf16, #tpu.memory_space<vmem>>, %arg5: memref<64x64xbf16, #tpu.memory_space<vmem>>, %arg6: memref<64x64xbf16, #tpu.memory_space<vmem>>, %arg7: memref<64x64xbf16, #tpu.memory_space<vmem>>, %arg8: memref<1x64xf32, #tpu.memory_space<vmem>>, %arg9: memref<1x64xf32, #tpu.memory_space<vmem>>, %arg10: memref<64x256xbf16, #tpu.memory_space<vmem>>, %arg11: memref<1x256xf32, #tpu.memory_space<vmem>>, %arg12: memref<256x64xbf16, #tpu.memory_space<vmem>>, %arg13: memref<1x64xf32, #tpu.memory_space<vmem>>, %arg14: memref<1x16x64xf32, #tpu.memory_space<vmem>>, %arg15: memref<16x64xf32, #tpu.memory_space<vmem>>) attributes {dimension_semantics = [#tpu.dimension_semantics<parallel>], iteration_bounds = array<i64: 2>, scalar_prefetch = 0 : i64, scratch_operands = 1 : i64, tpu.core_type = #tpu.core_type<tc>, window_params = [{transform_indices = @transform_0, window_bounds = array<i64: 1, 16, 64>}, {pipeline_mode = #tpu.pipeline_mode<synchronous>, transform_indices = @transform_1, window_bounds = array<i64: 1, 64>}, {pipeline_mode = #tpu.pipeline_mode<synchronous>, transform_indices = @transform_2, window_bounds = array<i64: 1, 64>}, {pipeline_mode = #tpu.pipeline_mode<synchronous>, transform_indices = @transform_3, window_bounds = array<i64: 64, 64>}, {pipeline_mode = #tpu.pipeline_mode<synchronous>, transform_indices = @transform_4, window_bounds = array<i64: 64, 64>}, {pipeline_mode = #tpu.pipeline_mode<synchronous>, transform_indices = @transform_5, window_bounds = array<i64: 64, 64>}, {pipeline_mode = #tpu.pipeline_mode<synchronous>, transform_indices = @transform_6, window_bounds = array<i64: 64, 64>}, {pipeline_mode = #tpu.pipeline_mode<synchronous>, transform_indices = @transform_7, window_bounds = array<i64: 1, 64>}, {pipeline_mode = #tpu.pipeline_mode<synchronous>, transform_indices = @transform_8, window_bounds = array<i64: 1, 64>}, {pipeline_mode = #tpu.pipeline_mode<synchronous>, transform_indices = @transform_9, window_bounds = array<i64: 64, 256>}, {pipeline_mode = #tpu.pipeline_mode<synchronous>, transform_indices = @transform_10, window_bounds = array<i64: 1, 256>}, {pipeline_mode = #tpu.pipeline_mode<synchronous>, transform_indices = @transform_11, window_bounds = array<i64: 256, 64>}, {pipeline_mode = #tpu.pipeline_mode<synchronous>, transform_indices = @transform_12, window_bounds = array<i64: 1, 64>}, {transform_indices = @transform_13, window_bounds = array<i64: 1, 16, 64>}]} {
    %c0 = arith.constant 0 : index
    %c0_0 = arith.constant 0 : index
    %c0_1 = arith.constant 0 : index
    %0 = vector.load %arg1[%c0, %c0_0, %c0_1] : memref<1x16x64xf32, #tpu.memory_space<vmem>>, vector<1x16x64xf32>
    %1 = vector.shape_cast %0 : vector<1x16x64xf32> to vector<16x64xf32>
    %c0_2 = arith.constant 0 : index
    %c0_3 = arith.constant 0 : index
    %2 = vector.load %arg2[%c0_2, %c0_3] : memref<1x64xf32, #tpu.memory_space<vmem>>, vector<1x64xf32>
    %c0_4 = arith.constant 0 : index
    %c0_5 = arith.constant 0 : index
    %3 = vector.load %arg3[%c0_4, %c0_5] : memref<1x64xf32, #tpu.memory_space<vmem>>, vector<1x64xf32>
    %cst = arith.constant dense<0.000000e+00> : vector<16xf32>
    %4 = vector.multi_reduction <add>, %1, %cst [1] : vector<16x64xf32> to vector<16xf32>
    %5 = vector.shape_cast %4 : vector<16xf32> to vector<16x1xf32>
    %cst_6 = arith.constant 6.400000e+01 : f32
    %6 = vector.broadcast %cst_6 : f32 to vector<16x1xf32>
    %7 = arith.divf %5, %6 : vector<16x1xf32>
    %8 = vector.broadcast %7 : vector<16x1xf32> to vector<16x64xf32>
    %9 = arith.subf %1, %8 : vector<16x64xf32>
    %10 = arith.mulf %9, %9 : vector<16x64xf32>
    %cst_7 = arith.constant dense<0.000000e+00> : vector<16xf32>
    %11 = vector.multi_reduction <add>, %10, %cst_7 [1] : vector<16x64xf32> to vector<16xf32>
    %12 = vector.shape_cast %11 : vector<16xf32> to vector<16x1xf32>
    %cst_8 = arith.constant 6.400000e+01 : f32
    %13 = vector.broadcast %cst_8 : f32 to vector<16x1xf32>
    %14 = arith.divf %12, %13 : vector<16x1xf32>
    %cst_9 = arith.constant 9.99999974E-6 : f32
    %15 = vector.broadcast %cst_9 : f32 to vector<16x1xf32>
    %16 = arith.addf %14, %15 : vector<16x1xf32>
    %17 = math.rsqrt %16 : vector<16x1xf32>
    %18 = vector.broadcast %17 : vector<16x1xf32> to vector<16x64xf32>
    %19 = arith.mulf %9, %18 : vector<16x64xf32>
    %20 = vector.broadcast %2 : vector<1x64xf32> to vector<16x64xf32>
    %21 = arith.mulf %19, %20 : vector<16x64xf32>
    %22 = vector.broadcast %3 : vector<1x64xf32> to vector<16x64xf32>
    %23 = arith.addf %21, %22 : vector<16x64xf32>
    %24 = arith.truncf %23 : vector<16x64xf32> to vector<16x64xbf16>
    %c0_10 = arith.constant 0 : index
    %c0_11 = arith.constant 0 : index
    %25 = vector.load %arg4[%c0_10, %c0_11] : memref<64x64xbf16, #tpu.memory_space<vmem>>, vector<64x64xbf16>
    %cst_12 = arith.constant dense<0.000000e+00> : vector<16x64xf32>
    %26 = tpu.matmul %24, %25, %cst_12 {dimension_numbers = #tpu.dot_dimension_numbers<[1], [0], [0], [1], [0, 0, 1, 1], [], []>} : vector<16x64xbf16>, vector<64x64xbf16>, vector<16x64xf32> -> vector<16x64xf32>
    %c0_13 = arith.constant 0 : index
    %c0_14 = arith.constant 0 : index
    %27 = vector.load %arg5[%c0_13, %c0_14] : memref<64x64xbf16, #tpu.memory_space<vmem>>, vector<64x64xbf16>
    %cst_15 = arith.constant dense<0.000000e+00> : vector<16x64xf32>
    %28 = tpu.matmul %24, %27, %cst_15 {dimension_numbers = #tpu.dot_dimension_numbers<[1], [0], [0], [1], [0, 0, 1, 1], [], []>} : vector<16x64xbf16>, vector<64x64xbf16>, vector<16x64xf32> -> vector<16x64xf32>
    %c0_16 = arith.constant 0 : index
    %c0_17 = arith.constant 0 : index
    %29 = vector.load %arg6[%c0_16, %c0_17] : memref<64x64xbf16, #tpu.memory_space<vmem>>, vector<64x64xbf16>
    %cst_18 = arith.constant dense<0.000000e+00> : vector<16x64xf32>
    %30 = tpu.matmul %24, %29, %cst_18 {dimension_numbers = #tpu.dot_dimension_numbers<[1], [0], [0], [1], [0, 0, 1, 1], [], []>} : vector<16x64xbf16>, vector<64x64xbf16>, vector<16x64xf32> -> vector<16x64xf32>
    %cst_19 = arith.constant 0.353553385 : f32
    %31 = vector.broadcast %cst_19 : f32 to vector<16x64xf32>
    %32 = arith.mulf %26, %31 : vector<16x64xf32>
    %33 = arith.truncf %32 : vector<16x64xf32> to vector<16x64xbf16>
    %34 = arith.truncf %28 : vector<16x64xf32> to vector<16x64xbf16>
    %35 = arith.truncf %30 : vector<16x64xf32> to vector<16x64xbf16>
    %36 = tpu.iota {dimensions = array<i32: 1>} : vector<1x16xi32>
    %c8_i32 = arith.constant 8 : i32
    %37 = vector.broadcast %c8_i32 : i32 to vector<1x16xi32>
    %38 = arith.cmpi slt, %36, %37 : vector<1x16xi32>
    %cst_20 = arith.constant 0.000000e+00 : f32
    %cst_21 = arith.constant -1.000000e+30 : f32
    %39 = vector.broadcast %cst_20 : f32 to vector<1x16xf32>
    %40 = vector.broadcast %cst_21 : f32 to vector<1x16xf32>
    %41 = arith.select %38, %39, %40 : vector<1x16xi1>, vector<1x16xf32>
    %42 = vector.extract_strided_slice %33 {offsets = [0, 0], sizes = [16, 8], strides = [1, 1]} : vector<16x64xbf16> to vector<16x8xbf16>
    %43 = vector.extract_strided_slice %34 {offsets = [0, 0], sizes = [16, 8], strides = [1, 1]} : vector<16x64xbf16> to vector<16x8xbf16>
    %44 = vector.extract_strided_slice %35 {offsets = [0, 0], sizes = [16, 8], strides = [1, 1]} : vector<16x64xbf16> to vector<16x8xbf16>
    %cst_22 = arith.constant dense<0.000000e+00> : vector<16x16xf32>
    %45 = tpu.matmul %42, %43, %cst_22 {dimension_numbers = #tpu.dot_dimension_numbers<[1], [1], [0], [0], [0, 0, 1, 0], [], []>} : vector<16x8xbf16>, vector<16x8xbf16>, vector<16x16xf32> -> vector<16x16xf32>
    %46 = vector.broadcast %41 : vector<1x16xf32> to vector<16x16xf32>
    %47 = arith.addf %45, %46 : vector<16x16xf32>
    %cst_23 = arith.constant dense<0xFF800000> : vector<16xf32>
    %48 = vector.multi_reduction <maximumf>, %47, %cst_23 [1] : vector<16x16xf32> to vector<16xf32>
    %49 = vector.shape_cast %48 : vector<16xf32> to vector<16x1xf32>
    %50 = vector.broadcast %49 : vector<16x1xf32> to vector<16x16xf32>
    %51 = arith.subf %47, %50 : vector<16x16xf32>
    %52 = math.exp %51 : vector<16x16xf32>
    %cst_24 = arith.constant dense<0.000000e+00> : vector<16xf32>
    %53 = vector.multi_reduction <add>, %52, %cst_24 [1] : vector<16x16xf32> to vector<16xf32>
    %54 = vector.shape_cast %53 : vector<16xf32> to vector<16x1xf32>
    %55 = arith.truncf %52 : vector<16x16xf32> to vector<16x16xbf16>
    %cst_25 = arith.constant dense<0.000000e+00> : vector<16x8xf32>
    %56 = tpu.matmul %55, %44, %cst_25 {dimension_numbers = #tpu.dot_dimension_numbers<[1], [0], [0], [1], [0, 0, 1, 1], [], []>} : vector<16x16xbf16>, vector<16x8xbf16>, vector<16x8xf32> -> vector<16x8xf32>
    %57 = tpu.reciprocal %54 {approx = true} : vector<16x1xf32> -> vector<16x1xf32>
    %58 = vector.broadcast %57 : vector<16x1xf32> to vector<16x8xf32>
    %59 = arith.mulf %56, %58 : vector<16x8xf32>
    %60 = vector.extract_strided_slice %33 {offsets = [0, 8], sizes = [16, 8], strides = [1, 1]} : vector<16x64xbf16> to vector<16x8xbf16>
    %61 = vector.extract_strided_slice %34 {offsets = [0, 8], sizes = [16, 8], strides = [1, 1]} : vector<16x64xbf16> to vector<16x8xbf16>
    %62 = vector.extract_strided_slice %35 {offsets = [0, 8], sizes = [16, 8], strides = [1, 1]} : vector<16x64xbf16> to vector<16x8xbf16>
    %cst_26 = arith.constant dense<0.000000e+00> : vector<16x16xf32>
    %63 = tpu.matmul %60, %61, %cst_26 {dimension_numbers = #tpu.dot_dimension_numbers<[1], [1], [0], [0], [0, 0, 1, 0], [], []>} : vector<16x8xbf16>, vector<16x8xbf16>, vector<16x16xf32> -> vector<16x16xf32>
    %64 = vector.broadcast %41 : vector<1x16xf32> to vector<16x16xf32>
    %65 = arith.addf %63, %64 : vector<16x16xf32>
    %cst_27 = arith.constant dense<0xFF800000> : vector<16xf32>
    %66 = vector.multi_reduction <maximumf>, %65, %cst_27 [1] : vector<16x16xf32> to vector<16xf32>
    %67 = vector.shape_cast %66 : vector<16xf32> to vector<16x1xf32>
    %68 = vector.broadcast %67 : vector<16x1xf32> to vector<16x16xf32>
    %69 = arith.subf %65, %68 : vector<16x16xf32>
    %70 = math.exp %69 : vector<16x16xf32>
    %cst_28 = arith.constant dense<0.000000e+00> : vector<16xf32>
    %71 = vector.multi_reduction <add>, %70, %cst_28 [1] : vector<16x16xf32> to vector<16xf32>
    %72 = vector.shape_cast %71 : vector<16xf32> to vector<16x1xf32>
    %73 = arith.truncf %70 : vector<16x16xf32> to vector<16x16xbf16>
    %cst_29 = arith.constant dense<0.000000e+00> : vector<16x8xf32>
    %74 = tpu.matmul %73, %62, %cst_29 {dimension_numbers = #tpu.dot_dimension_numbers<[1], [0], [0], [1], [0, 0, 1, 1], [], []>} : vector<16x16xbf16>, vector<16x8xbf16>, vector<16x8xf32> -> vector<16x8xf32>
    %75 = tpu.reciprocal %72 {approx = true} : vector<16x1xf32> -> vector<16x1xf32>
    %76 = vector.broadcast %75 : vector<16x1xf32> to vector<16x8xf32>
    %77 = arith.mulf %74, %76 : vector<16x8xf32>
    %78 = vector.extract_strided_slice %33 {offsets = [0, 16], sizes = [16, 8], strides = [1, 1]} : vector<16x64xbf16> to vector<16x8xbf16>
    %79 = vector.extract_strided_slice %34 {offsets = [0, 16], sizes = [16, 8], strides = [1, 1]} : vector<16x64xbf16> to vector<16x8xbf16>
    %80 = vector.extract_strided_slice %35 {offsets = [0, 16], sizes = [16, 8], strides = [1, 1]} : vector<16x64xbf16> to vector<16x8xbf16>
    %cst_30 = arith.constant dense<0.000000e+00> : vector<16x16xf32>
    %81 = tpu.matmul %78, %79, %cst_30 {dimension_numbers = #tpu.dot_dimension_numbers<[1], [1], [0], [0], [0, 0, 1, 0], [], []>} : vector<16x8xbf16>, vector<16x8xbf16>, vector<16x16xf32> -> vector<16x16xf32>
    %82 = vector.broadcast %41 : vector<1x16xf32> to vector<16x16xf32>
    %83 = arith.addf %81, %82 : vector<16x16xf32>
    %cst_31 = arith.constant dense<0xFF800000> : vector<16xf32>
    %84 = vector.multi_reduction <maximumf>, %83, %cst_31 [1] : vector<16x16xf32> to vector<16xf32>
    %85 = vector.shape_cast %84 : vector<16xf32> to vector<16x1xf32>
    %86 = vector.broadcast %85 : vector<16x1xf32> to vector<16x16xf32>
    %87 = arith.subf %83, %86 : vector<16x16xf32>
    %88 = math.exp %87 : vector<16x16xf32>
    %cst_32 = arith.constant dense<0.000000e+00> : vector<16xf32>
    %89 = vector.multi_reduction <add>, %88, %cst_32 [1] : vector<16x16xf32> to vector<16xf32>
    %90 = vector.shape_cast %89 : vector<16xf32> to vector<16x1xf32>
    %91 = arith.truncf %88 : vector<16x16xf32> to vector<16x16xbf16>
    %cst_33 = arith.constant dense<0.000000e+00> : vector<16x8xf32>
    %92 = tpu.matmul %91, %80, %cst_33 {dimension_numbers = #tpu.dot_dimension_numbers<[1], [0], [0], [1], [0, 0, 1, 1], [], []>} : vector<16x16xbf16>, vector<16x8xbf16>, vector<16x8xf32> -> vector<16x8xf32>
    %93 = tpu.reciprocal %90 {approx = true} : vector<16x1xf32> -> vector<16x1xf32>
    %94 = vector.broadcast %93 : vector<16x1xf32> to vector<16x8xf32>
    %95 = arith.mulf %92, %94 : vector<16x8xf32>
    %96 = vector.extract_strided_slice %33 {offsets = [0, 24], sizes = [16, 8], strides = [1, 1]} : vector<16x64xbf16> to vector<16x8xbf16>
    %97 = vector.extract_strided_slice %34 {offsets = [0, 24], sizes = [16, 8], strides = [1, 1]} : vector<16x64xbf16> to vector<16x8xbf16>
    %98 = vector.extract_strided_slice %35 {offsets = [0, 24], sizes = [16, 8], strides = [1, 1]} : vector<16x64xbf16> to vector<16x8xbf16>
    %cst_34 = arith.constant dense<0.000000e+00> : vector<16x16xf32>
    %99 = tpu.matmul %96, %97, %cst_34 {dimension_numbers = #tpu.dot_dimension_numbers<[1], [1], [0], [0], [0, 0, 1, 0], [], []>} : vector<16x8xbf16>, vector<16x8xbf16>, vector<16x16xf32> -> vector<16x16xf32>
    %100 = vector.broadcast %41 : vector<1x16xf32> to vector<16x16xf32>
    %101 = arith.addf %99, %100 : vector<16x16xf32>
    %cst_35 = arith.constant dense<0xFF800000> : vector<16xf32>
    %102 = vector.multi_reduction <maximumf>, %101, %cst_35 [1] : vector<16x16xf32> to vector<16xf32>
    %103 = vector.shape_cast %102 : vector<16xf32> to vector<16x1xf32>
    %104 = vector.broadcast %103 : vector<16x1xf32> to vector<16x16xf32>
    %105 = arith.subf %101, %104 : vector<16x16xf32>
    %106 = math.exp %105 : vector<16x16xf32>
    %cst_36 = arith.constant dense<0.000000e+00> : vector<16xf32>
    %107 = vector.multi_reduction <add>, %106, %cst_36 [1] : vector<16x16xf32> to vector<16xf32>
    %108 = vector.shape_cast %107 : vector<16xf32> to vector<16x1xf32>
    %109 = arith.truncf %106 : vector<16x16xf32> to vector<16x16xbf16>
    %cst_37 = arith.constant dense<0.000000e+00> : vector<16x8xf32>
    %110 = tpu.matmul %109, %98, %cst_37 {dimension_numbers = #tpu.dot_dimension_numbers<[1], [0], [0], [1], [0, 0, 1, 1], [], []>} : vector<16x16xbf16>, vector<16x8xbf16>, vector<16x8xf32> -> vector<16x8xf32>
    %111 = tpu.reciprocal %108 {approx = true} : vector<16x1xf32> -> vector<16x1xf32>
    %112 = vector.broadcast %111 : vector<16x1xf32> to vector<16x8xf32>
    %113 = arith.mulf %110, %112 : vector<16x8xf32>
    %114 = vector.extract_strided_slice %33 {offsets = [0, 32], sizes = [16, 8], strides = [1, 1]} : vector<16x64xbf16> to vector<16x8xbf16>
    %115 = vector.extract_strided_slice %34 {offsets = [0, 32], sizes = [16, 8], strides = [1, 1]} : vector<16x64xbf16> to vector<16x8xbf16>
    %116 = vector.extract_strided_slice %35 {offsets = [0, 32], sizes = [16, 8], strides = [1, 1]} : vector<16x64xbf16> to vector<16x8xbf16>
    %cst_38 = arith.constant dense<0.000000e+00> : vector<16x16xf32>
    %117 = tpu.matmul %114, %115, %cst_38 {dimension_numbers = #tpu.dot_dimension_numbers<[1], [1], [0], [0], [0, 0, 1, 0], [], []>} : vector<16x8xbf16>, vector<16x8xbf16>, vector<16x16xf32> -> vector<16x16xf32>
    %118 = vector.broadcast %41 : vector<1x16xf32> to vector<16x16xf32>
    %119 = arith.addf %117, %118 : vector<16x16xf32>
    %cst_39 = arith.constant dense<0xFF800000> : vector<16xf32>
    %120 = vector.multi_reduction <maximumf>, %119, %cst_39 [1] : vector<16x16xf32> to vector<16xf32>
    %121 = vector.shape_cast %120 : vector<16xf32> to vector<16x1xf32>
    %122 = vector.broadcast %121 : vector<16x1xf32> to vector<16x16xf32>
    %123 = arith.subf %119, %122 : vector<16x16xf32>
    %124 = math.exp %123 : vector<16x16xf32>
    %cst_40 = arith.constant dense<0.000000e+00> : vector<16xf32>
    %125 = vector.multi_reduction <add>, %124, %cst_40 [1] : vector<16x16xf32> to vector<16xf32>
    %126 = vector.shape_cast %125 : vector<16xf32> to vector<16x1xf32>
    %127 = arith.truncf %124 : vector<16x16xf32> to vector<16x16xbf16>
    %cst_41 = arith.constant dense<0.000000e+00> : vector<16x8xf32>
    %128 = tpu.matmul %127, %116, %cst_41 {dimension_numbers = #tpu.dot_dimension_numbers<[1], [0], [0], [1], [0, 0, 1, 1], [], []>} : vector<16x16xbf16>, vector<16x8xbf16>, vector<16x8xf32> -> vector<16x8xf32>
    %129 = tpu.reciprocal %126 {approx = true} : vector<16x1xf32> -> vector<16x1xf32>
    %130 = vector.broadcast %129 : vector<16x1xf32> to vector<16x8xf32>
    %131 = arith.mulf %128, %130 : vector<16x8xf32>
    %132 = vector.extract_strided_slice %33 {offsets = [0, 40], sizes = [16, 8], strides = [1, 1]} : vector<16x64xbf16> to vector<16x8xbf16>
    %133 = vector.extract_strided_slice %34 {offsets = [0, 40], sizes = [16, 8], strides = [1, 1]} : vector<16x64xbf16> to vector<16x8xbf16>
    %134 = vector.extract_strided_slice %35 {offsets = [0, 40], sizes = [16, 8], strides = [1, 1]} : vector<16x64xbf16> to vector<16x8xbf16>
    %cst_42 = arith.constant dense<0.000000e+00> : vector<16x16xf32>
    %135 = tpu.matmul %132, %133, %cst_42 {dimension_numbers = #tpu.dot_dimension_numbers<[1], [1], [0], [0], [0, 0, 1, 0], [], []>} : vector<16x8xbf16>, vector<16x8xbf16>, vector<16x16xf32> -> vector<16x16xf32>
    %136 = vector.broadcast %41 : vector<1x16xf32> to vector<16x16xf32>
    %137 = arith.addf %135, %136 : vector<16x16xf32>
    %cst_43 = arith.constant dense<0xFF800000> : vector<16xf32>
    %138 = vector.multi_reduction <maximumf>, %137, %cst_43 [1] : vector<16x16xf32> to vector<16xf32>
    %139 = vector.shape_cast %138 : vector<16xf32> to vector<16x1xf32>
    %140 = vector.broadcast %139 : vector<16x1xf32> to vector<16x16xf32>
    %141 = arith.subf %137, %140 : vector<16x16xf32>
    %142 = math.exp %141 : vector<16x16xf32>
    %cst_44 = arith.constant dense<0.000000e+00> : vector<16xf32>
    %143 = vector.multi_reduction <add>, %142, %cst_44 [1] : vector<16x16xf32> to vector<16xf32>
    %144 = vector.shape_cast %143 : vector<16xf32> to vector<16x1xf32>
    %145 = arith.truncf %142 : vector<16x16xf32> to vector<16x16xbf16>
    %cst_45 = arith.constant dense<0.000000e+00> : vector<16x8xf32>
    %146 = tpu.matmul %145, %134, %cst_45 {dimension_numbers = #tpu.dot_dimension_numbers<[1], [0], [0], [1], [0, 0, 1, 1], [], []>} : vector<16x16xbf16>, vector<16x8xbf16>, vector<16x8xf32> -> vector<16x8xf32>
    %147 = tpu.reciprocal %144 {approx = true} : vector<16x1xf32> -> vector<16x1xf32>
    %148 = vector.broadcast %147 : vector<16x1xf32> to vector<16x8xf32>
    %149 = arith.mulf %146, %148 : vector<16x8xf32>
    %150 = vector.extract_strided_slice %33 {offsets = [0, 48], sizes = [16, 8], strides = [1, 1]} : vector<16x64xbf16> to vector<16x8xbf16>
    %151 = vector.extract_strided_slice %34 {offsets = [0, 48], sizes = [16, 8], strides = [1, 1]} : vector<16x64xbf16> to vector<16x8xbf16>
    %152 = vector.extract_strided_slice %35 {offsets = [0, 48], sizes = [16, 8], strides = [1, 1]} : vector<16x64xbf16> to vector<16x8xbf16>
    %cst_46 = arith.constant dense<0.000000e+00> : vector<16x16xf32>
    %153 = tpu.matmul %150, %151, %cst_46 {dimension_numbers = #tpu.dot_dimension_numbers<[1], [1], [0], [0], [0, 0, 1, 0], [], []>} : vector<16x8xbf16>, vector<16x8xbf16>, vector<16x16xf32> -> vector<16x16xf32>
    %154 = vector.broadcast %41 : vector<1x16xf32> to vector<16x16xf32>
    %155 = arith.addf %153, %154 : vector<16x16xf32>
    %cst_47 = arith.constant dense<0xFF800000> : vector<16xf32>
    %156 = vector.multi_reduction <maximumf>, %155, %cst_47 [1] : vector<16x16xf32> to vector<16xf32>
    %157 = vector.shape_cast %156 : vector<16xf32> to vector<16x1xf32>
    %158 = vector.broadcast %157 : vector<16x1xf32> to vector<16x16xf32>
    %159 = arith.subf %155, %158 : vector<16x16xf32>
    %160 = math.exp %159 : vector<16x16xf32>
    %cst_48 = arith.constant dense<0.000000e+00> : vector<16xf32>
    %161 = vector.multi_reduction <add>, %160, %cst_48 [1] : vector<16x16xf32> to vector<16xf32>
    %162 = vector.shape_cast %161 : vector<16xf32> to vector<16x1xf32>
    %163 = arith.truncf %160 : vector<16x16xf32> to vector<16x16xbf16>
    %cst_49 = arith.constant dense<0.000000e+00> : vector<16x8xf32>
    %164 = tpu.matmul %163, %152, %cst_49 {dimension_numbers = #tpu.dot_dimension_numbers<[1], [0], [0], [1], [0, 0, 1, 1], [], []>} : vector<16x16xbf16>, vector<16x8xbf16>, vector<16x8xf32> -> vector<16x8xf32>
    %165 = tpu.reciprocal %162 {approx = true} : vector<16x1xf32> -> vector<16x1xf32>
    %166 = vector.broadcast %165 : vector<16x1xf32> to vector<16x8xf32>
    %167 = arith.mulf %164, %166 : vector<16x8xf32>
    %168 = vector.extract_strided_slice %33 {offsets = [0, 56], sizes = [16, 8], strides = [1, 1]} : vector<16x64xbf16> to vector<16x8xbf16>
    %169 = vector.extract_strided_slice %34 {offsets = [0, 56], sizes = [16, 8], strides = [1, 1]} : vector<16x64xbf16> to vector<16x8xbf16>
    %170 = vector.extract_strided_slice %35 {offsets = [0, 56], sizes = [16, 8], strides = [1, 1]} : vector<16x64xbf16> to vector<16x8xbf16>
    %cst_50 = arith.constant dense<0.000000e+00> : vector<16x16xf32>
    %171 = tpu.matmul %168, %169, %cst_50 {dimension_numbers = #tpu.dot_dimension_numbers<[1], [1], [0], [0], [0, 0, 1, 0], [], []>} : vector<16x8xbf16>, vector<16x8xbf16>, vector<16x16xf32> -> vector<16x16xf32>
    %172 = vector.broadcast %41 : vector<1x16xf32> to vector<16x16xf32>
    %173 = arith.addf %171, %172 : vector<16x16xf32>
    %cst_51 = arith.constant dense<0xFF800000> : vector<16xf32>
    %174 = vector.multi_reduction <maximumf>, %173, %cst_51 [1] : vector<16x16xf32> to vector<16xf32>
    %175 = vector.shape_cast %174 : vector<16xf32> to vector<16x1xf32>
    %176 = vector.broadcast %175 : vector<16x1xf32> to vector<16x16xf32>
    %177 = arith.subf %173, %176 : vector<16x16xf32>
    %178 = math.exp %177 : vector<16x16xf32>
    %cst_52 = arith.constant dense<0.000000e+00> : vector<16xf32>
    %179 = vector.multi_reduction <add>, %178, %cst_52 [1] : vector<16x16xf32> to vector<16xf32>
    %180 = vector.shape_cast %179 : vector<16xf32> to vector<16x1xf32>
    %181 = arith.truncf %178 : vector<16x16xf32> to vector<16x16xbf16>
    %cst_53 = arith.constant dense<0.000000e+00> : vector<16x8xf32>
    %182 = tpu.matmul %181, %170, %cst_53 {dimension_numbers = #tpu.dot_dimension_numbers<[1], [0], [0], [1], [0, 0, 1, 1], [], []>} : vector<16x16xbf16>, vector<16x8xbf16>, vector<16x8xf32> -> vector<16x8xf32>
    %183 = tpu.reciprocal %180 {approx = true} : vector<16x1xf32> -> vector<16x1xf32>
    %184 = vector.broadcast %183 : vector<16x1xf32> to vector<16x8xf32>
    %185 = arith.mulf %182, %184 : vector<16x8xf32>
    %186 = tpu.concatenate %59, %77, %95, %113, %131, %149, %167, %185 in 1 : vector<16x8xf32>, vector<16x8xf32>, vector<16x8xf32>, vector<16x8xf32>, vector<16x8xf32>, vector<16x8xf32>, vector<16x8xf32>, vector<16x8xf32> -> vector<16x64xf32>
    %c0_54 = arith.constant 0 : index
    %c0_55 = arith.constant 0 : index
    %187 = vector.load %arg15[%c0_54, %c0_55] : memref<16x64xf32, #tpu.memory_space<vmem>>, vector<16x64xf32>
    tpu.vector_store %arg15[%c0_54, %c0_55], %186 {strides = array<i32>} : memref<16x64xf32, #tpu.memory_space<vmem>>, vector<16x64xf32>,
    %c0_56 = arith.constant 0 : index
    %c0_57 = arith.constant 0 : index
    %188 = vector.load %arg15[%c0_56, %c0_57] : memref<16x64xf32, #tpu.memory_space<vmem>>, vector<16x64xf32>
    %189 = arith.truncf %188 : vector<16x64xf32> to vector<16x64xbf16>
    %c0_58 = arith.constant 0 : index
    %c0_59 = arith.constant 0 : index
    %190 = vector.load %arg7[%c0_58, %c0_59] : memref<64x64xbf16, #tpu.memory_space<vmem>>, vector<64x64xbf16>
    %cst_60 = arith.constant dense<0.000000e+00> : vector<16x64xf32>
    %191 = tpu.matmul %189, %190, %cst_60 {dimension_numbers = #tpu.dot_dimension_numbers<[1], [0], [0], [1], [0, 0, 1, 1], [], []>} : vector<16x64xbf16>, vector<64x64xbf16>, vector<16x64xf32> -> vector<16x64xf32>
    %192 = arith.addf %1, %191 : vector<16x64xf32>
    %c0_61 = arith.constant 0 : index
    %c0_62 = arith.constant 0 : index
    %193 = vector.load %arg8[%c0_61, %c0_62] : memref<1x64xf32, #tpu.memory_space<vmem>>, vector<1x64xf32>
    %c0_63 = arith.constant 0 : index
    %c0_64 = arith.constant 0 : index
    %194 = vector.load %arg9[%c0_63, %c0_64] : memref<1x64xf32, #tpu.memory_space<vmem>>, vector<1x64xf32>
    %cst_65 = arith.constant dense<0.000000e+00> : vector<16xf32>
    %195 = vector.multi_reduction <add>, %192, %cst_65 [1] : vector<16x64xf32> to vector<16xf32>
    %196 = vector.shape_cast %195 : vector<16xf32> to vector<16x1xf32>
    %cst_66 = arith.constant 6.400000e+01 : f32
    %197 = vector.broadcast %cst_66 : f32 to vector<16x1xf32>
    %198 = arith.divf %196, %197 : vector<16x1xf32>
    %199 = vector.broadcast %198 : vector<16x1xf32> to vector<16x64xf32>
    %200 = arith.subf %192, %199 : vector<16x64xf32>
    %201 = arith.mulf %200, %200 : vector<16x64xf32>
    %cst_67 = arith.constant dense<0.000000e+00> : vector<16xf32>
    %202 = vector.multi_reduction <add>, %201, %cst_67 [1] : vector<16x64xf32> to vector<16xf32>
    %203 = vector.shape_cast %202 : vector<16xf32> to vector<16x1xf32>
    %cst_68 = arith.constant 6.400000e+01 : f32
    %204 = vector.broadcast %cst_68 : f32 to vector<16x1xf32>
    %205 = arith.divf %203, %204 : vector<16x1xf32>
    %cst_69 = arith.constant 9.99999974E-6 : f32
    %206 = vector.broadcast %cst_69 : f32 to vector<16x1xf32>
    %207 = arith.addf %205, %206 : vector<16x1xf32>
    %208 = math.rsqrt %207 : vector<16x1xf32>
    %209 = vector.broadcast %208 : vector<16x1xf32> to vector<16x64xf32>
    %210 = arith.mulf %200, %209 : vector<16x64xf32>
    %211 = vector.broadcast %193 : vector<1x64xf32> to vector<16x64xf32>
    %212 = arith.mulf %210, %211 : vector<16x64xf32>
    %213 = vector.broadcast %194 : vector<1x64xf32> to vector<16x64xf32>
    %214 = arith.addf %212, %213 : vector<16x64xf32>
    %215 = arith.truncf %214 : vector<16x64xf32> to vector<16x64xbf16>
    %c0_70 = arith.constant 0 : index
    %c0_71 = arith.constant 0 : index
    %216 = vector.load %arg10[%c0_70, %c0_71] : memref<64x256xbf16, #tpu.memory_space<vmem>>, vector<64x256xbf16>
    %cst_72 = arith.constant dense<0.000000e+00> : vector<16x256xf32>
    %217 = tpu.matmul %215, %216, %cst_72 {dimension_numbers = #tpu.dot_dimension_numbers<[1], [0], [0], [1], [0, 0, 1, 1], [], []>} : vector<16x64xbf16>, vector<64x256xbf16>, vector<16x256xf32> -> vector<16x256xf32>
    %c0_73 = arith.constant 0 : index
    %c0_74 = arith.constant 0 : index
    %218 = vector.load %arg11[%c0_73, %c0_74] : memref<1x256xf32, #tpu.memory_space<vmem>>, vector<1x256xf32>
    %219 = vector.broadcast %218 : vector<1x256xf32> to vector<16x256xf32>
    %220 = arith.addf %217, %219 : vector<16x256xf32>
    %cst_75 = arith.constant 5.000000e-01 : f32
    %221 = vector.broadcast %cst_75 : f32 to vector<16x256xf32>
    %222 = arith.mulf %221, %220 : vector<16x256xf32>
    %cst_76 = arith.constant 0.707106769 : f32
    %223 = vector.broadcast %cst_76 : f32 to vector<16x256xf32>
    %224 = arith.mulf %220, %223 : vector<16x256xf32>
    %225 = math.erf %224 : vector<16x256xf32>
    %cst_77 = arith.constant 1.000000e+00 : f32
    %226 = vector.broadcast %cst_77 : f32 to vector<16x256xf32>
    %227 = arith.addf %226, %225 : vector<16x256xf32>
    %228 = arith.mulf %222, %227 : vector<16x256xf32>
    %229 = arith.truncf %228 : vector<16x256xf32> to vector<16x256xbf16>
    %c0_78 = arith.constant 0 : index
    %c0_79 = arith.constant 0 : index
    %230 = vector.load %arg12[%c0_78, %c0_79] : memref<256x64xbf16, #tpu.memory_space<vmem>>, vector<256x64xbf16>
    %cst_80 = arith.constant dense<0.000000e+00> : vector<16x64xf32>
    %231 = tpu.matmul %229, %230, %cst_80 {dimension_numbers = #tpu.dot_dimension_numbers<[1], [0], [0], [1], [0, 0, 1, 1], [], []>} : vector<16x256xbf16>, vector<256x64xbf16>, vector<16x64xf32> -> vector<16x64xf32>
    %c0_81 = arith.constant 0 : index
    %c0_82 = arith.constant 0 : index
    %232 = vector.load %arg13[%c0_81, %c0_82] : memref<1x64xf32, #tpu.memory_space<vmem>>, vector<1x64xf32>
    %233 = vector.broadcast %232 : vector<1x64xf32> to vector<16x64xf32>
    %234 = arith.addf %231, %233 : vector<16x64xf32>
    %235 = arith.addf %192, %234 : vector<16x64xf32>
    %c0_83 = arith.constant 0 : index
    %c0_84 = arith.constant 0 : index
    %c0_85 = arith.constant 0 : index
    %236 = vector.load %arg14[%c0_83, %c0_84, %c0_85] : memref<1x16x64xf32, #tpu.memory_space<vmem>>, vector<1x16x64xf32>
    %237 = vector.shape_cast %236 : vector<1x16x64xf32> to vector<16x64xf32>
    %238 = vector.shape_cast %235 : vector<16x64xf32> to vector<1x16x64xf32>
    tpu.vector_store %arg14[%c0_83, %c0_84, %c0_85], %238 {strides = array<i32>} : memref<1x16x64xf32, #tpu.memory_space<vmem>>, vector<1x16x64xf32>,
    return
  }
  func.func @transform_0(%arg0: i32) -> (i32, i32, i32) {
    %c0_i32 = arith.constant 0 : i32
    %c0_i32_0 = arith.constant 0 : i32
    %c0_i32_1 = arith.constant 0 : i32
    return %arg0, %c0_i32, %c0_i32_0 : i32, i32, i32
  }
  func.func @transform_1(%arg0: i32) -> (i32, i32) {
    %c0_i32 = arith.constant 0 : i32
    %c0_i32_0 = arith.constant 0 : i32
    %c0_i32_1 = arith.constant 0 : i32
    return %c0_i32, %c0_i32_0 : i32, i32
  }
  func.func @transform_2(%arg0: i32) -> (i32, i32) {
    %c0_i32 = arith.constant 0 : i32
    %c0_i32_0 = arith.constant 0 : i32
    %c0_i32_1 = arith.constant 0 : i32
    return %c0_i32, %c0_i32_0 : i32, i32
  }
  func.func @transform_3(%arg0: i32) -> (i32, i32) {
    %c0_i32 = arith.constant 0 : i32
    %c0_i32_0 = arith.constant 0 : i32
    %c0_i32_1 = arith.constant 0 : i32
    return %c0_i32, %c0_i32_0 : i32, i32
  }
  func.func @transform_4(%arg0: i32) -> (i32, i32) {
    %c0_i32 = arith.constant 0 : i32
    %c0_i32_0 = arith.constant 0 : i32
    %c0_i32_1 = arith.constant 0 : i32
    return %c0_i32, %c0_i32_0 : i32, i32
  }
  func.func @transform_5(%arg0: i32) -> (i32, i32) {
    %c0_i32 = arith.constant 0 : i32
    %c0_i32_0 = arith.constant 0 : i32
    %c0_i32_1 = arith.constant 0 : i32
    return %c0_i32, %c0_i32_0 : i32, i32
  }
  func.func @transform_6(%arg0: i32) -> (i32, i32) {
    %c0_i32 = arith.constant 0 : i32
    %c0_i32_0 = arith.constant 0 : i32
    %c0_i32_1 = arith.constant 0 : i32
    return %c0_i32, %c0_i32_0 : i32, i32
  }
  func.func @transform_7(%arg0: i32) -> (i32, i32) {
    %c0_i32 = arith.constant 0 : i32
    %c0_i32_0 = arith.constant 0 : i32
    %c0_i32_1 = arith.constant 0 : i32
    return %c0_i32, %c0_i32_0 : i32, i32
  }
  func.func @transform_8(%arg0: i32) -> (i32, i32) {
    %c0_i32 = arith.constant 0 : i32
    %c0_i32_0 = arith.constant 0 : i32
    %c0_i32_1 = arith.constant 0 : i32
    return %c0_i32, %c0_i32_0 : i32, i32
  }
  func.func @transform_9(%arg0: i32) -> (i32, i32) {
    %c0_i32 = arith.constant 0 : i32
    %c0_i32_0 = arith.constant 0 : i32
    %c0_i32_1 = arith.constant 0 : i32
    return %c0_i32, %c0_i32_0 : i32, i32
  }
  func.func @transform_10(%arg0: i32) -> (i32, i32) {
    %c0_i32 = arith.constant 0 : i32
    %c0_i32_0 = arith.constant 0 : i32
    %c0_i32_1 = arith.constant 0 : i32
    return %c0_i32, %c0_i32_0 : i32, i32
  }
  func.func @transform_11(%arg0: i32) -> (i32, i32) {
    %c0_i32 = arith.constant 0 : i32
    %c0_i32_0 = arith.constant 0 : i32
    %c0_i32_1 = arith.constant 0 : i32
    return %c0_i32, %c0_i32_0 : i32, i32
  }
  func.func @transform_12(%arg0: i32) -> (i32, i32) {
    %c0_i32 = arith.constant 0 : i32
    %c0_i32_0 = arith.constant 0 : i32
    %c0_i32_1 = arith.constant 0 : i32
    return %c0_i32, %c0_i32_0 : i32, i32
  }
  func.func @transform_13(%arg0: i32) -> (i32, i32, i32) {
    %c0_i32 = arith.constant 0 : i32
    %c0_i32_0 = arith.constant 0 : i32
    %c0_i32_1 = arith.constant 0 : i32
    return %arg0, %c0_i32, %c0_i32_0 : i32, i32, i32
  }
}

</mosaic_0001>

<bundles_post_ra>
// kernel: tpu_custom_call.1
= control target key start
LH: loop header
LB: loop body
LE: loop exit
PB: predicated region body
PF: predicated region fallthrough
CT: control target
= control target key end

     0   :  { %18 = vsyncpa [#allocation4], 0  ;;  %s3609_s0 = inlined_call_operand.vmem [shape: f32[2,16,64], index: 0, kind: input, shape index: {}]   ;;  %s3610_s1 = inlined_call_operand.hbm [shape: f32[1,64], index: 1, kind: input, shape index: {}]   ;;  %s3611_s2 = inlined_call_operand.vmem [shape: f32[1,64], index: 2, kind: input, shape index: {}]   ;;  %s3612_s3 = inlined_call_operand.vmem [shape: bf16[64,64], index: 3, kind: input, shape index: {}]   ;;  %s3613_s4 = inlined_call_operand.vmem [shape: bf16[64,64], index: 4, kind: input, shape index: {}]   ;;  %s3614_s5 = inlined_call_operand.vmem [shape: bf16[64,64], index: 5, kind: input, shape index: {}]   ;;  %s3615_s6 = inlined_call_operand.hbm [shape: bf16[64,64], index: 6, kind: input, shape index: {}]   ;;  %s3616_s7 = inlined_call_operand.vmem [shape: f32[1,64], index: 7, kind: input, shape index: {}]   ;;  %s3617_s8 = inlined_call_operand.vmem [shape: f32[1,64], index: 8, kind: input, shape index: {}]   ;;  %s3618_s9 = inlined_call_operand.vmem [shape: bf16[64,256], index: 9, kind: input, shape index: {}]   ;;  %s3619_s10 = inlined_call_operand.vmem [shape: f32[1,256], index: 10, kind: input, shape index: {}]   ;;  %s3620_s11 = inlined_call_operand.vmem [shape: bf16[256,64], index: 11, kind: input, shape index: {}]   ;;  %s3621_s12 = inlined_call_operand.vmem [shape: f32[1,64], index: 12, kind: input, shape index: {}]   ;;  %s3622_s13 = inlined_call_operand.hbm [shape: f32[2,16,64], index: 13, kind: output, shape index: {}]  }
   0x1   :  { %19 = vsyncpa [#allocation7], 0 }
   0x2   :  { %20 = vsyncpa [#allocation5], 0 }
   0x3   :  { %22 = vsyncpa [#allocation5 + $0x1], 0  ;;  %s3048_s25 = smov 0   ;;  %s3050_s26 = smov 0  }
   0x4   :  { %s3052_s27 = smov 0   ;;  %s3054_s28 = smov 0  }
   0x5 LB: > { %3630 = sst [smem:[#allocation12_spill]] %s2948_s27  ;;  %s3069_s29 = sadd.s32 4294967295, %s2952_s28   ;;  %s2952_s28 = sphi %s3054_s28, %s3645_s28   ;;  %s2948_s27 = sphi %s3052_s27, %s3647_s27   ;;  %s2944_s26 = sphi %s3050_s26, %s3649_s26   ;;  %s2940_s25 = sphi %s3048_s25, %s3648_s25  }
   0x6   : > { %s2323_s30 = sadd.s32 4294967294, %s2952_s28   ;;  %s3073_s14 = sadd.s32 1, %s2952_s28  }
   0x7   : > { %3631 = sst [smem:[#allocation13_spill]] %s3073_s14  ;;  %s313_s15 = sadd.s32 1, %s2948_s27 }
   0x8   : > { %s310_s16 = ssub.s32 %s2952_s28, %s3073_s14  ;;  %p323_p0 = scmp.ne.s32.totalorder %s2948_s27, %s2944_s26 }
   0x9   : > { %p311_p1 = scmp.eq.s32.totalorder %s310_s16, 0  ;;  %p324_p2 = scmp.eq.s32.totalorder %s3069_s29, 1 }
   0xa   : > { %p329_p3 = scmp.ne.s32.totalorder %s2944_s26, %s2940_s25  ;;  %p330_p4 = scmp.eq.s32.totalorder %s2323_s30, 1 }
   0xb   : > { %s3084_s17 = scalar_select %p311_p1, %s2948_s27, %s313_s15  }
   0xc   : > { %p3086_p5 = por %p324_p2, %p323_p0  ;;  %p3090_p6 = por %p330_p4, %p329_p3 }
   0xd   : > { %3632 = sst [smem:[#allocation14_spill]] %s3084_s17  ;;  %p2324_p7 = scmp.ge.s32.totalorder %s2952_s28, 1 }
   0xe   : > { %s3633_s18 = scalar_select %p3086_p5, 1, 0 }
   0xf   : > { %s3634_s19 = scalar_select %p3090_p6, 1, 0 }
  0x10   : > { %p337_p8 = scmp.lt.s32.totalorder %s2952_s28, 3  ;;  %p3623_p9 = scmp.eq.s32.totalorder %s3069_s29, 0 }
  0x11   : > { %s2954_s21 = smov [#allocation3]   ;;  %s2955_s23 = smov [#allocation6]  }
  0x12   : > { %p3097_p10 = pnand %p2324_p7, %p337_p8  ;;  %s350_s22 = sshll.u32 %s2954_s21, 4  ;;  %s351_s22 = int_to_ptr.vmem [resolvable:$true] %s350_s22 }
  0x13   : > { %s372_s24 = sshll.u32 %s2955_s23, 4  ;;  %s2843_s15 = scalar_lea.vmem %s351_s22, 16  ;;  %s373_s24 = int_to_ptr.vmem [resolvable:$true] %s372_s24 }
  0x14   : > { %s3635_s20 = scalar_select %p3097_p10, 1, 0 }
  0x15   : > { %p2635_p11 = pneg %p3097_p10  ;;  %p2844_p0 = scmp.ne.s32.totalorder %s351_s22, %s2843_s15 }
  0x16   : > { %s2850_s16 = scalar_lea.vmem %s351_s22, 32  ;;  %p2851_p3 = scmp.lt.s32.totalorder %s351_s22, %s351_s22 }
  0x17   : > { %p3105_p12 = pnand %p3623_p9, %p2635_p11  ;;  %p2852_p4 = scmp.lt.s32.totalorder %s2850_s16, %s2843_s15 }
  0x19   : > { %p2834_p13 = pneg %p3105_p12  ;;  %p2853_p7 = por %p2852_p4, %p2851_p3 }
  0x1b   : > { %p2846_p1 = pnand %p2844_p0, %p2834_p13 }
  0x1d   : > { %p2847_p2 = pneg %p2846_p1 }
  0x1f   : > { %p2854_p8 = pnand %p2853_p7, %p2847_p2 }
  0x21   : > { %2857 = shalt.err (!%p2854_p8)
}
  0x22   : > { %2638 = dma.hbm_to_vmem [thread:$0]  (!%p3105_p12), %s3610_s1, 16, %s351_s22, [#allocation4]  }
  0x23   : > { %s2869_s17 = scalar_lea.vmem %s373_s24, 512  ;;  %p2877_p1 = scmp.lt.s32.totalorder %s373_s24, %s373_s24 }
  0x24   : > { %p2870_p11 = scmp.ne.s32.totalorder %s373_s24, %s2869_s17  ;;  %p2878_p6 = scmp.lt.s32.totalorder %s2869_s17, %s2869_s17 }
  0x26   : > { %p2872_p9 = pnand %p2870_p11, %p2834_p13  ;;  %p2879_p5 = por %p2878_p6, %p2877_p1 }
  0x28   : > { %p2873_p0 = pneg %p2872_p9 }
  0x2a   : > { %p2880_p10 = pnand %p2879_p5, %p2873_p0 }
  0x2c   : > { %2883 = shalt.err (!%p2880_p10)
}
  0x2d   : > { %s2956_s15 = smov 64   ;;  %s2957_s16 = smov 4  }
  0x2e   : > { %2641 = dma.hbm_to_vmem [thread:$0]  (!%p3105_p12), %s3615_s6, 512, %s373_s24, [#allocation7], %s2956_s15, %s2956_s15, %s2957_s16  }
  0x2f   : > { %p3637_p2 = scmp.ne.s32.totalorder %s3635_s20, 0 }
  0x30   : > { %p3638_p3 = scmp.eq.s32.totalorder (!%p3637_p2), %s3069_s29, 0 }
  0x31   : > { %414 = sbr.rel (%p3637_p2) target bundleno = 2433 (0x981), region = 72 }
  0x36   : > { %2927 = dma.done.wait (%p3638_p3), [#allocation4], 16   ;;  %p3639_p9 = pmov %p3638_p3 }
  0x37   : > { %p3640_p5 = pmov %p3638_p3 }
  0x38   : > { %2929 = vsyncadd (%p3639_p9), [#allocation4], 4294967280 }
  0x39   : > { %2931 = dma.done.wait (%p3640_p5), [#allocation7], 512   ;;  %p3641_p6 = pmov %p3638_p3 }
  0x3a   : > { %p462_p10 = scmp.lt.s32.totalorder %s3069_s29, 1  ;;  %vm472_vm0 = vcmask 523264   ;;  %v2706_v14 = vld [vmem:[%s3612_s3 + $0x18] sm:$0xff]   ;;  %v2958_v16 = vmov 0.0   ;;  %v2708_v17 = vld [vmem:[%s3612_s3 + $0x10] sm:$0xff]   ;;  %vm2959_vm1 = vmmov 0  }
  0x3b   : > { %2933 = vsyncadd (%p3641_p6), [#allocation7], 4294966784  ;;  %v2707_v15 = vld [vmem:[%s3614_s5 + $0x18] sm:$0xff]   ;;  %2481 = vmatprep.subr.bf16.mxu1 %v2958_v16  ;;  %2505 = vmatprep.subr.bf16.mxu0 %v2958_v16  ;;  %v2709_v18 = vld [vmem:[%s3614_s5 + $0x10] sm:$0xff]   ;;  %vm748_vm2 = vcmask 64512   ;;  %s2962_s17 = smov 104  }
  0x3c   : > { %s463_s27 = scalar_select %p462_p10, %s3069_s29, 1  ;;  %2482 = vmatpush3.bf16.msra.mxu1 %v2706_v14  ;;  %2506 = vmatpush3.bf16.msra.mxu0 %v2707_v15  ;;  %v2710_v19 = vld [vmem:[%s3612_s3 + $0x8] sm:$0xff]   ;;  %v2712_v21 = vld [vmem:[%s3612_s3] sm:$0xff]   ;;  %v2334_v31 = vld [vmem:[#allocation3] ss:$0 sm:$0xff]  ;;  %vm796_vm4 = vcmask 130048  }
  0x3d   : > { %2483 = vmatprep.subr.bf16.mxu1 %v2958_v16  ;;  %2507 = vmatprep.subr.bf16.mxu0 %v2958_v16  ;;  %v2711_v20 = vld [vmem:[%s3614_s5 + $0x8] sm:$0xff]   ;;  %v2713_v22 = vld [vmem:[%s3614_s5] sm:$0xff]   ;;  %v2714_v39 = vld [vmem:[%s3613_s4 + $0x18] sm:$0xff]   ;;  %s2963_s20 = smov 96   ;;  %s2964_s24 = smov 88   ;;  %vm1774_vm5 = vcmask 195584  }
  0x3e   : > { %s2405_s14 = sshll.u32 %s463_s27, 4  ;;  %2489 = vmatprep.mubr.msk.bf16.mxu1 %vm2959_vm1, %v2958_v16  ;;  %2513 = vmatprep.mubr.msk.bf16.mxu0 %vm2959_vm1, %v2958_v16  ;;  %v2335_v35 = vld [vmem:[%s3611_s2] ss:$0 sm:$0xff]  ;;  %v2715_v41 = vld [vmem:[%s3613_s4 + $0x10] sm:$0xff]   ;;  %v2716_v42 = vld [vmem:[%s3613_s4 + $0x8] sm:$0xff]   ;;  %s2960_s27 = smov 120  }
  0x3f   : > { %s3142_s22 = scalar_lea.vmem %s3609_s0, %s2405_s14  ;;  %v2717_v43 = vld [vmem:[%s3613_s4] sm:$0xff]   ;;  %s2961_s14 = smov 112   ;;  %vm1777_vm6 = vcmask 261120   ;;  %vm1780_vm7 = vcmask 326656   ;;  %vm1783_vm8 = vcmask 392192   ;;  %vm1786_vm9 = vcmask 457728  }
  0x40   : > { %v468_v0 = vld [vmem:[%s3142_s22] sm:$0xff]  ;;  %v469_v1 = vld [vmem:[%s3142_s22 + $0x8] sm:$0xff]  ;;  %2484 = vmatpush3.bf16.msra.mxu1 %v2708_v17  ;;  %2508 = vmatpush3.bf16.msra.mxu0 %v2709_v18  ;;  %s2965_s30 = smov 80   ;;  %s2966_s21 = smov 72  }
  0x41   : > { %v473_v2 = vsel %vm472_vm0, %v468_v0, 0.0  ;;  %v476_v3 = vsel %vm472_vm0, %v469_v1, 0.0  ;;  %2485 = vmatprep.subr.bf16.mxu1 %v2958_v16  ;;  %2509 = vmatprep.subr.bf16.mxu0 %v2958_v16  ;;  %s3629_s23 = smov 8   ;;  %s2969_s15 = smov 16  }
  0x42   : > { %474 = vadd.xlane.f32.xlu0 %v473_v2  ;;  %s2970_s16 = smov 24   ;;  %p3642_p13 = scmp.ne.s32.totalorder %s3633_s18, 0 }
  0x44   : > { %2486 = vmatpush3.bf16.msra.mxu1 %v2710_v19  ;;  %2510 = vmatpush3.bf16.msra.mxu0 %v2711_v20  ;;  %v744_v20 = vlaneseq }
  0x45   : > { %2487 = vmatprep.subr.bf16.mxu1 %v2958_v16  ;;  %2511 = vmatprep.subr.bf16.mxu0 %v2958_v16 }
  0x46   : > { %477 = vadd.xlane.f32.xlu0 %v476_v3 }
  0x48   : > { %2488 = vmatpush3.bf16.msra.mxu1 %v2712_v21  ;;  %2512 = vmatpush3.bf16.msra.mxu0 %v2713_v22  ;;  %v745_v21 = vand.u32 127, %v744_v20  ;;  %v2967_v22 = vmov -1e+30  }
  0x49   : > { %2493 = vmatprep.subr.bf16.mxu1 %v2958_v16  ;;  %2529 = vmatprep.subr.bf16.mxu0 %v2958_v16 }
  0x4a   : > { %vm746_vm3 = vcmp.lt.s32.totalorder %v745_v21, 8 }
  0xcb   : > { %v475_v4 = vpop.xlane.xlu0 %474 }
  0xcc   : > { %v480_v5 = vmul.f32 0.015625, %v475_v4 }
  0xce   : > { %v482_v6 = vsub.f32 %v468_v0, %v480_v5 }
  0xcf   : > { %v478_v7 = vpop.xlane.xlu0 %477 }
  0xd0   : > { %v481_v8 = vmul.f32 0.015625, %v478_v7  ;;  %v484_v9 = vmul.f32 %v482_v6, %v482_v6 }
  0xd2   : > { %v483_v10 = vsub.f32 %v469_v1, %v481_v8  ;;  %v486_v11 = vsel %vm472_vm0, %v484_v9, 0.0 }
  0xd3   : > { %487 = vadd.xlane.f32.xlu1 %v486_v11 }
  0xd4   : > { %v485_v12 = vmul.f32 %v483_v10, %v483_v10 }
  0xd6   : > { %v489_v13 = vsel %vm472_vm0, %v485_v12, 0.0 }
  0xd7   : > { %490 = vadd.xlane.f32.xlu1 %v489_v13 }
 0x15c   : > { %v488_v23 = vpop.xlane.xlu1 %487 }
 0x15d   : > { %v492_v24 = vmul.f32 0.015625, %v488_v23  ;;  %v3276_v23 = vsel %vm746_vm3, 0.0, %v2967_v22 }
 0x15f   : > { %v494_v25 = vadd.f32 1e-05, %v492_v24 }
 0x160   : > { %v491_v26 = vpop.xlane.xlu1 %490 }
 0x161   : > { %2750 = vrsqrt.f32 %v494_v25  ;;  %v493_v27 = vmul.f32 0.015625, %v491_v26 }
 0x163   : > { %v495_v28 = vadd.f32 1e-05, %v493_v27 }
 0x165   : > { %2752 = vrsqrt.f32 %v495_v28 }
 0x16e   : > { %v2751_v29 = vpop.eup %2750 }
 0x16f   : > { %v498_v30 = vmul.f32 %v2751_v29, %v482_v6 }
 0x171   : > { %v506_v34 = vmul.f32 %v2334_v31, %v498_v30 }
 0x172   : > { %v2753_v32 = vpop.eup %2752 }
 0x173   : > { %v499_v33 = vmul.f32 %v2753_v32, %v483_v10  ;;  %v514_v37 = vadd.f32 %v2335_v35, %v506_v34 }
 0x175   : > { %v507_v36 = vmul.f32 %v2334_v31, %v499_v33 }
 0x177   : > { %v515_v38 = vadd.f32 %v2335_v35, %v507_v36 }
 0x179   : > { %v516_v40 = vpack.c.bf16 %v515_v38, %v514_v37 }
 0x17b   : > { %2490 = vmatmul.mubr.msk.bf16.vlgmr.msra.gmra.mxu1 %vm472_vm0, %v516_v40  ;;  %2514 = vmatmul.mubr.msk.bf16.vlgmr.msra.gmra.mxu0 %vm472_vm0, %v516_v40 }
 0x17c   : > { %2494 = vmatpush3.bf16.msra.mxu1 %v2714_v39  ;;  %2501 = vmatprep.mubr.msk.bf16.mxu1 %vm2959_vm1, %v2958_v16 }
 0x17d   : > { %2495 = vmatprep.subr.bf16.mxu1 %v2958_v16  ;;  %2531 = vmatprep.mubr.msk.bf16.mxu0 %vm2959_vm1, %v2958_v16 }
 0x180   : > { %2496 = vmatpush3.bf16.msra.mxu1 %v2715_v41 }
 0x181   : > { %2497 = vmatprep.subr.bf16.mxu1 %v2958_v16 }
 0x184   : > { %2498 = vmatpush3.bf16.msra.mxu1 %v2716_v42 }
 0x185   : > { %2499 = vmatprep.subr.bf16.mxu1 %v2958_v16 }
 0x188   : > { %2500 = vmatpush3.bf16.msra.mxu1 %v2717_v43 }
 0x189   : > { %2517 = vmatprep.subr.bf16.mxu1 %v2958_v16 }
 0x18b   : > { %2502 = vmatmul.mubr.msk.bf16.vlgmr.msra.gmra.mxu1 %vm472_vm0, %v516_v40 }
 0x18c   : > { %2519 = vmatprep.mubr.msk.bf16.mxu1 %vm2959_vm1, %v2958_v16 }
 0x23b   : > { %v586_v44 = vpop.f32.mrf.mxu1  ;;  %v732_v45 = vpop.f32.mrf.mxu0 }
 0x23c   : > { %v739_v50 = vmul.f32 0.35355338, %v586_v44 }
 0x23d   : > { %v2491_v46 = vpop.f32.mrf.mxu1  ;;  %v2515_v47 = vpop.f32.mrf.mxu0 }
 0x23f   : > { %v589_v48 = vpop.f32.mrf.mxu1  ;;  %v735_v49 = vpop.f32.mrf.mxu0 }
 0x240   : > { %v740_v51 = vmul.f32 0.35355338, %v589_v48  ;;  %v3221_v61 = vpack.c.bf16 %v735_v49, %v732_v45 }
 0x241   : > { %v2492_v52 = vpop.f32.mrf.mxu1  ;;  %v2516_v53 = vpop.f32.mrf.mxu0 }
 0x242   : > { %v741_v54 = vpack.c.bf16 %v740_v51, %v739_v50 }
 0x244   : > { %865 = vrot.lane.b32.xlu1 %v741_v54, %s2960_s27 }
 0x24b   : > { %v659_v55 = vpop.f32.mrf.mxu1 }
 0x24d   : > { %v2503_v56 = vpop.f32.mrf.mxu1 }
 0x24f   : > { %v662_v57 = vpop.f32.mrf.mxu1 }
 0x250   : > { %v742_v58 = vpack.c.bf16 %v662_v57, %v659_v55 }
 0x251   : > { %v2504_v59 = vpop.f32.mrf.mxu1 }
 0x252   : > { %990 = vrot.lane.b32.xlu1 %v742_v58, %s2961_s14  ;;  %868 = vrot.lane.b32.xlu0 %v742_v58, %s2960_s27  ;;  %v753_v60 = vsel %vm748_vm2, %v742_v58, 0 }
 0x253   : > { %2518 = vmatpush3.bf16.xpose.msra.mxu1 %v753_v60 }
 0x254   : > { %2523 = vmatprep.subr.bf16.mxu1 %v2958_v16 }
 0x256   : > { %988 = vrot.lane.b32.xlu1 %v741_v54, %s2961_s14  ;;  %1111 = vrot.lane.b32.xlu0 %v742_v58, %s2962_s17 }
 0x25a   : > { %1109 = vrot.lane.b32.xlu1 %v741_v54, %s2962_s17  ;;  %1232 = vrot.lane.b32.xlu0 %v742_v58, %s2963_s20 }
 0x25b   : > { %2520 = vmatmul.mubr.msk.bf16.vlgmr.msra.gmra.mxu1 %vm748_vm2, %v741_v54 }
 0x25c   : > { %2524 = vmatpush3.bf16.msra.mxu1 %v3221_v61  ;;  %2525 = vmatprep.mubr.msk.bf16.mxu1 %vm2959_vm1, %v2958_v16 }
 0x25d   : > { %2535 = vmatprep.subr.bf16.mxu1 %v2958_v16 }
 0x25e   : > { %1230 = vrot.lane.b32.xlu1 %v741_v54, %s2963_s20  ;;  %1353 = vrot.lane.b32.xlu0 %v742_v58, %s2964_s24 }
 0x262   : > { %1351 = vrot.lane.b32.xlu1 %v741_v54, %s2964_s24  ;;  %1474 = vrot.lane.b32.xlu0 %v742_v58, %s2965_s30 }
 0x266   : > { %1472 = vrot.lane.b32.xlu1 %v741_v54, %s2965_s30  ;;  %1595 = vrot.lane.b32.xlu0 %v742_v58, %s2966_s21 }
 0x26a   : > { %1593 = vrot.lane.b32.xlu1 %v741_v54, %s2966_s21  ;;  %937 = vrot.lane.b32.xlu0 %v3221_v61, %s2960_s27  ;;  %s2971_s27 = smov 32  }
 0x26e   : > { %1058 = vrot.lane.b32.xlu1 %v3221_v61, %s2961_s14  ;;  %s2972_s14 = smov 40  }
 0x2b6   : > { %v866_v0 = vpop.permute.xlu1 %865 }
 0x2c4   : > { %v869_v62 = vpop.permute.xlu0 %868  ;;  %v991_v1 = vpop.permute.xlu1 %990 }
 0x2c5   : > { %v874_v63 = vsel %vm748_vm2, %v869_v62, 0  ;;  %v996_v2 = vsel %vm748_vm2, %v991_v1, 0 }
 0x2c6   : > { %2530 = vmatpush3.bf16.xpose.msra.mxu0 %v874_v63 }
 0x2c7   : > { %2541 = vmatprep.subr.bf16.mxu0 %v2958_v16 }
 0x2c8   : > { %v1112_v3 = vpop.permute.xlu0 %1111  ;;  %v989_v4 = vpop.permute.xlu1 %988 }
 0x2c9   : > { %v1117_v5 = vsel %vm748_vm2, %v1112_v3, 0 }
 0x2cc   : > { %v1233_v6 = vpop.permute.xlu0 %1232  ;;  %v1110_v7 = vpop.permute.xlu1 %1109 }
 0x2cd   : > { %2532 = vmatmul.mubr.msk.bf16.vlgmr.msra.gmra.mxu0 %vm748_vm2, %v866_v0  ;;  %v1238_v8 = vsel %vm748_vm2, %v1233_v6, 0 }
 0x2ce   : > { %2542 = vmatpush3.bf16.xpose.msra.mxu0 %v996_v2  ;;  %2543 = vmatprep.mubr.msk.bf16.mxu0 %vm2959_vm1, %v2958_v16 }
 0x2cf   : > { %2553 = vmatprep.subr.bf16.mxu0 %v2958_v16 }
 0x2d0   : > { %v1354_v9 = vpop.permute.xlu0 %1353  ;;  %v1231_v10 = vpop.permute.xlu1 %1230 }
 0x2d1   : > { %v1359_v11 = vsel %vm748_vm2, %v1354_v9, 0 }
 0x2d4   : > { %v1475_v12 = vpop.permute.xlu0 %1474  ;;  %v1352_v13 = vpop.permute.xlu1 %1351 }
 0x2d5   : > { %2544 = vmatmul.mubr.msk.bf16.vlgmr.msra.gmra.mxu0 %vm748_vm2, %v989_v4  ;;  %v1480_v14 = vsel %vm748_vm2, %v1475_v12, 0 }
 0x2d6   : > { %2554 = vmatpush3.bf16.xpose.msra.mxu0 %v1117_v5  ;;  %2555 = vmatprep.mubr.msk.bf16.mxu0 %vm2959_vm1, %v2958_v16 }
 0x2d7   : > { %2565 = vmatprep.subr.bf16.mxu0 %v2958_v16 }
 0x2d8   : > { %v1596_v15 = vpop.permute.xlu0 %1595  ;;  %v1473_v17 = vpop.permute.xlu1 %1472 }
 0x2d9   : > { %v1601_v18 = vsel %vm748_vm2, %v1596_v15, 0 }
 0x2dc   : > { %v1594_v19 = vpop.permute.xlu1 %1593  ;;  %v938_v55 = vpop.permute.xlu0 %937 }
 0x2dd   : > { %2556 = vmatmul.mubr.msk.bf16.vlgmr.msra.gmra.mxu0 %vm748_vm2, %v1110_v7 }
 0x2de   : > { %2566 = vmatpush3.bf16.xpose.msra.mxu0 %v1238_v8  ;;  %2567 = vmatprep.mubr.msk.bf16.mxu0 %vm2959_vm1, %v2958_v16 }
 0x2df   : > { %2577 = vmatprep.subr.bf16.mxu0 %v2958_v16 }
 0x2e0   : > { %v3315_v60 = vpop.permute.xlu1 %1058 }
 0x2e5   : > { %2568 = vmatmul.mubr.msk.bf16.vlgmr.msra.gmra.mxu0 %vm748_vm2, %v1231_v10 }
 0x2e6   : > { %2578 = vmatpush3.bf16.xpose.msra.mxu0 %v1359_v11  ;;  %2579 = vmatprep.mubr.msk.bf16.mxu0 %vm2959_vm1, %v2958_v16 }
 0x2e7   : > { %2589 = vmatprep.subr.bf16.mxu0 %v2958_v16 }
 0x2ed   : > { %2580 = vmatmul.mubr.msk.bf16.vlgmr.msra.gmra.mxu0 %vm748_vm2, %v1352_v13 }
 0x2ee   : > { %2590 = vmatpush3.bf16.xpose.msra.mxu0 %v1480_v14  ;;  %2591 = vmatprep.mubr.msk.bf16.mxu0 %vm2959_vm1, %v2958_v16 }
 0x2ef   : > { %2601 = vmatprep.subr.bf16.mxu0 %v2958_v16 }
 0x2f5   : > { %2592 = vmatmul.mubr.msk.bf16.vlgmr.msra.gmra.mxu0 %vm748_vm2, %v1473_v17 }
 0x2f6   : > { %2602 = vmatpush3.bf16.xpose.msra.mxu0 %v1601_v18  ;;  %2603 = vmatprep.mubr.msk.bf16.mxu0 %vm2959_vm1, %v2958_v16 }
 0x2f7   : > { %2613 = vmatprep.subr.bf16.mxu0 %v2958_v16 }
 0x2fd   : > { %2604 = vmatmul.mubr.msk.bf16.vlgmr.msra.gmra.mxu0 %vm748_vm2, %v1594_v19 }
 0x2fe   : > { %2621 = vmatprep.mubr.msk.bf16.mxu0 %vm2959_vm1, %v2958_v16 }
 0x31b   : > { %v789_v24 = vpop.f32.mrf.mxu1 }
 0x31c   : > { %v790_v25 = vadd.f32 %v789_v24, %v3276_v23 }
 0x31d   : > { %v2521_v26 = vpop.f32.mrf.mxu1 }
 0x31e   : > { %v797_v27 = vsel %vm796_vm4, %v790_v25, -inf }
 0x31f   : > { %798 = vmax.xlane.f32.xlu0 %v797_v27  ;;  %v792_v28 = vpop.f32.mrf.mxu1 }
 0x320   : > { %v793_v29 = vadd.f32 %v792_v28, %v3276_v23 }
 0x321   : > { %v2522_v30 = vpop.f32.mrf.mxu1 }
 0x322   : > { %v800_v31 = vsel %vm796_vm4, %v793_v29, -inf }
 0x323   : > { %801 = vmax.xlane.f32.xlu1 %v800_v31 }
 0x38d   : > { %v910_v32 = vpop.f32.mrf.mxu0 }
 0x38e   : > { %v3283_v33 = vadd.f32 %v910_v32, %v3276_v23 }
 0x38f   : > { %v2533_v34 = vpop.f32.mrf.mxu0 }
 0x390   : > { %v917_v35 = vsel %vm796_vm4, %v3283_v33, -inf }
 0x391   : > { %v913_v36 = vpop.f32.mrf.mxu0  ;;  %918 = vmax.xlane.f32.xlu0 %v917_v35 }
 0x392   : > { %v3288_v37 = vadd.f32 %v913_v36, %v3276_v23 }
 0x393   : > { %v2534_v38 = vpop.f32.mrf.mxu0 }
 0x394   : > { %v920_v39 = vsel %vm796_vm4, %v3288_v37, -inf }
 0x395   : > { %v1032_v40 = vpop.f32.mrf.mxu0  ;;  %921 = vmax.xlane.f32.xlu0 %v920_v39 }
 0x396   : > { %v3293_v41 = vadd.f32 %v1032_v40, %v3276_v23 }
 0x397   : > { %v2545_v42 = vpop.f32.mrf.mxu0 }
 0x398   : > { %v1039_v43 = vsel %vm796_vm4, %v3293_v41, -inf }
 0x399   : > { %v1035_v44 = vpop.f32.mrf.mxu0  ;;  %1040 = vmax.xlane.f32.xlu0 %v1039_v43 }
 0x39a   : > { %v3298_v45 = vadd.f32 %v1035_v44, %v3276_v23 }
 0x39b   : > { %v2546_v46 = vpop.f32.mrf.mxu0 }
 0x39c   : > { %v1042_v47 = vsel %vm796_vm4, %v3298_v45, -inf }
 0x39d   : > { %v1153_v48 = vpop.f32.mrf.mxu0  ;;  %1043 = vmax.xlane.f32.xlu1 %v1042_v47 }
 0x39e   : > { %v3303_v49 = vadd.f32 %v1153_v48, %v3276_v23 }
 0x39f   : > { %v2557_v50 = vpop.f32.mrf.mxu0 }
 0x3a0   : > { %v1160_v51 = vsel %vm796_vm4, %v3303_v49, -inf }
 0x3a1   : > { %v1156_v52 = vpop.f32.mrf.mxu0  ;;  %1161 = vmax.xlane.f32.xlu0 %v1160_v51 }
 0x3a2   : > { %v3308_v53 = vadd.f32 %v1156_v52, %v3276_v23 }
 0x3a3   : > { %v2558_v54 = vpop.f32.mrf.mxu0 }
 0x3a4   : > { %v1163_v56 = vsel %vm796_vm4, %v3308_v53, -inf }
 0x3a5   : > { %v1274_v57 = vpop.f32.mrf.mxu0  ;;  %1164 = vmax.xlane.f32.xlu1 %v1163_v56 }
 0x3a6   : > { %v3313_v58 = vadd.f32 %v1274_v57, %v3276_v23 }
 0x3a7   : > { %v2569_v59 = vpop.f32.mrf.mxu0 }
 0x3a8   : > { %v799_v62 = vpop.xlane.xlu0 %798  ;;  %v1281_v63 = vsel %vm796_vm4, %v3313_v58, -inf }
 0x3a9   : > { %v803_v0 = vsub.f32 %v790_v25, %v799_v62  ;;  %v1277_v1 = vpop.f32.mrf.mxu0  ;;  %1282 = vmax.xlane.f32.xlu0 %v1281_v63 }
 0x3aa   : > { %v3320_v2 = vadd.f32 %v1277_v1, %v3276_v23 }
 0x3ab   : > { %v2570_v3 = vpop.f32.mrf.mxu0  ;;  %v805_v4 = vmul.f32 1.442695, %v803_v0 }
 0x3ac   : > { %v802_v5 = vpop.xlane.xlu1 %801  ;;  %v1284_v6 = vsel %vm796_vm4, %v3320_v2, -inf }
 0x3ad   : > { %v804_v7 = vsub.f32 %v793_v29, %v802_v5  ;;  %v1395_v8 = vpop.f32.mrf.mxu0  ;;  %1285 = vmax.xlane.f32.xlu1 %v1284_v6  ;;  %2754 = vpow2.f32 %v805_v4 }
 0x3ae   : > { %v3325_v9 = vadd.f32 %v1395_v8, %v3276_v23 }
 0x3af   : > { %v807_v10 = vmul.f32 1.442695, %v804_v7  ;;  %v2581_v11 = vpop.f32.mrf.mxu0 }
 0x3b0   : > { %v1402_v12 = vsel %vm796_vm4, %v3325_v9, -inf }
 0x3b1   : > { %2756 = vpow2.f32 %v807_v10  ;;  %v1398_v13 = vpop.f32.mrf.mxu0  ;;  %1403 = vmax.xlane.f32.xlu1 %v1402_v12 }
 0x3b2   : > { %v3330_v14 = vadd.f32 %v1398_v13, %v3276_v23 }
 0x3b3   : > { %v2582_v15 = vpop.f32.mrf.mxu0 }
 0x3b4   : > { %v1405_v17 = vsel %vm796_vm4, %v3330_v14, -inf }
 0x3b5   : > { %v1516_v18 = vpop.f32.mrf.mxu0  ;;  %1406 = vmax.xlane.f32.xlu1 %v1405_v17 }
 0x3b6   : > { %v3364_v39 = vadd.f32 %v1516_v18, %v3276_v23 }
 0x3b7   : > { %v2593_v19 = vpop.f32.mrf.mxu0 }
 0x3b8   : > { %v1523_v40 = vsel %vm796_vm4, %v3364_v39, -inf }
 0x3b9   : > { %v1519_v21 = vpop.f32.mrf.mxu0 }
 0x3ba   : > { %v3335_v22 = vadd.f32 %v1519_v21, %v3276_v23  ;;  %v3339_v26 = vpop.eup %2754 }
 0x3bb   : > { %v2594_v24 = vpop.f32.mrf.mxu0 }
 0x3bc   : > { %v1526_v25 = vsel %vm796_vm4, %v3335_v22, -inf }
 0x3bd   : > { %v1637_v27 = vpop.f32.mrf.mxu0  ;;  %1527 = vmax.xlane.f32.xlu1 %v1526_v25 }
 0x3be   : > { %v3341_v28 = vpop.eup %2756  ;;  %v3344_v29 = vadd.f32 %v1637_v27, %v3276_v23 }
 0x3bf   : > { %v2605_v30 = vpop.f32.mrf.mxu0  ;;  %1179 = vrot.lane.b32.xlu0 %v3221_v61, %s2962_s17  ;;  %v815_v31 = vpack.c.bf16 %v3341_v28, %v3339_v26  ;;  %s2973_s17 = smov 48  }
 0x3c0   : > { %v1644_v32 = vsel %vm796_vm4, %v3344_v29, -inf }
 0x3c1   : > { %2526 = vmatmul.mubr.msk.bf16.vlgmr.msra.gmra.mxu1 %vm796_vm4, %v815_v31  ;;  %v1640_v34 = vpop.f32.mrf.mxu0  ;;  %1645 = vmax.xlane.f32.xlu1 %v1644_v32 }
 0x3c2   : > { %2536 = vmatpush3.bf16.msra.mxu1 %v938_v55  ;;  %v3354_v35 = vadd.f32 %v1640_v34, %v3276_v23  ;;  %2537 = vmatprep.mubr.msk.bf16.mxu1 %vm2959_vm1, %v2958_v16 }
 0x3c3   : > { %v2606_v36 = vpop.f32.mrf.mxu0  ;;  %2547 = vmatprep.subr.bf16.mxu1 %v2958_v16 }
 0x3c4   : > { %v1647_v38 = vsel %vm796_vm4, %v3354_v35, -inf }
 0x3c5   : > { %1648 = vmax.xlane.f32.xlu1 %v1647_v38 }
 0x3d6   : > { %1300 = vrot.lane.b32.xlu1 %v3221_v61, %s2963_s20  ;;  %s2974_s20 = smov 56  }
 0x3de   : > { %1524 = vmax.xlane.f32.xlu0 %v1523_v40 }
 0x3f4   : > { %1421 = vrot.lane.b32.xlu0 %v3221_v61, %s2964_s24 }
 0x3f8   : > { %1542 = vrot.lane.b32.xlu0 %v3221_v61, %s2965_s30 }
 0x3fc   : > { %1663 = vrot.lane.b32.xlu0 %v3221_v61, %s2966_s21 }
 0x41a   : > { %v919_v42 = vpop.xlane.xlu0 %918 }
 0x41b   : > { %v923_v43 = vsub.f32 %v3283_v33, %v919_v42 }
 0x41d   : > { %v925_v44 = vmul.f32 1.442695, %v923_v43 }
 0x41e   : > { %v922_v46 = vpop.xlane.xlu0 %921 }
 0x41f   : > { %2758 = vpow2.f32 %v925_v44  ;;  %v924_v23 = vsub.f32 %v3288_v37, %v922_v46 }
 0x421   : > { %v927_v47 = vmul.f32 1.442695, %v924_v23 }
 0x422   : > { %v1041_v48 = vpop.xlane.xlu0 %1040 }
 0x423   : > { %2760 = vpow2.f32 %v927_v47  ;;  %v1045_v50 = vsub.f32 %v3293_v41, %v1041_v48 }
 0x425   : > { %v1047_v51 = vmul.f32 1.442695, %v1045_v50 }
 0x426   : > { %v1044_v52 = vpop.xlane.xlu1 %1043 }
 0x427   : > { %2762 = vpow2.f32 %v1047_v51  ;;  %v1046_v54 = vsub.f32 %v3298_v45, %v1044_v52  ;;  %v812_v52 = vsel %vm796_vm4, %v3341_v28, 0.0 }
 0x429   : > { %v1049_v55 = vmul.f32 1.442695, %v1046_v54 }
 0x42a   : > { %v1162_v61 = vpop.xlane.xlu0 %1161 }
 0x42b   : > { %2764 = vpow2.f32 %v1049_v55  ;;  %v1166_v33 = vsub.f32 %v3303_v49, %v1162_v61 }
 0x42c   : > { %v2759_v56 = vpop.eup %2758 }
 0x42d   : > { %v1168_v57 = vmul.f32 1.442695, %v1166_v33  ;;  %v929_v59 = vsel %vm796_vm4, %v2759_v56, 0.0 }
 0x42e   : > { %930 = vadd.xlane.f32.xlu1 %v929_v59  ;;  %v1165_v37 = vpop.xlane.xlu1 %1164 }
 0x42f   : > { %2766 = vpow2.f32 %v1168_v57  ;;  %v1167_v62 = vsub.f32 %v3308_v53, %v1165_v37 }
 0x430   : > { %v2761_v41 = vpop.eup %2760 }
 0x431   : > { %v1170_v63 = vmul.f32 1.442695, %v1167_v62  ;;  %v932_v0 = vsel %vm796_vm4, %v2761_v41, 0.0  ;;  %v935_v1 = vpack.c.bf16 %v2761_v41, %v2759_v56 }
 0x432   : > { %933 = vadd.xlane.f32.xlu0 %v932_v0  ;;  %v1283_v45 = vpop.xlane.xlu0 %1282 }
 0x433   : > { %2768 = vpow2.f32 %v1170_v63  ;;  %v1287_v3 = vsub.f32 %v3313_v58, %v1283_v45  ;;  %2538 = vmatmul.mubr.msk.bf16.vlgmr.msra.gmra.mxu1 %vm796_vm4, %v935_v1  ;;  %v809_v1 = vsel %vm796_vm4, %v3339_v26, 0.0 }
 0x434   : > { %v2763_v49 = vpop.eup %2762  ;;  %2548 = vmatpush3.bf16.msra.mxu1 %v3315_v60  ;;  %2549 = vmatprep.mubr.msk.bf16.mxu1 %vm2959_vm1, %v2958_v16 }
 0x435   : > { %v1289_v4 = vmul.f32 1.442695, %v1287_v3  ;;  %v1051_v53 = vsel %vm796_vm4, %v2763_v49, 0.0  ;;  %2559 = vmatprep.subr.bf16.mxu1 %v2958_v16 }
 0x436   : > { %1052 = vadd.xlane.f32.xlu0 %v1051_v53  ;;  %v1286_v5 = vpop.xlane.xlu1 %1285  ;;  %v1180_v11 = vpop.permute.xlu0 %1179 }
 0x437   : > { %2770 = vpow2.f32 %v1289_v4  ;;  %v1288_v6 = vsub.f32 %v3320_v2, %v1286_v5 }
 0x438   : > { %v2765_v7 = vpop.eup %2764 }
 0x439   : > { %v1291_v58 = vmul.f32 1.442695, %v1288_v6  ;;  %v1054_v8 = vsel %vm796_vm4, %v2765_v7, 0.0  ;;  %v1057_v10 = vpack.c.bf16 %v2765_v7, %v2763_v49 }
 0x43a   : > { %1055 = vadd.xlane.f32.xlu0 %v1054_v8  ;;  %v1404_v60 = vpop.xlane.xlu1 %1403 }
 0x43b   : > { %2772 = vpow2.f32 %v1291_v58  ;;  %v1408_v12 = vsub.f32 %v3325_v9, %v1404_v60  ;;  %2550 = vmatmul.mubr.msk.bf16.vlgmr.msra.gmra.mxu1 %vm796_vm4, %v1057_v10 }
 0x43c   : > { %v2767_v13 = vpop.eup %2766  ;;  %2560 = vmatpush3.bf16.msra.mxu1 %v1180_v11  ;;  %2561 = vmatprep.mubr.msk.bf16.mxu1 %vm2959_vm1, %v2958_v16 }
 0x43d   : > { %v1410_v15 = vmul.f32 1.442695, %v1408_v12  ;;  %v1172_v2 = vsel %vm796_vm4, %v2767_v13, 0.0  ;;  %2571 = vmatprep.subr.bf16.mxu1 %v2958_v16 }
 0x43e   : > { %1173 = vadd.xlane.f32.xlu1 %v1172_v2  ;;  %v1407_v17 = vpop.xlane.xlu1 %1406 }
 0x43f   : > { %2774 = vpow2.f32 %v1410_v15  ;;  %v1409_v18 = vsub.f32 %v3330_v14, %v1407_v17 }
 0x440   : > { %v2769_v19 = vpop.eup %2768 }
 0x441   : > { %v1412_v21 = vmul.f32 1.442695, %v1409_v18  ;;  %v1175_v9 = vsel %vm796_vm4, %v2769_v19, 0.0  ;;  %v1178_v24 = vpack.c.bf16 %v2769_v19, %v2767_v13 }
 0x442   : > { %1176 = vadd.xlane.f32.xlu0 %v1175_v9 }
 0x443   : > { %2776 = vpow2.f32 %v1412_v21  ;;  %2562 = vmatmul.mubr.msk.bf16.vlgmr.msra.gmra.mxu1 %vm796_vm4, %v1178_v24 }
 0x444   : > { %v2771_v25 = vpop.eup %2770  ;;  %2573 = vmatprep.mubr.msk.bf16.mxu1 %vm2959_vm1, %v2958_v16 }
 0x445   : > { %v1293_v27 = vsel %vm796_vm4, %v2771_v25, 0.0 }
 0x446   : > { %1294 = vadd.xlane.f32.xlu1 %v1293_v27  ;;  %v1528_v30 = vpop.xlane.xlu1 %1527 }
 0x447   : > { %v1530_v31 = vsub.f32 %v3335_v22, %v1528_v30 }
 0x448   : > { %v2773_v14 = vpop.eup %2772 }
 0x449   : > { %v1533_v32 = vmul.f32 1.442695, %v1530_v31  ;;  %v1296_v34 = vsel %vm796_vm4, %v2773_v14, 0.0  ;;  %v1299_v47 = vpack.c.bf16 %v2773_v14, %v2771_v25 }
 0x44a   : > { %1297 = vadd.xlane.f32.xlu0 %v1296_v34  ;;  %v1646_v36 = vpop.xlane.xlu1 %1645 }
 0x44b   : > { %2778 = vpow2.f32 %v1533_v32  ;;  %v1650_v54 = vsub.f32 %v3344_v29, %v1646_v36 }
 0x44c   : > { %v2775_v38 = vpop.eup %2774 }
 0x44d   : > { %v1414_v40 = vsel %vm796_vm4, %v2775_v38, 0.0  ;;  %v1652_v33 = vmul.f32 1.442695, %v1650_v54 }
 0x44e   : > { %1415 = vadd.xlane.f32.xlu1 %v1414_v40  ;;  %v1649_v42 = vpop.xlane.xlu1 %1648 }
 0x44f   : > { %v1651_v43 = vsub.f32 %v3354_v35, %v1649_v42 }
 0x450   : > { %v2777_v44 = vpop.eup %2776 }
 0x451   : > { %v1654_v46 = vmul.f32 1.442695, %v1651_v43  ;;  %v1417_v23 = vsel %vm796_vm4, %v2777_v44, 0.0  ;;  %v1420_v59 = vpack.c.bf16 %v2777_v44, %v2775_v38 }
 0x452   : > { %1418 = vadd.xlane.f32.xlu0 %v1417_v23  ;;  %v1301_v22 = vpop.permute.xlu1 %1300 }
 0x453   : > { %2780 = vpow2.f32 %v1654_v46  ;;  %2572 = vmatpush3.bf16.msra.mxu1 %v1301_v22 }
 0x454   : > { %2583 = vmatprep.subr.bf16.mxu1 %v2958_v16 }
 0x456   : > { %2574 = vmatmul.mubr.msk.bf16.vlgmr.msra.gmra.mxu1 %vm796_vm4, %v1299_v47 }
 0x457   : > { %2585 = vmatprep.mubr.msk.bf16.mxu1 %vm2959_vm1, %v2958_v16 }
 0x458   : > { %v2779_v48 = vpop.eup %2778 }
 0x459   : > { %v1538_v50 = vsel %vm796_vm4, %v2779_v48, 0.0 }
 0x45a   : > { %1539 = vadd.xlane.f32.xlu0 %v1538_v50 }
 0x460   : > { %v2781_v35 = vpop.eup %2780 }
 0x461   : > { %v1659_v51 = vsel %vm796_vm4, %v2781_v35, 0.0 }
 0x462   : > { %1660 = vadd.xlane.f32.xlu0 %v1659_v51 }
 0x466   : > { %813 = vadd.xlane.f32.xlu0 %v812_v52 }
 0x467   : > { %v1525_v55 = vpop.xlane.xlu0 %1524 }
 0x468   : > { %v1529_v61 = vsub.f32 %v3364_v39, %v1525_v55 }
 0x46a   : > { %v1531_v56 = vmul.f32 1.442695, %v1529_v61 }
 0x46b   : > { %v1422_v57 = vpop.permute.xlu0 %1421 }
 0x46c   : > { %2782 = vpow2.f32 %v1531_v56  ;;  %2584 = vmatpush3.bf16.msra.mxu1 %v1422_v57 }
 0x46d   : > { %2595 = vmatprep.subr.bf16.mxu1 %v2958_v16  ;;  %2784 = vpow2.f32 %v1652_v33 }
 0x46f   : > { %v1543_v37 = vpop.permute.xlu0 %1542  ;;  %2586 = vmatmul.mubr.msk.bf16.vlgmr.msra.gmra.mxu1 %vm796_vm4, %v1420_v59 }
 0x470   : > { %2596 = vmatpush3.bf16.msra.mxu1 %v1543_v37  ;;  %2597 = vmatprep.mubr.msk.bf16.mxu1 %vm2959_vm1, %v2958_v16 }
 0x471   : > { %2607 = vmatprep.subr.bf16.mxu1 %v2958_v16 }
 0x473   : > { %v1664_v41 = vpop.permute.xlu0 %1663 }
 0x479   : > { %v2783_v28 = vpop.eup %2782 }
 0x47a   : > { %v1535_v29 = vsel %vm796_vm4, %v2783_v28, 0.0  ;;  %v1541_v39 = vpack.c.bf16 %v2779_v48, %v2783_v28  ;;  %v2785_v62 = vpop.eup %2784 }
 0x47b   : > { %1536 = vadd.xlane.f32.xlu1 %v1535_v29  ;;  %v1656_v63 = vsel %vm796_vm4, %v2785_v62, 0.0  ;;  %v1662_v45 = vpack.c.bf16 %v2781_v35, %v2785_v62 }
 0x47c   : > { %2598 = vmatmul.mubr.msk.bf16.vlgmr.msra.gmra.mxu1 %vm796_vm4, %v1541_v39 }
 0x47d   : > { %2608 = vmatpush3.bf16.msra.mxu1 %v1664_v41  ;;  %2609 = vmatprep.mubr.msk.bf16.mxu1 %vm2959_vm1, %v2958_v16  ;;  %v2718_v41 = vld [vmem:[#allocation6 + $0x18] sm:$0xff]  }
 0x47e   : > { %2614 = vmatpush3.bf16.msra.mxu0 %v2718_v41  ;;  %v2831_v41 = vld [vmem:[%s3142_s22 + $0x8] sm:$0xff] }
 0x47f   : > { %1657 = vadd.xlane.f32.xlu1 %v1656_v63  ;;  %2615 = vmatprep.subr.bf16.mxu0 %v2958_v16 }
 0x481   : > { %v3428_v0 = vpop.f32.mrf.mxu1 }
 0x483   : > { %v2527_v3 = vpop.f32.mrf.mxu1  ;;  %810 = vadd.xlane.f32.xlu1 %v809_v1 }
 0x484   : > { %2610 = vmatmul.mubr.msk.bf16.vlgmr.msra.gmra.mxu1 %vm796_vm4, %v1662_v45 }
 0x485   : > { %v3433_v49 = vpop.f32.mrf.mxu1 }
 0x487   : > { %v2528_v4 = vpop.f32.mrf.mxu1 }
 0x488   : > { %v2719_v4 = vld [vmem:[#allocation6 + $0x10] sm:$0xff]  }
 0x489   : > { %2616 = vmatpush3.bf16.msra.mxu0 %v2719_v4 }
 0x48a   : > { %2617 = vmatprep.subr.bf16.mxu0 %v2958_v16 }
 0x4b7   : > { %v931_v53 = vpop.xlane.xlu1 %930 }
 0x4b8   : > { %2786 = vrcp.f32 %v931_v53 }
 0x4bb   : > { %v934_v5 = vpop.xlane.xlu0 %933 }
 0x4bc   : > { %2788 = vrcp.f32 %v934_v5 }
 0x4bf   : > { %v1053_v6 = vpop.xlane.xlu0 %1052 }
 0x4c0   : > { %2790 = vrcp.f32 %v1053_v6  ;;  %v2720_v6 = vld [vmem:[#allocation6 + $0x8] sm:$0xff]  }
 0x4c1   : > { %2618 = vmatpush3.bf16.msra.mxu0 %v2720_v6 }
 0x4c2   : > { %2619 = vmatprep.subr.bf16.mxu0 %v2958_v16 }
 0x4c3   : > { %v1056_v7 = vpop.xlane.xlu0 %1055 }
 0x4c4   : > { %2792 = vrcp.f32 %v1056_v7 }
 0x4c5   : > { %v2787_v58 = vpop.eup %2786 }
 0x4c7   : > { %v1174_v8 = vpop.xlane.xlu1 %1173 }
 0x4c8   : > { %2794 = vrcp.f32 %v1174_v8 }
 0x4c9   : > { %v2789_v11 = vpop.eup %2788 }
 0x4cb   : > { %v1177_v12 = vpop.xlane.xlu0 %1176 }
 0x4cc   : > { %2796 = vrcp.f32 %v1177_v12 }
 0x4cd   : > { %v2791_v17 = vpop.eup %2790 }
 0x4cf   : > { %v1295_v34 = vpop.xlane.xlu1 %1294 }
 0x4d0   : > { %2798 = vrcp.f32 %v1295_v34 }
 0x4d1   : > { %v2793_v9 = vpop.eup %2792 }
 0x4d3   : > { %v1298_v43 = vpop.xlane.xlu0 %1297 }
 0x4d4   : > { %2800 = vrcp.f32 %v1298_v43 }
 0x4d5   : > { %v2795_v30 = vpop.eup %2794 }
 0x4d7   : > { %v1416_v51 = vpop.xlane.xlu1 %1415 }
 0x4d8   : > { %2802 = vrcp.f32 %v1416_v51 }
 0x4d9   : > { %v2797_v36 = vpop.eup %2796 }
 0x4db   : > { %v1419_v52 = vpop.xlane.xlu0 %1418 }
 0x4dc   : > { %2804 = vrcp.f32 %v1419_v52 }
 0x4dd   : > { %v2799_v44 = vpop.eup %2798 }
 0x4e1   : > { %v2801_v47 = vpop.eup %2800 }
 0x4e3   : > { %v1540_v33 = vpop.xlane.xlu0 %1539 }
 0x4e5   : > { %v2803_v55 = vpop.eup %2802 }
 0x4e9   : > { %v2805_v59 = vpop.eup %2804 }
 0x4eb   : > { %v1661_v62 = vpop.xlane.xlu0 %1660 }
 0x4f3   : > { %v977_v10 = vpop.f32.mrf.mxu1 }
 0x4f4   : > { %v986_v26 = vmul.f32 %v2787_v58, %v977_v10 }
 0x4f5   : > { %v2539_v60 = vpop.f32.mrf.mxu1 }
 0x4f6   : > { %1716 = vrot.lane.b32.xlu1 %v986_v26, %s3629_s23  ;;  %v2721_v26 = vld [vmem:[#allocation6] sm:$0xff]  }
 0x4f7   : > { %v980_v13 = vpop.f32.mrf.mxu1  ;;  %2620 = vmatpush3.bf16.msra.mxu0 %v2721_v26 }
 0x4f8   : > { %v987_v15 = vmul.f32 %v2789_v11, %v980_v13 }
 0x4f9   : > { %v2540_v2 = vpop.f32.mrf.mxu1 }
 0x4fa   : > { %1718 = vrot.lane.b32.xlu0 %v987_v15, %s3629_s23 }
 0x4fb   : > { %v1098_v18 = vpop.f32.mrf.mxu1 }
 0x4fc   : > { %v1107_v19 = vmul.f32 %v2791_v17, %v1098_v18 }
 0x4fd   : > { %v2551_v21 = vpop.f32.mrf.mxu1 }
 0x4fe   : > { %1724 = vrot.lane.b32.xlu1 %v1107_v19, %s2969_s15  ;;  %v814_v21 = vpop.xlane.xlu0 %813 }
 0x4ff   : > { %v1101_v24 = vpop.f32.mrf.mxu1 }
 0x500   : > { %v1108_v25 = vmul.f32 %v2793_v9, %v1101_v24 }
 0x501   : > { %v2552_v27 = vpop.f32.mrf.mxu1 }
 0x502   : > { %1726 = vrot.lane.b32.xlu1 %v1108_v25, %s2969_s15  ;;  %s459_s15 = sand.u32 1, %s2944_s26  }
 0x503   : > { %v1219_v31 = vpop.f32.mrf.mxu1 }
 0x504   : > { %v1228_v14 = vmul.f32 %v2795_v30, %v1219_v31  ;;  %v1537_v54 = vpop.xlane.xlu1 %1536 }
 0x505   : > { %v2563_v32 = vpop.f32.mrf.mxu1  ;;  %2806 = vrcp.f32 %v1537_v54 }
 0x506   : > { %1732 = vrot.lane.b32.xlu1 %v1228_v14, %s2970_s16  ;;  %2808 = vrcp.f32 %v1540_v33 }
 0x507   : > { %v1222_v38 = vpop.f32.mrf.mxu1 }
 0x508   : > { %v1229_v40 = vmul.f32 %v2797_v36, %v1222_v38  ;;  %v1658_v28 = vpop.xlane.xlu1 %1657 }
 0x509   : > { %v2564_v42 = vpop.f32.mrf.mxu1  ;;  %2810 = vrcp.f32 %v1658_v28 }
 0x50a   : > { %1734 = vrot.lane.b32.xlu0 %v1229_v40, %s2970_s16  ;;  %2812 = vrcp.f32 %v1661_v62 }
 0x50c   : > { %v811_v17 = vpop.xlane.xlu1 %810 }
 0x50d   : > { %2814 = vrcp.f32 %v811_v17  ;;  %v2733_v17 = vld [vmem:[%s3618_s9 + $0x4] ss:$8 sps:$4 sm:$0xff]  }
 0x50e   : > { %2816 = vrcp.f32 %v814_v21 }
 0x512   : > { %v2807_v63 = vpop.eup %2806 }
 0x513   : > { %v2809_v53 = vpop.eup %2808 }
 0x516   : > { %v1340_v46 = vpop.f32.mrf.mxu1  ;;  %v2811_v8 = vpop.eup %2810 }
 0x517   : > { %v1349_v23 = vmul.f32 %v2799_v44, %v1340_v46  ;;  %v2813_v12 = vpop.eup %2812 }
 0x518   : > { %v2575_v22 = vpop.f32.mrf.mxu1 }
 0x519   : > { %1740 = vrot.lane.b32.xlu1 %v1349_v23, %s2971_s27 }
 0x51a   : > { %v1343_v48 = vpop.f32.mrf.mxu1  ;;  %v2815_v30 = vpop.eup %2814 }
 0x51b   : > { %v1350_v50 = vmul.f32 %v2801_v47, %v1343_v48  ;;  %v862_v32 = vmul.f32 %v2815_v30, %v3428_v0  ;;  %v2817_v34 = vpop.eup %2816 }
 0x51c   : > { %v2576_v35 = vpop.f32.mrf.mxu1  ;;  %v863_v43 = vmul.f32 %v2817_v34, %v3433_v49 }
 0x51d   : > { %1742 = vrot.lane.b32.xlu0 %v1350_v50, %s2971_s27  ;;  %s2976_s27 = smov [#allocation8]  }
 0x52f   : > { %v1461_v61 = vpop.f32.mrf.mxu1 }
 0x530   : > { %v1470_v56 = vmul.f32 %v2803_v55, %v1461_v61 }
 0x531   : > { %v2587_v57 = vpop.f32.mrf.mxu1 }
 0x532   : > { %1748 = vrot.lane.b32.xlu1 %v1470_v56, %s2972_s14 }
 0x533   : > { %v1464_v37 = vpop.f32.mrf.mxu1 }
 0x534   : > { %v1471_v29 = vmul.f32 %v2805_v59, %v1464_v37  ;;  %v2830_v37 = vld [vmem:[%s3142_s22] sm:$0xff] }
 0x535   : > { %v2588_v39 = vpop.f32.mrf.mxu1 }
 0x536   : > { %1750 = vrot.lane.b32.xlu0 %v1471_v29, %s2972_s14  ;;  %s2331_s14 = sshll.u32 %s459_s15, 4 }
 0x53c   : > { %v1582_v1 = vpop.f32.mrf.mxu1 }
 0x53d   : > { %v1591_v45 = vmul.f32 %v2807_v63, %v1582_v1 }
 0x53e   : > { %v2599_v3 = vpop.f32.mrf.mxu1 }
 0x53f   : > { %1756 = vrot.lane.b32.xlu1 %v1591_v45, %s2973_s17 }
 0x540   : > { %v1585_v5 = vpop.f32.mrf.mxu1 }
 0x541   : > { %v1592_v7 = vmul.f32 %v2809_v53, %v1585_v5 }
 0x542   : > { %v2600_v58 = vpop.f32.mrf.mxu1 }
 0x543   : > { %1758 = vrot.lane.b32.xlu0 %v1592_v7, %s2973_s17  ;;  %s2406_s17 = sshll.u32 %s3069_s29, 8  ;;  %s3568_s29 = scalar_lea.sflag [#allocation5], %s459_s15 }
 0x544   : > { %v1703_v10 = vpop.f32.mrf.mxu1  ;;  %s3562_s21 = scalar_lea.hbm %s3622_s13, %s2406_s17 }
 0x545   : > { %v1712_v60 = vmul.f32 %v2811_v8, %v1703_v10 }
 0x546   : > { %v2611_v11 = vpop.f32.mrf.mxu1 }
 0x547   : > { %1764 = vrot.lane.b32.xlu1 %v1712_v60, %s2974_s20  ;;  %v2724_v60 = vld [vmem:[%s3618_s9 + $0x34] ss:$8 sps:$4 sm:$0xff]   ;;  %v2722_v11 = vld [vmem:[%s3618_s9 + $0x30] ss:$8 sps:$4 sm:$0xff]  }
 0x548   : > { %v1706_v13 = vpop.f32.mrf.mxu1  ;;  %1988 = vmatprep.subr.bf16.mxu1 %v2724_v60 }
 0x549   : > { %v1713_v15 = vmul.f32 %v2813_v12, %v1706_v13  ;;  %1989 = vmatpush1.bf16.msra.mxu1 %v2722_v11  ;;  %v2727_v12 = vld [vmem:[%s3618_s9 + $0x24] ss:$8 sps:$4 sm:$0xff]   ;;  %v2725_v13 = vld [vmem:[%s3618_s9 + $0x20] ss:$8 sps:$4 sm:$0xff]  }
 0x54a   : > { %v2612_v2 = vpop.f32.mrf.mxu1  ;;  %1990 = vmatprep.subr.bf16.mxu1 %v2727_v12 }
 0x54b   : > { %1766 = vrot.lane.b32.xlu0 %v1713_v15, %s2974_s20  ;;  %v2728_v15 = vld [vmem:[%s3618_s9 + $0x10] ss:$8 sps:$4 sm:$0xff]   ;;  %v2730_v2 = vld [vmem:[%s3618_s9 + $0x14] ss:$8 sps:$4 sm:$0xff]   ;;  %s461_s20 = scalar_lea.vmem [#allocation8], %s2331_s14  ;;  %s2888_s14 = sshll.u32 %s2976_s27, 4  ;;  %s2889_s14 = int_to_ptr.vmem [resolvable:$false] %s2888_s14 }
 0x54c   : > { %s2239_s22 = sshll.u32 %s461_s20, 4  ;;  %s2890_s17 = scalar_lea.vmem %s2889_s14, 512  ;;  %s3565_s22 = int_to_ptr.vmem [resolvable:$true] %s2239_s22 }
 0x54d   : > { %1991 = vmatpush1.bf16.msra.mxu1 %v2725_v13  ;;  %s2884_s16 = scalar_lea.vmem %s3565_s22, 256  ;;  %p2891_p8 = scmp.lt.s32.totalorder %s3565_s22, %s2889_s14 }
 0x54e   : > { %1992 = vmatprep.subr.bf16.mxu1 %v2730_v2  ;;  %p2885_p12 = scmp.ne.s32.totalorder %s3565_s22, %s2884_s16  ;;  %p2892_p11 = scmp.lt.s32.totalorder %s2890_s17, %s2884_s16 }
 0x550   : > { %p2886_p4 = pnand %p2885_p12, %p3642_p13  ;;  %p2893_p0 = por %p2892_p11, %p2891_p8 }
 0x551   : > { %1993 = vmatpush1.bf16.msra.mxu1 %v2728_v15 }
 0x552   : > { %1994 = vmatprep.subr.bf16.mxu1 %v2733_v17  ;;  %p2887_p7 = pneg %p2886_p4 }
 0x554   : > { %p2894_p1 = pnand %p2893_p0, %p2887_p7 }
 0x568   : > { %v1717_v18 = vpop.permute.xlu1 %1716 }
 0x569   : > { %v1770_v36 = vsel %vm748_vm2, %v862_v32, %v1717_v18  ;;  %v2975_v18 = vmov 0  }
 0x56a   : > { %2012 = vmatprep.mubr.bf16.mxu1 %v2975_v18 }
 0x56c   : > { %v1719_v24 = vpop.permute.xlu0 %1718 }
 0x56d   : > { %v1771_v0 = vsel %vm748_vm2, %v863_v43, %v1719_v24 }
 0x570   : > { %v1725_v19 = vpop.permute.xlu1 %1724 }
 0x571   : > { %v1772_v38 = vsel %vm796_vm4, %v1770_v36, %v1725_v19  ;;  %v2731_v19 = vld [vmem:[%s3618_s9] ss:$8 sps:$4 sm:$0xff]  }
 0x572   : > { %1995 = vmatpush1.bf16.msra.mxu1 %v2731_v19 }
 0x574   : > { %v1727_v9 = vpop.permute.xlu1 %1726 }
 0x575   : > { %v1773_v22 = vsel %vm796_vm4, %v1771_v0, %v1727_v9  ;;  %v2735_v0 = vld [vmem:[%s3620_s11 + $0x38] sm:$0xff]  }
 0x578   : > { %v1733_v25 = vpop.permute.xlu1 %1732 }
 0x579   : > { %v1775_v44 = vsel %vm1774_vm5, %v1772_v38, %v1733_v25  ;;  %v2373_v38 = vld [vmem:[%s3617_s8] ss:$0 sm:$0xff] }
 0x57c   : > { %v1735_v27 = vpop.permute.xlu0 %1734 }
 0x57d   : > { %v1776_v35 = vsel %vm1774_vm5, %v1773_v22, %v1735_v27  ;;  %v2737_v22 = vld [vmem:[%s3620_s11 + $0x30] sm:$0xff]  }
 0x58b   : > { %v1741_v16 = vpop.permute.xlu1 %1740 }
 0x58c   : > { %v1778_v46 = vsel %vm1777_vm6, %v1775_v44, %v1741_v16 }
 0x58f   : > { %v1743_v31 = vpop.permute.xlu0 %1742 }
 0x590   : > { %v1779_v49 = vsel %vm1777_vm6, %v1776_v35, %v1743_v31  ;;  %v2741_v35 = vld [vmem:[%s3620_s11 + $0x20] sm:$0xff]  }
 0x5a4   : > { %v1749_v14 = vpop.permute.xlu1 %1748 }
 0x5a5   : > { %v1781_v23 = vsel %vm1780_vm7, %v1778_v46, %v1749_v14  ;;  %v2372_v14 = vld [vmem:[%s3616_s7] ss:$0 sm:$0xff]  ;;  %v2734_v46 = vld [vmem:[%s3620_s11 + $0x78] sm:$0xff]  }
 0x5a6   : > { %2459 = vmatprep.subr.bf16.mxu0 %v2734_v46 }
 0x5a8   : > { %v1751_v40 = vpop.permute.xlu0 %1750 }
 0x5a9   : > { %v1782_v52 = vsel %vm1780_vm7, %v1779_v49, %v1751_v40  ;;  %v2743_v49 = vld [vmem:[%s3620_s11 + $0x18] sm:$0xff]  }
 0x5b1   : > { %v1757_v42 = vpop.permute.xlu1 %1756 }
 0x5b2   : > { %v1784_v47 = vsel %vm1783_vm8, %v1781_v23, %v1757_v42  ;;  %v2736_v23 = vld [vmem:[%s3620_s11 + $0x70] sm:$0xff]  }
 0x5b5   : > { %v1759_v48 = vpop.permute.xlu0 %1758 }
 0x5b6   : > { %v1785_v54 = vsel %vm1783_vm8, %v1782_v52, %v1759_v48  ;;  %v2739_v48 = vld [vmem:[%s3620_s11 + $0x28] sm:$0xff]   ;;  %v2744_v52 = vld [vmem:[%s3620_s11 + $0x50] sm:$0xff]  }
 0x5b9   : > { %v1765_v50 = vpop.permute.xlu1 %1764 }
 0x5ba   : > { %v1787_v51 = vsel %vm1786_vm9, %v1784_v47, %v1765_v50  ;;  %v2738_v47 = vld [vmem:[%s3620_s11 + $0x68] sm:$0xff]   ;;  %v2740_v50 = vld [vmem:[%s3620_s11 + $0x60] sm:$0xff]  }
 0x5bb   : > { %1789 = vst.msk [vmem:[#allocation2] sm:$0xff] %vm472_vm0, %v1787_v51  ;;  %v2742_v51 = vld [vmem:[%s3620_s11 + $0x58] sm:$0xff]  }
 0x5bd   : > { %v1767_v55 = vpop.permute.xlu0 %1766 }
 0x5be   : > { %v1788_v61 = vsel %vm1786_vm9, %v1785_v54, %v1767_v55  ;;  %v2745_v54 = vld [vmem:[%s3620_s11 + $0x10] sm:$0xff]   ;;  %v2746_v55 = vld [vmem:[%s3620_s11 + $0x48] sm:$0xff]  }
 0x5bf   : > { %1790 = vst.msk [vmem:[#allocation2 + $0x8] sm:$0xff] %vm472_vm0, %v1788_v61  ;;  %v2747_v61 = vld [vmem:[%s3620_s11 + $0x8] sm:$0xff]  }
 0x5c2   : > { %v1791_v33 = vld [vmem:[#allocation2] sm:$0xff] }
 0x5c6   : > { %v1792_v56 = vld [vmem:[#allocation2 + $0x8] sm:$0xff] }
 0x5c7   : > { %v1793_v57 = vpack.c.bf16 %v1792_v56, %v1791_v33  ;;  %v2748_v33 = vld [vmem:[%s3620_s11 + $0x40] sm:$0xff]  }
 0x5c8   : > { %v2749_v56 = vld [vmem:[%s3620_s11] sm:$0xff]  }
 0x5c9   : > { %2622 = vmatmul.mubr.msk.bf16.vlgmr.msra.gmra.mxu0 %vm472_vm0, %v1793_v57  ;;  %v1928_v57 = vshrl.u32 %v744_v20, 7 }
 0x5ca   : > { %2460 = vmatpush3.bf16.msra.mxu0 %v2735_v0 }
 0x5cb   : > { %2461 = vmatprep.subr.bf16.mxu0 %v2736_v23 }
 0x5ce   : > { %2462 = vmatpush3.bf16.msra.mxu0 %v2737_v22 }
 0x5cf   : > { %2463 = vmatprep.subr.bf16.mxu0 %v2738_v47 }
 0x5d2   : > { %2464 = vmatpush3.bf16.msra.mxu0 %v2739_v48 }
 0x5d3   : > { %2465 = vmatprep.subr.bf16.mxu0 %v2740_v50 }
 0x5d6   : > { %2466 = vmatpush3.bf16.msra.mxu0 %v2741_v35 }
 0x5d7   : > { %2467 = vmatprep.subr.bf16.mxu0 %v2742_v51 }
 0x5da   : > { %2468 = vmatpush3.bf16.msra.mxu0 %v2743_v49 }
 0x5db   : > { %2469 = vmatprep.subr.bf16.mxu0 %v2744_v52 }
 0x5de   : > { %2470 = vmatpush3.bf16.msra.mxu0 %v2745_v54 }
 0x5df   : > { %2471 = vmatprep.subr.bf16.mxu0 %v2746_v55 }
 0x5e2   : > { %2472 = vmatpush3.bf16.msra.mxu0 %v2747_v61 }
 0x5e3   : > { %2473 = vmatprep.subr.bf16.mxu0 %v2748_v33 }
 0x5e6   : > { %2474 = vmatpush3.bf16.msra.mxu0 %v2749_v56 }
 0x689   : > { %v1863_v59 = vpop.f32.mrf.mxu0 }
 0x68a   : > { %v3456_v28 = vadd.f32 %v2830_v37, %v1863_v59  ;;  %v1929_v59 = vsub.s32 0, %v1928_v57  ;;  %v1925_v37 = vld [vmem:[%s3619_s10] sm:$0x3] }
 0x68b   : > { %v2623_v29 = vpop.f32.mrf.mxu0 }
 0x68c   : > { %v1874_v39 = vsel %vm472_vm0, %v3456_v28, 0.0  ;;  %v1933_v29 = vsub.s32 1, %v1928_v57 }
 0x68d   : > { %1875 = vadd.xlane.f32.xlu1 %v1874_v39  ;;  %v1866_v62 = vpop.f32.mrf.mxu0  ;;  %v1930_v39 = vrot.slane %v1925_v37, %v1929_v59 }
 0x68e   : > { %v3461_v63 = vadd.f32 %v2831_v41, %v1866_v62  ;;  %v1934_v62 = vrot.slane %v1925_v37, %v1933_v29 }
 0x68f   : > { %v2624_v1 = vpop.f32.mrf.mxu0 }
 0x690   : > { %v1877_v45 = vsel %vm472_vm0, %v3461_v63, 0.0 }
 0x691   : > { %1878 = vadd.xlane.f32.xlu0 %v1877_v45 }
 0x716   : > { %v1876_v3 = vpop.xlane.xlu1 %1875 }
 0x717   : > { %v1880_v4 = vmul.f32 0.015625, %v1876_v3 }
 0x719   : > { %v1882_v53 = vsub.f32 %v3456_v28, %v1880_v4 }
 0x71a   : > { %v1879_v5 = vpop.xlane.xlu0 %1878 }
 0x71b   : > { %v1881_v6 = vmul.f32 0.015625, %v1879_v5  ;;  %v1884_v7 = vmul.f32 %v1882_v53, %v1882_v53 }
 0x71d   : > { %v1883_v58 = vsub.f32 %v3461_v63, %v1881_v6  ;;  %v1886_v8 = vsel %vm472_vm0, %v1884_v7, 0.0 }
 0x71e   : > { %1887 = vadd.xlane.f32.xlu0 %v1886_v8 }
 0x71f   : > { %v1885_v10 = vmul.f32 %v1883_v58, %v1883_v58 }
 0x721   : > { %v1889_v26 = vsel %vm472_vm0, %v1885_v10, 0.0 }
 0x722   : > { %1890 = vadd.xlane.f32.xlu0 %v1889_v26 }
 0x7a7   : > { %v1888_v21 = vpop.xlane.xlu0 %1887 }
 0x7a8   : > { %v1892_v9 = vmul.f32 0.015625, %v1888_v21 }
 0x7aa   : > { %v1894_v24 = vadd.f32 1e-05, %v1892_v9 }
 0x7ab   : > { %v1891_v25 = vpop.xlane.xlu0 %1890 }
 0x7ac   : > { %2818 = vrsqrt.f32 %v1894_v24  ;;  %v1893_v27 = vmul.f32 0.015625, %v1891_v25 }
 0x7ae   : > { %v1895_v16 = vadd.f32 1e-05, %v1893_v27 }
 0x7b0   : > { %2820 = vrsqrt.f32 %v1895_v16 }
 0x7b9   : > { %v2819_v30 = vpop.eup %2818 }
 0x7ba   : > { %v1898_v31 = vmul.f32 %v2819_v30, %v1882_v53 }
 0x7bc   : > { %v1906_v36 = vmul.f32 %v2372_v14, %v1898_v31 }
 0x7bd   : > { %v2821_v32 = vpop.eup %2820 }
 0x7be   : > { %v1899_v34 = vmul.f32 %v2821_v32, %v1883_v58  ;;  %v1914_v42 = vadd.f32 %v2373_v38, %v1906_v36 }
 0x7c0   : > { %v1907_v40 = vmul.f32 %v2372_v14, %v1899_v34  ;;  %v2383_v14 = vld [vmem:[%s3621_s12] ss:$0 sm:$0xff] }
 0x7c2   : > { %v1915_v43 = vadd.f32 %v2373_v38, %v1907_v40 }
 0x7c4   : > { %v1916_v44 = vpack.c.bf16 %v1915_v43, %v1914_v42 }
 0x7c6   : > { %2382 = vmatmul.mubr.msk.bf16.vlgmr.msra.gmra.mxu1 %vm472_vm0, %v1916_v44 }
 0x886   : > { %v2014_v41 = vpop.f32.mrf.mxu1 }
 0x887   : > { %v2015_v1 = vadd.f32 %v2014_v41, %v1930_v39 }
 0x888   : > { %v2016_v45 = vpop.f32.mrf.mxu1 }
 0x889   : > { %v2017_v3 = vadd.f32 %v2016_v45, %v1934_v62  ;;  %v2027_v4 = vmul.f32 0.70710677, %v2015_v1  ;;  %v2023_v21 = vmul.f32 0.5, %v2015_v1 }
 0x88a   : > { %v2018_v53 = vpop.f32.mrf.mxu1 }
 0x88b   : > { %v2028_v5 = vmul.f32 0.70710677, %v2017_v3  ;;  %v2019_v6 = vadd.f32 %v2018_v53, %v1930_v39  ;;  %v2024_v17 = vmul.f32 0.5, %v2017_v3 }
 0x88c   : > { %v2020_v7 = vpop.f32.mrf.mxu1 }
 0x88d   : > { %2822 = verf.f32 %v2028_v5  ;;  %v2029_v58 = vmul.f32 0.70710677, %v2019_v6  ;;  %v2021_v20 = vadd.f32 %v2020_v7, %v1934_v62  ;;  %v2025_v2 = vmul.f32 0.5, %v2019_v6 }
 0x88e   : > { %2824 = verf.f32 %v2027_v4 }
 0x88f   : > { %2826 = verf.f32 %v2029_v58  ;;  %v2030_v8 = vmul.f32 0.70710677, %v2021_v20  ;;  %v2026_v18 = vmul.f32 0.5, %v2021_v20 }
 0x891   : > { %2828 = verf.f32 %v2030_v8 }
 0x89a   : > { %v2823_v10 = vpop.eup %2822 }
 0x89b   : > { %v2825_v26 = vpop.eup %2824  ;;  %v2036_v11 = vadd.f32 1.0, %v2823_v10 }
 0x89c   : > { %v2827_v60 = vpop.eup %2826  ;;  %v2035_v15 = vadd.f32 1.0, %v2825_v26 }
 0x89d   : > { %v2037_v12 = vadd.f32 1.0, %v2827_v60  ;;  %v2040_v24 = vmul.f32 %v2036_v11, %v2024_v17 }
 0x89e   : > { %v2829_v13 = vpop.eup %2828  ;;  %v2039_v27 = vmul.f32 %v2035_v15, %v2023_v21 }
 0x89f   : > { %v2038_v19 = vadd.f32 1.0, %v2829_v13  ;;  %v2041_v9 = vmul.f32 %v2037_v12, %v2025_v2 }
 0x8a1   : > { %v2042_v25 = vmul.f32 %v2038_v19, %v2026_v18  ;;  %v2043_v30 = vpack.c.bf16 %v2041_v9, %v2039_v27 }
 0x8a3   : > { %v2044_v16 = vpack.c.bf16 %v2042_v25, %v2040_v24 }
 0x8a5   : > { %2212 = vmatprep.mubr.bf16.mxu0 %v2044_v16 }
 0x8a6   : > { %2213 = vmatmul.mubr.bf16.vlgmr.msra.gmra.mxu0 %v2043_v30 }
 0x966   : > { %v2475_v31 = vpop.f32.mrf.mxu0 }
 0x968   : > { %v2476_v32 = vpop.f32.mrf.mxu0 }
 0x969   : > { %v2477_v34 = vadd.f32 %v2476_v32, %v2475_v31 }
 0x96a   : > { %v2478_v36 = vpop.f32.mrf.mxu0 }
 0x96b   : > { %v2215_v38 = vadd.f32 %v2477_v34, %v2383_v14 }
 0x96c   : > { %v2479_v40 = vpop.f32.mrf.mxu0 }
 0x96d   : > { %v2221_v42 = vadd.f32 %v2215_v38, %v3456_v28  ;;  %v2480_v43 = vadd.f32 %v2479_v40, %v2478_v36 }
 0x96f   : > { %2223 = vst.msk [vmem:[%s461_s20] sm:$0xff] %vm472_vm0, %v2221_v42  ;;  %v2218_v44 = vadd.f32 %v2480_v43, %v2383_v14 }
 0x971   : > { %v2222_v46 = vadd.f32 %v2218_v44, %v3461_v63 }
 0x973   : > { %2224 = vst.msk [vmem:[%s461_s20 + $0x8] sm:$0xff] %vm472_vm0, %v2222_v46 }
 0x974   : > { %2897 = shalt.err (!%p2894_p1)
}
 0x975   : > { %s2898_s15 = scalar_lea.hbm %s3562_s21, 256  ;;  %s2902_s30 = scalar_lea.hbm %s3622_s13, 512 }
 0x976   : > { %p2899_p2 = scmp.ne.s32.totalorder %s3562_s21, %s2898_s15  ;;  %p2903_p5 = scmp.lt.s32.totalorder %s3562_s21, %s3622_s13 }
 0x977   : > { %p2904_p6 = scmp.lt.s32.totalorder %s2902_s30, %s2898_s15 }
 0x978   : > { %p2900_p3 = pnand %p2899_p2, %p3642_p13 }
 0x979   : > { %p2905_p10 = por %p2904_p6, %p2903_p5 }
 0x97a   : > { %p2901_p9 = pneg %p2900_p3 }
 0x97c   : > { %p2906_p12 = pnand %p2905_p10, %p2901_p9 }
 0x97e   : > { %2909 = shalt.err (!%p2906_p12)
}
 0x97f   : > { %s2977_s16 = smov 128   ;;  %s3643_s14 = smov 8  }
 0x980   : > { %2633 = dma.vmem_to_hbm [thread:$0]  (%p3642_p13), %s3565_s22, 256, %s3562_s21, %s3568_s29, %s2977_s16, %s2977_s16, %s3643_s14  }
 0x981 PF: > { %p2650_p4 = scmp.ge.s32.totalorder %s2952_s28, 2  ;;  %s2254_s17 = sand.u32 1, %s2940_s25  }
 0x982   : > { %p3644_p7 = scmp.ne.s32.totalorder %s3634_s19, 0  ;;  %s2255_s23 = scalar_lea.sflag [#allocation5], %s2254_s17 }
 0x984   : > { %p2643_p8 = pnand %p2650_p4, %p3644_p7 }
 0x986   : > { %p2644_p11 = pneg %p2643_p8 }
 0x988   : > { %2935 = dma.done.wait (%p2644_p11), %s2255_s23, 256  }
 0x989   : > { %2937 = vsyncadd (%p2644_p11), %s2255_s23, 4294967040  ;;  %s3645_s28 = sld [smem:[#allocation13_spill]]  ;;  %s3648_s25 = smov %s2944_s26 }
 0x98a   : > { %s3646_s18 = sld [smem:[#allocation12_spill]] }
 0x98b   : > { %s3647_s27 = sld [smem:[#allocation14_spill]] }
 0x98f   : > { %p25_p0 = scmp.ge.s32.totalorder %s3645_s28, 4  }
 0x990   : > { %s3649_s26 = smov %s3646_s18 }
 0x991   :  { %27 = sbr.rel (!%p25_p0) target bundleno = 5 (0x5), region = 116 }
 0x996   :  { %2260 = vsyncpa [#allocation4], 1 }
 0x997   :  { %2262 = vsyncpa [#allocation4 + $0x1], 1 }
 0x998   :  { %2263 = vsyncpa [#allocation7], 1 }
 0x999   :  { %2264 = vsyncpa [#allocation5], 1 }
 0x99a   :  { %2266 = vsyncpa [#allocation5 + $0x1], 1 }

// kernel: tpu_custom_call.1
= control target key start
LH: loop header
LB: loop body
LE: loop exit
PB: predicated region body
PF: predicated region fallthrough
CT: control target
= control target key end

     0   :  { %18 = vsyncpa [#allocation4], 0  ;;  %s3609_s0 = inlined_call_operand.vmem [shape: f32[2,16,64], index: 0, kind: input, shape index: {}]   ;;  %s3610_s1 = inlined_call_operand.hbm [shape: f32[1,64], index: 1, kind: input, shape index: {}]   ;;  %s3611_s2 = inlined_call_operand.vmem [shape: f32[1,64], index: 2, kind: input, shape index: {}]   ;;  %s3612_s3 = inlined_call_operand.vmem [shape: bf16[64,64], index: 3, kind: input, shape index: {}]   ;;  %s3613_s4 = inlined_call_operand.vmem [shape: bf16[64,64], index: 4, kind: input, shape index: {}]   ;;  %s3614_s5 = inlined_call_operand.vmem [shape: bf16[64,64], index: 5, kind: input, shape index: {}]   ;;  %s3615_s6 = inlined_call_operand.hbm [shape: bf16[64,64], index: 6, kind: input, shape index: {}]   ;;  %s3616_s7 = inlined_call_operand.vmem [shape: f32[1,64], index: 7, kind: input, shape index: {}]   ;;  %s3617_s8 = inlined_call_operand.vmem [shape: f32[1,64], index: 8, kind: input, shape index: {}]   ;;  %s3618_s9 = inlined_call_operand.vmem [shape: bf16[64,256], index: 9, kind: input, shape index: {}]   ;;  %s3619_s10 = inlined_call_operand.vmem [shape: f32[1,256], index: 10, kind: input, shape index: {}]   ;;  %s3620_s11 = inlined_call_operand.vmem [shape: bf16[256,64], index: 11, kind: input, shape index: {}]   ;;  %s3621_s12 = inlined_call_operand.vmem [shape: f32[1,64], index: 12, kind: input, shape index: {}]   ;;  %s3622_s13 = inlined_call_operand.hbm [shape: f32[2,16,64], index: 13, kind: output, shape index: {}]  }
   0x1   :  { %19 = vsyncpa [#allocation7], 0 }
   0x2   :  { %20 = vsyncpa [#allocation5], 0 }
   0x3   :  { %22 = vsyncpa [#allocation5 + $0x1], 0  ;;  %s3048_s25 = smov 0   ;;  %s3050_s26 = smov 0  }
   0x4   :  { %s3052_s27 = smov 0   ;;  %s3054_s28 = smov 0  }
   0x5 LB: > { %3630 = sst [smem:[#allocation12_spill]] %s2948_s27  ;;  %s3069_s29 = sadd.s32 4294967295, %s2952_s28   ;;  %s2952_s28 = sphi %s3054_s28, %s3645_s28   ;;  %s2948_s27 = sphi %s3052_s27, %s3647_s27   ;;  %s2944_s26 = sphi %s3050_s26, %s3649_s26   ;;  %s2940_s25 = sphi %s3048_s25, %s3648_s25  }
   0x6   : > { %s2323_s30 = sadd.s32 4294967294, %s2952_s28   ;;  %s3073_s14 = sadd.s32 1, %s2952_s28  }
   0x7   : > { %3631 = sst [smem:[#allocation13_spill]] %s3073_s14  ;;  %s313_s15 = sadd.s32 1, %s2948_s27 }
   0x8   : > { %s310_s16 = ssub.s32 %s2952_s28, %s3073_s14  ;;  %p323_p0 = scmp.ne.s32.totalorder %s2948_s27, %s2944_s26 }
   0x9   : > { %p311_p1 = scmp.eq.s32.totalorder %s310_s16, 0  ;;  %p324_p2 = scmp.eq.s32.totalorder %s3069_s29, 1 }
   0xa   : > { %p329_p3 = scmp.ne.s32.totalorder %s2944_s26, %s2940_s25  ;;  %p330_p4 = scmp.eq.s32.totalorder %s2323_s30, 1 }
   0xb   : > { %s3084_s17 = scalar_select %p311_p1, %s2948_s27, %s313_s15  }
   0xc   : > { %p3086_p5 = por %p324_p2, %p323_p0  ;;  %p3090_p6 = por %p330_p4, %p329_p3 }
   0xd   : > { %3632 = sst [smem:[#allocation14_spill]] %s3084_s17  ;;  %p2324_p7 = scmp.ge.s32.totalorder %s2952_s28, 1 }
   0xe   : > { %s3633_s18 = scalar_select %p3086_p5, 1, 0 }
   0xf   : > { %s3634_s19 = scalar_select %p3090_p6, 1, 0 }
  0x10   : > { %p337_p8 = scmp.lt.s32.totalorder %s2952_s28, 3  ;;  %p3623_p9 = scmp.eq.s32.totalorder %s3069_s29, 0 }
  0x11   : > { %s2954_s21 = smov [#allocation3]   ;;  %s2955_s23 = smov [#allocation6]  }
  0x12   : > { %p3097_p10 = pnand %p2324_p7, %p337_p8  ;;  %s350_s22 = sshll.u32 %s2954_s21, 4  ;;  %s351_s22 = int_to_ptr.vmem [resolvable:$true] %s350_s22 }
  0x13   : > { %s372_s24 = sshll.u32 %s2955_s23, 4  ;;  %s2843_s15 = scalar_lea.vmem %s351_s22, 16  ;;  %s373_s24 = int_to_ptr.vmem [resolvable:$true] %s372_s24 }
  0x14   : > { %s3635_s20 = scalar_select %p3097_p10, 1, 0 }
  0x15   : > { %p2635_p11 = pneg %p3097_p10  ;;  %p2844_p0 = scmp.ne.s32.totalorder %s351_s22, %s2843_s15 }
  0x16   : > { %s2850_s16 = scalar_lea.vmem %s351_s22, 32  ;;  %p2851_p3 = scmp.lt.s32.totalorder %s351_s22, %s351_s22 }
  0x17   : > { %p3105_p12 = pnand %p3623_p9, %p2635_p11  ;;  %p2852_p4 = scmp.lt.s32.totalorder %s2850_s16, %s2843_s15 }
  0x19   : > { %p2834_p13 = pneg %p3105_p12  ;;  %p2853_p7 = por %p2852_p4, %p2851_p3 }
  0x1b   : > { %p2846_p1 = pnand %p2844_p0, %p2834_p13 }
  0x1d   : > { %p2847_p2 = pneg %p2846_p1 }
  0x1f   : > { %p2854_p8 = pnand %p2853_p7, %p2847_p2 }
  0x21   : > { %2857 = shalt.err (!%p2854_p8)
}
  0x22   : > { %2638 = dma.hbm_to_vmem [thread:$0]  (!%p3105_p12), %s3610_s1, 16, %s351_s22, [#allocation4]  }
  0x23   : > { %s2869_s17 = scalar_lea.vmem %s373_s24, 512  ;;  %p2877_p1 = scmp.lt.s32.totalorder %s373_s24, %s373_s24 }
  0x24   : > { %p2870_p11 = scmp.ne.s32.totalorder %s373_s24, %s2869_s17  ;;  %p2878_p6 = scmp.lt.s32.totalorder %s2869_s17, %s2869_s17 }
  0x26   : > { %p2872_p9 = pnand %p2870_p11, %p2834_p13  ;;  %p2879_p5 = por %p2878_p6, %p2877_p1 }
  0x28   : > { %p2873_p0 = pneg %p2872_p9 }
  0x2a   : > { %p2880_p10 = pnand %p2879_p5, %p2873_p0 }
  0x2c   : > { %2883 = shalt.err (!%p2880_p10)
}
  0x2d   : > { %s2956_s15 = smov 64   ;;  %s2957_s16 = smov 4  }
  0x2e   : > { %2641 = dma.hbm_to_vmem [thread:$0]  (!%p3105_p12), %s3615_s6, 512, %s373_s24, [#allocation7], %s2956_s15, %s2956_s15, %s2957_s16  }
  0x2f   : > { %p3637_p2 = scmp.ne.s32.totalorder %s3635_s20, 0 }
  0x30   : > { %p3638_p3 = scmp.eq.s32.totalorder (!%p3637_p2), %s3069_s29, 0 }
  0x31   : > { %414 = sbr.rel (%p3637_p2) target bundleno = 2433 (0x981), region = 72 }
  0x36   : > { %2927 = dma.done.wait (%p3638_p3), [#allocation4], 16   ;;  %p3639_p9 = pmov %p3638_p3 }
  0x37   : > { %p3640_p5 = pmov %p3638_p3 }
  0x38   : > { %2929 = vsyncadd (%p3639_p9), [#allocation4], 4294967280 }
  0x39   : > { %2931 = dma.done.wait (%p3640_p5), [#allocation7], 512   ;;  %p3641_p6 = pmov %p3638_p3 }
  0x3a   : > { %p462_p10 = scmp.lt.s32.totalorder %s3069_s29, 1  ;;  %vm472_vm0 = vcmask 523264   ;;  %v2706_v14 = vld [vmem:[%s3612_s3 + $0x18] sm:$0xff]   ;;  %v2958_v16 = vmov 0.0   ;;  %v2708_v17 = vld [vmem:[%s3612_s3 + $0x10] sm:$0xff]   ;;  %vm2959_vm1 = vmmov 0  }
  0x3b   : > { %2933 = vsyncadd (%p3641_p6), [#allocation7], 4294966784  ;;  %v2707_v15 = vld [vmem:[%s3614_s5 + $0x18] sm:$0xff]   ;;  %2481 = vmatprep.subr.bf16.mxu1 %v2958_v16  ;;  %2505 = vmatprep.subr.bf16.mxu0 %v2958_v16  ;;  %v2709_v18 = vld [vmem:[%s3614_s5 + $0x10] sm:$0xff]   ;;  %vm748_vm2 = vcmask 64512   ;;  %s2962_s17 = smov 104  }
  0x3c   : > { %s463_s27 = scalar_select %p462_p10, %s3069_s29, 1  ;;  %2482 = vmatpush3.bf16.msra.mxu1 %v2706_v14  ;;  %2506 = vmatpush3.bf16.msra.mxu0 %v2707_v15  ;;  %v2710_v19 = vld [vmem:[%s3612_s3 + $0x8] sm:$0xff]   ;;  %v2712_v21 = vld [vmem:[%s3612_s3] sm:$0xff]   ;;  %v2334_v31 = vld [vmem:[#allocation3] ss:$0 sm:$0xff]  ;;  %vm796_vm4 = vcmask 130048  }
  0x3d   : > { %2483 = vmatprep.subr.bf16.mxu1 %v2958_v16  ;;  %2507 = vmatprep.subr.bf16.mxu0 %v2958_v16  ;;  %v2711_v20 = vld [vmem:[%s3614_s5 + $0x8] sm:$0xff]   ;;  %v2713_v22 = vld [vmem:[%s3614_s5] sm:$0xff]   ;;  %v2714_v39 = vld [vmem:[%s3613_s4 + $0x18] sm:$0xff]   ;;  %s2963_s20 = smov 96   ;;  %s2964_s24 = smov 88   ;;  %vm1774_vm5 = vcmask 195584  }
  0x3e   : > { %s2405_s14 = sshll.u32 %s463_s27, 4  ;;  %2489 = vmatprep.mubr.msk.bf16.mxu1 %vm2959_vm1, %v2958_v16  ;;  %2513 = vmatprep.mubr.msk.bf16.mxu0 %vm2959_vm1, %v2958_v16  ;;  %v2335_v35 = vld [vmem:[%s3611_s2] ss:$0 sm:$0xff]  ;;  %v2715_v41 = vld [vmem:[%s3613_s4 + $0x10] sm:$0xff]   ;;  %v2716_v42 = vld [vmem:[%s3613_s4 + $0x8] sm:$0xff]   ;;  %s2960_s27 = smov 120  }
  0x3f   : > { %s3142_s22 = scalar_lea.vmem %s3609_s0, %s2405_s14  ;;  %v2717_v43 = vld [vmem:[%s3613_s4] sm:$0xff]   ;;  %s2961_s14 = smov 112   ;;  %vm1777_vm6 = vcmask 261120   ;;  %vm1780_vm7 = vcmask 326656   ;;  %vm1783_vm8 = vcmask 392192   ;;  %vm1786_vm9 = vcmask 457728  }
  0x40   : > { %v468_v0 = vld [vmem:[%s3142_s22] sm:$0xff]  ;;  %v469_v1 = vld [vmem:[%s3142_s22 + $0x8] sm:$0xff]  ;;  %2484 = vmatpush3.bf16.msra.mxu1 %v2708_v17  ;;  %2508 = vmatpush3.bf16.msra.mxu0 %v2709_v18  ;;  %s2965_s30 = smov 80   ;;  %s2966_s21 = smov 72  }
  0x41   : > { %v473_v2 = vsel %vm472_vm0, %v468_v0, 0.0  ;;  %v476_v3 = vsel %vm472_vm0, %v469_v1, 0.0  ;;  %2485 = vmatprep.subr.bf16.mxu1 %v2958_v16  ;;  %2509 = vmatprep.subr.bf16.mxu0 %v2958_v16  ;;  %s3629_s23 = smov 8   ;;  %s2969_s15 = smov 16  }
  0x42   : > { %474 = vadd.xlane.f32.xlu0 %v473_v2  ;;  %s2970_s16 = smov 24   ;;  %p3642_p13 = scmp.ne.s32.totalorder %s3633_s18, 0 }
  0x44   : > { %2486 = vmatpush3.bf16.msra.mxu1 %v2710_v19  ;;  %2510 = vmatpush3.bf16.msra.mxu0 %v2711_v20  ;;  %v744_v20 = vlaneseq }
  0x45   : > { %2487 = vmatprep.subr.bf16.mxu1 %v2958_v16  ;;  %2511 = vmatprep.subr.bf16.mxu0 %v2958_v16 }
  0x46   : > { %477 = vadd.xlane.f32.xlu0 %v476_v3 }
  0x48   : > { %2488 = vmatpush3.bf16.msra.mxu1 %v2712_v21  ;;  %2512 = vmatpush3.bf16.msra.mxu0 %v2713_v22  ;;  %v745_v21 = vand.u32 127, %v744_v20  ;;  %v2967_v22 = vmov -1e+30  }
  0x49   : > { %2493 = vmatprep.subr.bf16.mxu1 %v2958_v16  ;;  %2529 = vmatprep.subr.bf16.mxu0 %v2958_v16 }
  0x4a   : > { %vm746_vm3 = vcmp.lt.s32.totalorder %v745_v21, 8 }
  0xcb   : > { %v475_v4 = vpop.xlane.xlu0 %474 }
  0xcc   : > { %v480_v5 = vmul.f32 0.015625, %v475_v4 }
  0xce   : > { %v482_v6 = vsub.f32 %v468_v0, %v480_v5 }
  0xcf   : > { %v478_v7 = vpop.xlane.xlu0 %477 }
  0xd0   : > { %v481_v8 = vmul.f32 0.015625, %v478_v7  ;;  %v484_v9 = vmul.f32 %v482_v6, %v482_v6 }
  0xd2   : > { %v483_v10 = vsub.f32 %v469_v1, %v481_v8  ;;  %v486_v11 = vsel %vm472_vm0, %v484_v9, 0.0 }
  0xd3   : > { %487 = vadd.xlane.f32.xlu1 %v486_v11 }
  0xd4   : > { %v485_v12 = vmul.f32 %v483_v10, %v483_v10 }
  0xd6   : > { %v489_v13 = vsel %vm472_vm0, %v485_v12, 0.0 }
  0xd7   : > { %490 = vadd.xlane.f32.xlu1 %v489_v13 }
 0x15c   : > { %v488_v23 = vpop.xlane.xlu1 %487 }
 0x15d   : > { %v492_v24 = vmul.f32 0.015625, %v488_v23  ;;  %v3276_v23 = vsel %vm746_vm3, 0.0, %v2967_v22 }
 0x15f   : > { %v494_v25 = vadd.f32 1e-05, %v492_v24 }
 0x160   : > { %v491_v26 = vpop.xlane.xlu1 %490 }
 0x161   : > { %2750 = vrsqrt.f32 %v494_v25  ;;  %v493_v27 = vmul.f32 0.015625, %v491_v26 }
 0x163   : > { %v495_v28 = vadd.f32 1e-05, %v493_v27 }
 0x165   : > { %2752 = vrsqrt.f32 %v495_v28 }
 0x16e   : > { %v2751_v29 = vpop.eup %2750 }
 0x16f   : > { %v498_v30 = vmul.f32 %v2751_v29, %v482_v6 }
 0x171   : > { %v506_v34 = vmul.f32 %v2334_v31, %v498_v30 }
 0x172   : > { %v2753_v32 = vpop.eup %2752 }
 0x173   : > { %v499_v33 = vmul.f32 %v2753_v32, %v483_v10  ;;  %v514_v37 = vadd.f32 %v2335_v35, %v506_v34 }
 0x175   : > { %v507_v36 = vmul.f32 %v2334_v31, %v499_v33 }
 0x177   : > { %v515_v38 = vadd.f32 %v2335_v35, %v507_v36 }
 0x179   : > { %v516_v40 = vpack.c.bf16 %v515_v38, %v514_v37 }
 0x17b   : > { %2490 = vmatmul.mubr.msk.bf16.vlgmr.msra.gmra.mxu1 %vm472_vm0, %v516_v40  ;;  %2514 = vmatmul.mubr.msk.bf16.vlgmr.msra.gmra.mxu0 %vm472_vm0, %v516_v40 }
 0x17c   : > { %2494 = vmatpush3.bf16.msra.mxu1 %v2714_v39  ;;  %2501 = vmatprep.mubr.msk.bf16.mxu1 %vm2959_vm1, %v2958_v16 }
 0x17d   : > { %2495 = vmatprep.subr.bf16.mxu1 %v2958_v16  ;;  %2531 = vmatprep.mubr.msk.bf16.mxu0 %vm2959_vm1, %v2958_v16 }
 0x180   : > { %2496 = vmatpush3.bf16.msra.mxu1 %v2715_v41 }
 0x181   : > { %2497 = vmatprep.subr.bf16.mxu1 %v2958_v16 }
 0x184   : > { %2498 = vmatpush3.bf16.msra.mxu1 %v2716_v42 }
 0x185   : > { %2499 = vmatprep.subr.bf16.mxu1 %v2958_v16 }
 0x188   : > { %2500 = vmatpush3.bf16.msra.mxu1 %v2717_v43 }
 0x189   : > { %2517 = vmatprep.subr.bf16.mxu1 %v2958_v16 }
 0x18b   : > { %2502 = vmatmul.mubr.msk.bf16.vlgmr.msra.gmra.mxu1 %vm472_vm0, %v516_v40 }
 0x18c   : > { %2519 = vmatprep.mubr.msk.bf16.mxu1 %vm2959_vm1, %v2958_v16 }
 0x23b   : > { %v586_v44 = vpop.f32.mrf.mxu1  ;;  %v732_v45 = vpop.f32.mrf.mxu0 }
 0x23c   : > { %v739_v50 = vmul.f32 0.35355338, %v586_v44 }
 0x23d   : > { %v2491_v46 = vpop.f32.mrf.mxu1  ;;  %v2515_v47 = vpop.f32.mrf.mxu0 }
 0x23f   : > { %v589_v48 = vpop.f32.mrf.mxu1  ;;  %v735_v49 = vpop.f32.mrf.mxu0 }
 0x240   : > { %v740_v51 = vmul.f32 0.35355338, %v589_v48  ;;  %v3221_v61 = vpack.c.bf16 %v735_v49, %v732_v45 }
 0x241   : > { %v2492_v52 = vpop.f32.mrf.mxu1  ;;  %v2516_v53 = vpop.f32.mrf.mxu0 }
 0x242   : > { %v741_v54 = vpack.c.bf16 %v740_v51, %v739_v50 }
 0x244   : > { %865 = vrot.lane.b32.xlu1 %v741_v54, %s2960_s27 }
 0x24b   : > { %v659_v55 = vpop.f32.mrf.mxu1 }
 0x24d   : > { %v2503_v56 = vpop.f32.mrf.mxu1 }
 0x24f   : > { %v662_v57 = vpop.f32.mrf.mxu1 }
 0x250   : > { %v742_v58 = vpack.c.bf16 %v662_v57, %v659_v55 }
 0x251   : > { %v2504_v59 = vpop.f32.mrf.mxu1 }
 0x252   : > { %990 = vrot.lane.b32.xlu1 %v742_v58, %s2961_s14  ;;  %868 = vrot.lane.b32.xlu0 %v742_v58, %s2960_s27  ;;  %v753_v60 = vsel %vm748_vm2, %v742_v58, 0 }
 0x253   : > { %2518 = vmatpush3.bf16.xpose.msra.mxu1 %v753_v60 }
 0x254   : > { %2523 = vmatprep.subr.bf16.mxu1 %v2958_v16 }
 0x256   : > { %988 = vrot.lane.b32.xlu1 %v741_v54, %s2961_s14  ;;  %1111 = vrot.lane.b32.xlu0 %v742_v58, %s2962_s17 }
 0x25a   : > { %1109 = vrot.lane.b32.xlu1 %v741_v54, %s2962_s17  ;;  %1232 = vrot.lane.b32.xlu0 %v742_v58, %s2963_s20 }
 0x25b   : > { %2520 = vmatmul.mubr.msk.bf16.vlgmr.msra.gmra.mxu1 %vm748_vm2, %v741_v54 }
 0x25c   : > { %2524 = vmatpush3.bf16.msra.mxu1 %v3221_v61  ;;  %2525 = vmatprep.mubr.msk.bf16.mxu1 %vm2959_vm1, %v2958_v16 }
 0x25d   : > { %2535 = vmatprep.subr.bf16.mxu1 %v2958_v16 }
 0x25e   : > { %1230 = vrot.lane.b32.xlu1 %v741_v54, %s2963_s20  ;;  %1353 = vrot.lane.b32.xlu0 %v742_v58, %s2964_s24 }
 0x262   : > { %1351 = vrot.lane.b32.xlu1 %v741_v54, %s2964_s24  ;;  %1474 = vrot.lane.b32.xlu0 %v742_v58, %s2965_s30 }
 0x266   : > { %1472 = vrot.lane.b32.xlu1 %v741_v54, %s2965_s30  ;;  %1595 = vrot.lane.b32.xlu0 %v742_v58, %s2966_s21 }
 0x26a   : > { %1593 = vrot.lane.b32.xlu1 %v741_v54, %s2966_s21  ;;  %937 = vrot.lane.b32.xlu0 %v3221_v61, %s2960_s27  ;;  %s2971_s27 = smov 32  }
 0x26e   : > { %1058 = vrot.lane.b32.xlu1 %v3221_v61, %s2961_s14  ;;  %s2972_s14 = smov 40  }
 0x2b6   : > { %v866_v0 = vpop.permute.xlu1 %865 }
 0x2c4   : > { %v869_v62 = vpop.permute.xlu0 %868  ;;  %v991_v1 = vpop.permute.xlu1 %990 }
 0x2c5   : > { %v874_v63 = vsel %vm748_vm2, %v869_v62, 0  ;;  %v996_v2 = vsel %vm748_vm2, %v991_v1, 0 }
 0x2c6   : > { %2530 = vmatpush3.bf16.xpose.msra.mxu0 %v874_v63 }
 0x2c7   : > { %2541 = vmatprep.subr.bf16.mxu0 %v2958_v16 }
 0x2c8   : > { %v1112_v3 = vpop.permute.xlu0 %1111  ;;  %v989_v4 = vpop.permute.xlu1 %988 }
 0x2c9   : > { %v1117_v5 = vsel %vm748_vm2, %v1112_v3, 0 }
 0x2cc   : > { %v1233_v6 = vpop.permute.xlu0 %1232  ;;  %v1110_v7 = vpop.permute.xlu1 %1109 }
 0x2cd   : > { %2532 = vmatmul.mubr.msk.bf16.vlgmr.msra.gmra.mxu0 %vm748_vm2, %v866_v0  ;;  %v1238_v8 = vsel %vm748_vm2, %v1233_v6, 0 }
 0x2ce   : > { %2542 = vmatpush3.bf16.xpose.msra.mxu0 %v996_v2  ;;  %2543 = vmatprep.mubr.msk.bf16.mxu0 %vm2959_vm1, %v2958_v16 }
 0x2cf   : > { %2553 = vmatprep.subr.bf16.mxu0 %v2958_v16 }
 0x2d0   : > { %v1354_v9 = vpop.permute.xlu0 %1353  ;;  %v1231_v10 = vpop.permute.xlu1 %1230 }
 0x2d1   : > { %v1359_v11 = vsel %vm748_vm2, %v1354_v9, 0 }
 0x2d4   : > { %v1475_v12 = vpop.permute.xlu0 %1474  ;;  %v1352_v13 = vpop.permute.xlu1 %1351 }
 0x2d5   : > { %2544 = vmatmul.mubr.msk.bf16.vlgmr.msra.gmra.mxu0 %vm748_vm2, %v989_v4  ;;  %v1480_v14 = vsel %vm748_vm2, %v1475_v12, 0 }
 0x2d6   : > { %2554 = vmatpush3.bf16.xpose.msra.mxu0 %v1117_v5  ;;  %2555 = vmatprep.mubr.msk.bf16.mxu0 %vm2959_vm1, %v2958_v16 }
 0x2d7   : > { %2565 = vmatprep.subr.bf16.mxu0 %v2958_v16 }
 0x2d8   : > { %v1596_v15 = vpop.permute.xlu0 %1595  ;;  %v1473_v17 = vpop.permute.xlu1 %1472 }
 0x2d9   : > { %v1601_v18 = vsel %vm748_vm2, %v1596_v15, 0 }
 0x2dc   : > { %v1594_v19 = vpop.permute.xlu1 %1593  ;;  %v938_v55 = vpop.permute.xlu0 %937 }
 0x2dd   : > { %2556 = vmatmul.mubr.msk.bf16.vlgmr.msra.gmra.mxu0 %vm748_vm2, %v1110_v7 }
 0x2de   : > { %2566 = vmatpush3.bf16.xpose.msra.mxu0 %v1238_v8  ;;  %2567 = vmatprep.mubr.msk.bf16.mxu0 %vm2959_vm1, %v2958_v16 }
 0x2df   : > { %2577 = vmatprep.subr.bf16.mxu0 %v2958_v16 }
 0x2e0   : > { %v3315_v60 = vpop.permute.xlu1 %1058 }
 0x2e5   : > { %2568 = vmatmul.mubr.msk.bf16.vlgmr.msra.gmra.mxu0 %vm748_vm2, %v1231_v10 }
 0x2e6   : > { %2578 = vmatpush3.bf16.xpose.msra.mxu0 %v1359_v11  ;;  %2579 = vmatprep.mubr.msk.bf16.mxu0 %vm2959_vm1, %v2958_v16 }
 0x2e7   : > { %2589 = vmatprep.subr.bf16.mxu0 %v2958_v16 }
 0x2ed   : > { %2580 = vmatmul.mubr.msk.bf16.vlgmr.msra.gmra.mxu0 %vm748_vm2, %v1352_v13 }
 0x2ee   : > { %2590 = vmatpush3.bf16.xpose.msra.mxu0 %v1480_v14  ;;  %2591 = vmatprep.mubr.msk.bf16.mxu0 %vm2959_vm1, %v2958_v16 }
 0x2ef   : > { %2601 = vmatprep.subr.bf16.mxu0 %v2958_v16 }
 0x2f5   : > { %2592 = vmatmul.mubr.msk.bf16.vlgmr.msra.gmra.mxu0 %vm748_vm2, %v1473_v17 }
 0x2f6   : > { %2602 = vmatpush3.bf16.xpose.msra.mxu0 %v1601_v18  ;;  %2603 = vmatprep.mubr.msk.bf16.mxu0 %vm2959_vm1, %v2958_v16 }
 0x2f7   : > { %2613 = vmatprep.subr.bf16.mxu0 %v2958_v16 }
 0x2fd   : > { %2604 = vmatmul.mubr.msk.bf16.vlgmr.msra.gmra.mxu0 %vm748_vm2, %v1594_v19 }
 0x2fe   : > { %2621 = vmatprep.mubr.msk.bf16.mxu0 %vm2959_vm1, %v2958_v16 }
 0x31b   : > { %v789_v24 = vpop.f32.mrf.mxu1 }
 0x31c   : > { %v790_v25 = vadd.f32 %v789_v24, %v3276_v23 }
 0x31d   : > { %v2521_v26 = vpop.f32.mrf.mxu1 }
 0x31e   : > { %v797_v27 = vsel %vm796_vm4, %v790_v25, -inf }
 0x31f   : > { %798 = vmax.xlane.f32.xlu0 %v797_v27  ;;  %v792_v28 = vpop.f32.mrf.mxu1 }
 0x320   : > { %v793_v29 = vadd.f32 %v792_v28, %v3276_v23 }
 0x321   : > { %v2522_v30 = vpop.f32.mrf.mxu1 }
 0x322   : > { %v800_v31 = vsel %vm796_vm4, %v793_v29, -inf }
 0x323   : > { %801 = vmax.xlane.f32.xlu1 %v800_v31 }
 0x38d   : > { %v910_v32 = vpop.f32.mrf.mxu0 }
 0x38e   : > { %v3283_v33 = vadd.f32 %v910_v32, %v3276_v23 }
 0x38f   : > { %v2533_v34 = vpop.f32.mrf.mxu0 }
 0x390   : > { %v917_v35 = vsel %vm796_vm4, %v3283_v33, -inf }
 0x391   : > { %v913_v36 = vpop.f32.mrf.mxu0  ;;  %918 = vmax.xlane.f32.xlu0 %v917_v35 }
 0x392   : > { %v3288_v37 = vadd.f32 %v913_v36, %v3276_v23 }
 0x393   : > { %v2534_v38 = vpop.f32.mrf.mxu0 }
 0x394   : > { %v920_v39 = vsel %vm796_vm4, %v3288_v37, -inf }
 0x395   : > { %v1032_v40 = vpop.f32.mrf.mxu0  ;;  %921 = vmax.xlane.f32.xlu0 %v920_v39 }
 0x396   : > { %v3293_v41 = vadd.f32 %v1032_v40, %v3276_v23 }
 0x397   : > { %v2545_v42 = vpop.f32.mrf.mxu0 }
 0x398   : > { %v1039_v43 = vsel %vm796_vm4, %v3293_v41, -inf }
 0x399   : > { %v1035_v44 = vpop.f32.mrf.mxu0  ;;  %1040 = vmax.xlane.f32.xlu0 %v1039_v43 }
 0x39a   : > { %v3298_v45 = vadd.f32 %v1035_v44, %v3276_v23 }
 0x39b   : > { %v2546_v46 = vpop.f32.mrf.mxu0 }
 0x39c   : > { %v1042_v47 = vsel %vm796_vm4, %v3298_v45, -inf }
 0x39d   : > { %v1153_v48 = vpop.f32.mrf.mxu0  ;;  %1043 = vmax.xlane.f32.xlu1 %v1042_v47 }
 0x39e   : > { %v3303_v49 = vadd.f32 %v1153_v48, %v3276_v23 }
 0x39f   : > { %v2557_v50 = vpop.f32.mrf.mxu0 }
 0x3a0   : > { %v1160_v51 = vsel %vm796_vm4, %v3303_v49, -inf }
 0x3a1   : > { %v1156_v52 = vpop.f32.mrf.mxu0  ;;  %1161 = vmax.xlane.f32.xlu0 %v1160_v51 }
 0x3a2   : > { %v3308_v53 = vadd.f32 %v1156_v52, %v3276_v23 }
 0x3a3   : > { %v2558_v54 = vpop.f32.mrf.mxu0 }
 0x3a4   : > { %v1163_v56 = vsel %vm796_vm4, %v3308_v53, -inf }
 0x3a5   : > { %v1274_v57 = vpop.f32.mrf.mxu0  ;;  %1164 = vmax.xlane.f32.xlu1 %v1163_v56 }
 0x3a6   : > { %v3313_v58 = vadd.f32 %v1274_v57, %v3276_v23 }
 0x3a7   : > { %v2569_v59 = vpop.f32.mrf.mxu0 }
 0x3a8   : > { %v799_v62 = vpop.xlane.xlu0 %798  ;;  %v1281_v63 = vsel %vm796_vm4, %v3313_v58, -inf }
 0x3a9   : > { %v803_v0 = vsub.f32 %v790_v25, %v799_v62  ;;  %v1277_v1 = vpop.f32.mrf.mxu0  ;;  %1282 = vmax.xlane.f32.xlu0 %v1281_v63 }
 0x3aa   : > { %v3320_v2 = vadd.f32 %v1277_v1, %v3276_v23 }
 0x3ab   : > { %v2570_v3 = vpop.f32.mrf.mxu0  ;;  %v805_v4 = vmul.f32 1.442695, %v803_v0 }
 0x3ac   : > { %v802_v5 = vpop.xlane.xlu1 %801  ;;  %v1284_v6 = vsel %vm796_vm4, %v3320_v2, -inf }
 0x3ad   : > { %v804_v7 = vsub.f32 %v793_v29, %v802_v5  ;;  %v1395_v8 = vpop.f32.mrf.mxu0  ;;  %1285 = vmax.xlane.f32.xlu1 %v1284_v6  ;;  %2754 = vpow2.f32 %v805_v4 }
 0x3ae   : > { %v3325_v9 = vadd.f32 %v1395_v8, %v3276_v23 }
 0x3af   : > { %v807_v10 = vmul.f32 1.442695, %v804_v7  ;;  %v2581_v11 = vpop.f32.mrf.mxu0 }
 0x3b0   : > { %v1402_v12 = vsel %vm796_vm4, %v3325_v9, -inf }
 0x3b1   : > { %2756 = vpow2.f32 %v807_v10  ;;  %v1398_v13 = vpop.f32.mrf.mxu0  ;;  %1403 = vmax.xlane.f32.xlu1 %v1402_v12 }
 0x3b2   : > { %v3330_v14 = vadd.f32 %v1398_v13, %v3276_v23 }
 0x3b3   : > { %v2582_v15 = vpop.f32.mrf.mxu0 }
 0x3b4   : > { %v1405_v17 = vsel %vm796_vm4, %v3330_v14, -inf }
 0x3b5   : > { %v1516_v18 = vpop.f32.mrf.mxu0  ;;  %1406 = vmax.xlane.f32.xlu1 %v1405_v17 }
 0x3b6   : > { %v3364_v39 = vadd.f32 %v1516_v18, %v3276_v23 }
 0x3b7   : > { %v2593_v19 = vpop.f32.mrf.mxu0 }
 0x3b8   : > { %v1523_v40 = vsel %vm796_vm4, %v3364_v39, -inf }
 0x3b9   : > { %v1519_v21 = vpop.f32.mrf.mxu0 }
 0x3ba   : > { %v3335_v22 = vadd.f32 %v1519_v21, %v3276_v23  ;;  %v3339_v26 = vpop.eup %2754 }
 0x3bb   : > { %v2594_v24 = vpop.f32.mrf.mxu0 }
 0x3bc   : > { %v1526_v25 = vsel %vm796_vm4, %v3335_v22, -inf }
 0x3bd   : > { %v1637_v27 = vpop.f32.mrf.mxu0  ;;  %1527 = vmax.xlane.f32.xlu1 %v1526_v25 }
 0x3be   : > { %v3341_v28 = vpop.eup %2756  ;;  %v3344_v29 = vadd.f32 %v1637_v27, %v3276_v23 }
 0x3bf   : > { %v2605_v30 = vpop.f32.mrf.mxu0  ;;  %1179 = vrot.lane.b32.xlu0 %v3221_v61, %s2962_s17  ;;  %v815_v31 = vpack.c.bf16 %v3341_v28, %v3339_v26  ;;  %s2973_s17 = smov 48  }
 0x3c0   : > { %v1644_v32 = vsel %vm796_vm4, %v3344_v29, -inf }
 0x3c1   : > { %2526 = vmatmul.mubr.msk.bf16.vlgmr.msra.gmra.mxu1 %vm796_vm4, %v815_v31  ;;  %v1640_v34 = vpop.f32.mrf.mxu0  ;;  %1645 = vmax.xlane.f32.xlu1 %v1644_v32 }
 0x3c2   : > { %2536 = vmatpush3.bf16.msra.mxu1 %v938_v55  ;;  %v3354_v35 = vadd.f32 %v1640_v34, %v3276_v23  ;;  %2537 = vmatprep.mubr.msk.bf16.mxu1 %vm2959_vm1, %v2958_v16 }
 0x3c3   : > { %v2606_v36 = vpop.f32.mrf.mxu0  ;;  %2547 = vmatprep.subr.bf16.mxu1 %v2958_v16 }
 0x3c4   : > { %v1647_v38 = vsel %vm796_vm4, %v3354_v35, -inf }
 0x3c5   : > { %1648 = vmax.xlane.f32.xlu1 %v1647_v38 }
 0x3d6   : > { %1300 = vrot.lane.b32.xlu1 %v3221_v61, %s2963_s20  ;;  %s2974_s20 = smov 56  }
 0x3de   : > { %1524 = vmax.xlane.f32.xlu0 %v1523_v40 }
 0x3f4   : > { %1421 = vrot.lane.b32.xlu0 %v3221_v61, %s2964_s24 }
 0x3f8   : > { %1542 = vrot.lane.b32.xlu0 %v3221_v61, %s2965_s30 }
 0x3fc   : > { %1663 = vrot.lane.b32.xlu0 %v3221_v61, %s2966_s21 }
 0x41a   : > { %v919_v42 = vpop.xlane.xlu0 %918 }
 0x41b   : > { %v923_v43 = vsub.f32 %v3283_v33, %v919_v42 }
 0x41d   : > { %v925_v44 = vmul.f32 1.442695, %v923_v43 }
 0x41e   : > { %v922_v46 = vpop.xlane.xlu0 %921 }
 0x41f   : > { %2758 = vpow2.f32 %v925_v44  ;;  %v924_v23 = vsub.f32 %v3288_v37, %v922_v46 }
 0x421   : > { %v927_v47 = vmul.f32 1.442695, %v924_v23 }
 0x422   : > { %v1041_v48 = vpop.xlane.xlu0 %1040 }
 0x423   : > { %2760 = vpow2.f32 %v927_v47  ;;  %v1045_v50 = vsub.f32 %v3293_v41, %v1041_v48 }
 0x425   : > { %v1047_v51 = vmul.f32 1.442695, %v1045_v50 }
 0x426   : > { %v1044_v52 = vpop.xlane.xlu1 %1043 }
 0x427   : > { %2762 = vpow2.f32 %v1047_v51  ;;  %v1046_v54 = vsub.f32 %v3298_v45, %v1044_v52  ;;  %v812_v52 = vsel %vm796_vm4, %v3341_v28, 0.0 }
 0x429   : > { %v1049_v55 = vmul.f32 1.442695, %v1046_v54 }
 0x42a   : > { %v1162_v61 = vpop.xlane.xlu0 %1161 }
 0x42b   : > { %2764 = vpow2.f32 %v1049_v55  ;;  %v1166_v33 = vsub.f32 %v3303_v49, %v1162_v61 }
 0x42c   : > { %v2759_v56 = vpop.eup %2758 }
 0x42d   : > { %v1168_v57 = vmul.f32 1.442695, %v1166_v33  ;;  %v929_v59 = vsel %vm796_vm4, %v2759_v56, 0.0 }
 0x42e   : > { %930 = vadd.xlane.f32.xlu1 %v929_v59  ;;  %v1165_v37 = vpop.xlane.xlu1 %1164 }
 0x42f   : > { %2766 = vpow2.f32 %v1168_v57  ;;  %v1167_v62 = vsub.f32 %v3308_v53, %v1165_v37 }
 0x430   : > { %v2761_v41 = vpop.eup %2760 }
 0x431   : > { %v1170_v63 = vmul.f32 1.442695, %v1167_v62  ;;  %v932_v0 = vsel %vm796_vm4, %v2761_v41, 0.0  ;;  %v935_v1 = vpack.c.bf16 %v2761_v41, %v2759_v56 }
 0x432   : > { %933 = vadd.xlane.f32.xlu0 %v932_v0  ;;  %v1283_v45 = vpop.xlane.xlu0 %1282 }
 0x433   : > { %2768 = vpow2.f32 %v1170_v63  ;;  %v1287_v3 = vsub.f32 %v3313_v58, %v1283_v45  ;;  %2538 = vmatmul.mubr.msk.bf16.vlgmr.msra.gmra.mxu1 %vm796_vm4, %v935_v1  ;;  %v809_v1 = vsel %vm796_vm4, %v3339_v26, 0.0 }
 0x434   : > { %v2763_v49 = vpop.eup %2762  ;;  %2548 = vmatpush3.bf16.msra.mxu1 %v3315_v60  ;;  %2549 = vmatprep.mubr.msk.bf16.mxu1 %vm2959_vm1, %v2958_v16 }
 0x435   : > { %v1289_v4 = vmul.f32 1.442695, %v1287_v3  ;;  %v1051_v53 = vsel %vm796_vm4, %v2763_v49, 0.0  ;;  %2559 = vmatprep.subr.bf16.mxu1 %v2958_v16 }
 0x436   : > { %1052 = vadd.xlane.f32.xlu0 %v1051_v53  ;;  %v1286_v5 = vpop.xlane.xlu1 %1285  ;;  %v1180_v11 = vpop.permute.xlu0 %1179 }
 0x437   : > { %2770 = vpow2.f32 %v1289_v4  ;;  %v1288_v6 = vsub.f32 %v3320_v2, %v1286_v5 }
 0x438   : > { %v2765_v7 = vpop.eup %2764 }
 0x439   : > { %v1291_v58 = vmul.f32 1.442695, %v1288_v6  ;;  %v1054_v8 = vsel %vm796_vm4, %v2765_v7, 0.0  ;;  %v1057_v10 = vpack.c.bf16 %v2765_v7, %v2763_v49 }
 0x43a   : > { %1055 = vadd.xlane.f32.xlu0 %v1054_v8  ;;  %v1404_v60 = vpop.xlane.xlu1 %1403 }
 0x43b   : > { %2772 = vpow2.f32 %v1291_v58  ;;  %v1408_v12 = vsub.f32 %v3325_v9, %v1404_v60  ;;  %2550 = vmatmul.mubr.msk.bf16.vlgmr.msra.gmra.mxu1 %vm796_vm4, %v1057_v10 }
 0x43c   : > { %v2767_v13 = vpop.eup %2766  ;;  %2560 = vmatpush3.bf16.msra.mxu1 %v1180_v11  ;;  %2561 = vmatprep.mubr.msk.bf16.mxu1 %vm2959_vm1, %v2958_v16 }
 0x43d   : > { %v1410_v15 = vmul.f32 1.442695, %v1408_v12  ;;  %v1172_v2 = vsel %vm796_vm4, %v2767_v13, 0.0  ;;  %2571 = vmatprep.subr.bf16.mxu1 %v2958_v16 }
 0x43e   : > { %1173 = vadd.xlane.f32.xlu1 %v1172_v2  ;;  %v1407_v17 = vpop.xlane.xlu1 %1406 }
 0x43f   : > { %2774 = vpow2.f32 %v1410_v15  ;;  %v1409_v18 = vsub.f32 %v3330_v14, %v1407_v17 }
 0x440   : > { %v2769_v19 = vpop.eup %2768 }
 0x441   : > { %v1412_v21 = vmul.f32 1.442695, %v1409_v18  ;;  %v1175_v9 = vsel %vm796_vm4, %v2769_v19, 0.0  ;;  %v1178_v24 = vpack.c.bf16 %v2769_v19, %v2767_v13 }
 0x442   : > { %1176 = vadd.xlane.f32.xlu0 %v1175_v9 }
 0x443   : > { %2776 = vpow2.f32 %v1412_v21  ;;  %2562 = vmatmul.mubr.msk.bf16.vlgmr.msra.gmra.mxu1 %vm796_vm4, %v1178_v24 }
 0x444   : > { %v2771_v25 = vpop.eup %2770  ;;  %2573 = vmatprep.mubr.msk.bf16.mxu1 %vm2959_vm1, %v2958_v16 }
 0x445   : > { %v1293_v27 = vsel %vm796_vm4, %v2771_v25, 0.0 }
 0x446   : > { %1294 = vadd.xlane.f32.xlu1 %v1293_v27  ;;  %v1528_v30 = vpop.xlane.xlu1 %1527 }
 0x447   : > { %v1530_v31 = vsub.f32 %v3335_v22, %v1528_v30 }
 0x448   : > { %v2773_v14 = vpop.eup %2772 }
 0x449   : > { %v1533_v32 = vmul.f32 1.442695, %v1530_v31  ;;  %v1296_v34 = vsel %vm796_vm4, %v2773_v14, 0.0  ;;  %v1299_v47 = vpack.c.bf16 %v2773_v14, %v2771_v25 }
 0x44a   : > { %1297 = vadd.xlane.f32.xlu0 %v1296_v34  ;;  %v1646_v36 = vpop.xlane.xlu1 %1645 }
 0x44b   : > { %2778 = vpow2.f32 %v1533_v32  ;;  %v1650_v54 = vsub.f32 %v3344_v29, %v1646_v36 }
 0x44c   : > { %v2775_v38 = vpop.eup %2774 }
 0x44d   : > { %v1414_v40 = vsel %vm796_vm4, %v2775_v38, 0.0  ;;  %v1652_v33 = vmul.f32 1.442695, %v1650_v54 }
 0x44e   : > { %1415 = vadd.xlane.f32.xlu1 %v1414_v40  ;;  %v1649_v42 = vpop.xlane.xlu1 %1648 }
 0x44f   : > { %v1651_v43 = vsub.f32 %v3354_v35, %v1649_v42 }
 0x450   : > { %v2777_v44 = vpop.eup %2776 }
 0x451   : > { %v1654_v46 = vmul.f32 1.442695, %v1651_v43  ;;  %v1417_v23 = vsel %vm796_vm4, %v2777_v44, 0.0  ;;  %v1420_v59 = vpack.c.bf16 %v2777_v44, %v2775_v38 }
 0x452   : > { %1418 = vadd.xlane.f32.xlu0 %v1417_v23  ;;  %v1301_v22 = vpop.permute.xlu1 %1300 }
 0x453   : > { %2780 = vpow2.f32 %v1654_v46  ;;  %2572 = vmatpush3.bf16.msra.mxu1 %v1301_v22 }
 0x454   : > { %2583 = vmatprep.subr.bf16.mxu1 %v2958_v16 }
 0x456   : > { %2574 = vmatmul.mubr.msk.bf16.vlgmr.msra.gmra.mxu1 %vm796_vm4, %v1299_v47 }
 0x457   : > { %2585 = vmatprep.mubr.msk.bf16.mxu1 %vm2959_vm1, %v2958_v16 }
 0x458   : > { %v2779_v48 = vpop.eup %2778 }
 0x459   : > { %v1538_v50 = vsel %vm796_vm4, %v2779_v48, 0.0 }
 0x45a   : > { %1539 = vadd.xlane.f32.xlu0 %v1538_v50 }
 0x460   : > { %v2781_v35 = vpop.eup %2780 }
 0x461   : > { %v1659_v51 = vsel %vm796_vm4, %v2781_v35, 0.0 }
 0x462   : > { %1660 = vadd.xlane.f32.xlu0 %v1659_v51 }
 0x466   : > { %813 = vadd.xlane.f32.xlu0 %v812_v52 }
 0x467   : > { %v1525_v55 = vpop.xlane.xlu0 %1524 }
 0x468   : > { %v1529_v61 = vsub.f32 %v3364_v39, %v1525_v55 }
 0x46a   : > { %v1531_v56 = vmul.f32 1.442695, %v1529_v61 }
 0x46b   : > { %v1422_v57 = vpop.permute.xlu0 %1421 }
 0x46c   : > { %2782 = vpow2.f32 %v1531_v56  ;;  %2584 = vmatpush3.bf16.msra.mxu1 %v1422_v57 }
 0x46d   : > { %2595 = vmatprep.subr.bf16.mxu1 %v2958_v16  ;;  %2784 = vpow2.f32 %v1652_v33 }
 0x46f   : > { %v1543_v37 = vpop.permute.xlu0 %1542  ;;  %2586 = vmatmul.mubr.msk.bf16.vlgmr.msra.gmra.mxu1 %vm796_vm4, %v1420_v59 }
 0x470   : > { %2596 = vmatpush3.bf16.msra.mxu1 %v1543_v37  ;;  %2597 = vmatprep.mubr.msk.bf16.mxu1 %vm2959_vm1, %v2958_v16 }
 0x471   : > { %2607 = vmatprep.subr.bf16.mxu1 %v2958_v16 }
 0x473   : > { %v1664_v41 = vpop.permute.xlu0 %1663 }
 0x479   : > { %v2783_v28 = vpop.eup %2782 }
 0x47a   : > { %v1535_v29 = vsel %vm796_vm4, %v2783_v28, 0.0  ;;  %v1541_v39 = vpack.c.bf16 %v2779_v48, %v2783_v28  ;;  %v2785_v62 = vpop.eup %2784 }
 0x47b   : > { %1536 = vadd.xlane.f32.xlu1 %v1535_v29  ;;  %v1656_v63 = vsel %vm796_vm4, %v2785_v62, 0.0  ;;  %v1662_v45 = vpack.c.bf16 %v2781_v35, %v2785_v62 }
 0x47c   : > { %2598 = vmatmul.mubr.msk.bf16.vlgmr.msra.gmra.mxu1 %vm796_vm4, %v1541_v39 }
 0x47d   : > { %2608 = vmatpush3.bf16.msra.mxu1 %v1664_v41  ;;  %2609 = vmatprep.mubr.msk.bf16.mxu1 %vm2959_vm1, %v2958_v16  ;;  %v2718_v41 = vld [vmem:[#allocation6 + $0x18] sm:$0xff]  }
 0x47e   : > { %2614 = vmatpush3.bf16.msra.mxu0 %v2718_v41  ;;  %v2831_v41 = vld [vmem:[%s3142_s22 + $0x8] sm:$0xff] }
 0x47f   : > { %1657 = vadd.xlane.f32.xlu1 %v1656_v63  ;;  %2615 = vmatprep.subr.bf16.mxu0 %v2958_v16 }
 0x481   : > { %v3428_v0 = vpop.f32.mrf.mxu1 }
 0x483   : > { %v2527_v3 = vpop.f32.mrf.mxu1  ;;  %810 = vadd.xlane.f32.xlu1 %v809_v1 }
 0x484   : > { %2610 = vmatmul.mubr.msk.bf16.vlgmr.msra.gmra.mxu1 %vm796_vm4, %v1662_v45 }
 0x485   : > { %v3433_v49 = vpop.f32.mrf.mxu1 }
 0x487   : > { %v2528_v4 = vpop.f32.mrf.mxu1 }
 0x488   : > { %v2719_v4 = vld [vmem:[#allocation6 + $0x10] sm:$0xff]  }
 0x489   : > { %2616 = vmatpush3.bf16.msra.mxu0 %v2719_v4 }
 0x48a   : > { %2617 = vmatprep.subr.bf16.mxu0 %v2958_v16 }
 0x4b7   : > { %v931_v53 = vpop.xlane.xlu1 %930 }
 0x4b8   : > { %2786 = vrcp.f32 %v931_v53 }
 0x4bb   : > { %v934_v5 = vpop.xlane.xlu0 %933 }
 0x4bc   : > { %2788 = vrcp.f32 %v934_v5 }
 0x4bf   : > { %v1053_v6 = vpop.xlane.xlu0 %1052 }
 0x4c0   : > { %2790 = vrcp.f32 %v1053_v6  ;;  %v2720_v6 = vld [vmem:[#allocation6 + $0x8] sm:$0xff]  }
 0x4c1   : > { %2618 = vmatpush3.bf16.msra.mxu0 %v2720_v6 }
 0x4c2   : > { %2619 = vmatprep.subr.bf16.mxu0 %v2958_v16 }
 0x4c3   : > { %v1056_v7 = vpop.xlane.xlu0 %1055 }
 0x4c4   : > { %2792 = vrcp.f32 %v1056_v7 }
 0x4c5   : > { %v2787_v58 = vpop.eup %2786 }
 0x4c7   : > { %v1174_v8 = vpop.xlane.xlu1 %1173 }
 0x4c8   : > { %2794 = vrcp.f32 %v1174_v8 }
 0x4c9   : > { %v2789_v11 = vpop.eup %2788 }
 0x4cb   : > { %v1177_v12 = vpop.xlane.xlu0 %1176 }
 0x4cc   : > { %2796 = vrcp.f32 %v1177_v12 }
 0x4cd   : > { %v2791_v17 = vpop.eup %2790 }
 0x4cf   : > { %v1295_v34 = vpop.xlane.xlu1 %1294 }
 0x4d0   : > { %2798 = vrcp.f32 %v1295_v34 }
 0x4d1   : > { %v2793_v9 = vpop.eup %2792 }
 0x4d3   : > { %v1298_v43 = vpop.xlane.xlu0 %1297 }
 0x4d4   : > { %2800 = vrcp.f32 %v1298_v43 }
 0x4d5   : > { %v2795_v30 = vpop.eup %2794 }
 0x4d7   : > { %v1416_v51 = vpop.xlane.xlu1 %1415 }
 0x4d8   : > { %2802 = vrcp.f32 %v1416_v51 }
 0x4d9   : > { %v2797_v36 = vpop.eup %2796 }
 0x4db   : > { %v1419_v52 = vpop.xlane.xlu0 %1418 }
 0x4dc   : > { %2804 = vrcp.f32 %v1419_v52 }
 0x4dd   : > { %v2799_v44 = vpop.eup %2798 }
 0x4e1   : > { %v2801_v47 = vpop.eup %2800 }
 0x4e3   : > { %v1540_v33 = vpop.xlane.xlu0 %1539 }
 0x4e5   : > { %v2803_v55 = vpop.eup %2802 }
 0x4e9   : > { %v2805_v59 = vpop.eup %2804 }
 0x4eb   : > { %v1661_v62 = vpop.xlane.xlu0 %1660 }
 0x4f3   : > { %v977_v10 = vpop.f32.mrf.mxu1 }
 0x4f4   : > { %v986_v26 = vmul.f32 %v2787_v58, %v977_v10 }
 0x4f5   : > { %v2539_v60 = vpop.f32.mrf.mxu1 }
 0x4f6   : > { %1716 = vrot.lane.b32.xlu1 %v986_v26, %s3629_s23  ;;  %v2721_v26 = vld [vmem:[#allocation6] sm:$0xff]  }
 0x4f7   : > { %v980_v13 = vpop.f32.mrf.mxu1  ;;  %2620 = vmatpush3.bf16.msra.mxu0 %v2721_v26 }
 0x4f8   : > { %v987_v15 = vmul.f32 %v2789_v11, %v980_v13 }
 0x4f9   : > { %v2540_v2 = vpop.f32.mrf.mxu1 }
 0x4fa   : > { %1718 = vrot.lane.b32.xlu0 %v987_v15, %s3629_s23 }
 0x4fb   : > { %v1098_v18 = vpop.f32.mrf.mxu1 }
 0x4fc   : > { %v1107_v19 = vmul.f32 %v2791_v17, %v1098_v18 }
 0x4fd   : > { %v2551_v21 = vpop.f32.mrf.mxu1 }
 0x4fe   : > { %1724 = vrot.lane.b32.xlu1 %v1107_v19, %s2969_s15  ;;  %v814_v21 = vpop.xlane.xlu0 %813 }
 0x4ff   : > { %v1101_v24 = vpop.f32.mrf.mxu1 }
 0x500   : > { %v1108_v25 = vmul.f32 %v2793_v9, %v1101_v24 }
 0x501   : > { %v2552_v27 = vpop.f32.mrf.mxu1 }
 0x502   : > { %1726 = vrot.lane.b32.xlu1 %v1108_v25, %s2969_s15  ;;  %s459_s15 = sand.u32 1, %s2944_s26  }
 0x503   : > { %v1219_v31 = vpop.f32.mrf.mxu1 }
 0x504   : > { %v1228_v14 = vmul.f32 %v2795_v30, %v1219_v31  ;;  %v1537_v54 = vpop.xlane.xlu1 %1536 }
 0x505   : > { %v2563_v32 = vpop.f32.mrf.mxu1  ;;  %2806 = vrcp.f32 %v1537_v54 }
 0x506   : > { %1732 = vrot.lane.b32.xlu1 %v1228_v14, %s2970_s16  ;;  %2808 = vrcp.f32 %v1540_v33 }
 0x507   : > { %v1222_v38 = vpop.f32.mrf.mxu1 }
 0x508   : > { %v1229_v40 = vmul.f32 %v2797_v36, %v1222_v38  ;;  %v1658_v28 = vpop.xlane.xlu1 %1657 }
 0x509   : > { %v2564_v42 = vpop.f32.mrf.mxu1  ;;  %2810 = vrcp.f32 %v1658_v28 }
 0x50a   : > { %1734 = vrot.lane.b32.xlu0 %v1229_v40, %s2970_s16  ;;  %2812 = vrcp.f32 %v1661_v62 }
 0x50c   : > { %v811_v17 = vpop.xlane.xlu1 %810 }
 0x50d   : > { %2814 = vrcp.f32 %v811_v17  ;;  %v2733_v17 = vld [vmem:[%s3618_s9 + $0x4] ss:$8 sps:$4 sm:$0xff]  }
 0x50e   : > { %2816 = vrcp.f32 %v814_v21 }
 0x512   : > { %v2807_v63 = vpop.eup %2806 }
 0x513   : > { %v2809_v53 = vpop.eup %2808 }
 0x516   : > { %v1340_v46 = vpop.f32.mrf.mxu1  ;;  %v2811_v8 = vpop.eup %2810 }
 0x517   : > { %v1349_v23 = vmul.f32 %v2799_v44, %v1340_v46  ;;  %v2813_v12 = vpop.eup %2812 }
 0x518   : > { %v2575_v22 = vpop.f32.mrf.mxu1 }
 0x519   : > { %1740 = vrot.lane.b32.xlu1 %v1349_v23, %s2971_s27 }
 0x51a   : > { %v1343_v48 = vpop.f32.mrf.mxu1  ;;  %v2815_v30 = vpop.eup %2814 }
 0x51b   : > { %v1350_v50 = vmul.f32 %v2801_v47, %v1343_v48  ;;  %v862_v32 = vmul.f32 %v2815_v30, %v3428_v0  ;;  %v2817_v34 = vpop.eup %2816 }
 0x51c   : > { %v2576_v35 = vpop.f32.mrf.mxu1  ;;  %v863_v43 = vmul.f32 %v2817_v34, %v3433_v49 }
 0x51d   : > { %1742 = vrot.lane.b32.xlu0 %v1350_v50, %s2971_s27  ;;  %s2976_s27 = smov [#allocation8]  }
 0x52f   : > { %v1461_v61 = vpop.f32.mrf.mxu1 }
 0x530   : > { %v1470_v56 = vmul.f32 %v2803_v55, %v1461_v61 }
 0x531   : > { %v2587_v57 = vpop.f32.mrf.mxu1 }
 0x532   : > { %1748 = vrot.lane.b32.xlu1 %v1470_v56, %s2972_s14 }
 0x533   : > { %v1464_v37 = vpop.f32.mrf.mxu1 }
 0x534   : > { %v1471_v29 = vmul.f32 %v2805_v59, %v1464_v37  ;;  %v2830_v37 = vld [vmem:[%s3142_s22] sm:$0xff] }
 0x535   : > { %v2588_v39 = vpop.f32.mrf.mxu1 }
 0x536   : > { %1750 = vrot.lane.b32.xlu0 %v1471_v29, %s2972_s14  ;;  %s2331_s14 = sshll.u32 %s459_s15, 4 }
 0x53c   : > { %v1582_v1 = vpop.f32.mrf.mxu1 }
 0x53d   : > { %v1591_v45 = vmul.f32 %v2807_v63, %v1582_v1 }
 0x53e   : > { %v2599_v3 = vpop.f32.mrf.mxu1 }
 0x53f   : > { %1756 = vrot.lane.b32.xlu1 %v1591_v45, %s2973_s17 }
 0x540   : > { %v1585_v5 = vpop.f32.mrf.mxu1 }
 0x541   : > { %v1592_v7 = vmul.f32 %v2809_v53, %v1585_v5 }
 0x542   : > { %v2600_v58 = vpop.f32.mrf.mxu1 }
 0x543   : > { %1758 = vrot.lane.b32.xlu0 %v1592_v7, %s2973_s17  ;;  %s2406_s17 = sshll.u32 %s3069_s29, 8  ;;  %s3568_s29 = scalar_lea.sflag [#allocation5], %s459_s15 }
 0x544   : > { %v1703_v10 = vpop.f32.mrf.mxu1  ;;  %s3562_s21 = scalar_lea.hbm %s3622_s13, %s2406_s17 }
 0x545   : > { %v1712_v60 = vmul.f32 %v2811_v8, %v1703_v10 }
 0x546   : > { %v2611_v11 = vpop.f32.mrf.mxu1 }
 0x547   : > { %1764 = vrot.lane.b32.xlu1 %v1712_v60, %s2974_s20  ;;  %v2724_v60 = vld [vmem:[%s3618_s9 + $0x34] ss:$8 sps:$4 sm:$0xff]   ;;  %v2722_v11 = vld [vmem:[%s3618_s9 + $0x30] ss:$8 sps:$4 sm:$0xff]  }
 0x548   : > { %v1706_v13 = vpop.f32.mrf.mxu1  ;;  %1988 = vmatprep.subr.bf16.mxu1 %v2724_v60 }
 0x549   : > { %v1713_v15 = vmul.f32 %v2813_v12, %v1706_v13  ;;  %1989 = vmatpush1.bf16.msra.mxu1 %v2722_v11  ;;  %v2727_v12 = vld [vmem:[%s3618_s9 + $0x24] ss:$8 sps:$4 sm:$0xff]   ;;  %v2725_v13 = vld [vmem:[%s3618_s9 + $0x20] ss:$8 sps:$4 sm:$0xff]  }
 0x54a   : > { %v2612_v2 = vpop.f32.mrf.mxu1  ;;  %1990 = vmatprep.subr.bf16.mxu1 %v2727_v12 }
 0x54b   : > { %1766 = vrot.lane.b32.xlu0 %v1713_v15, %s2974_s20  ;;  %v2728_v15 = vld [vmem:[%s3618_s9 + $0x10] ss:$8 sps:$4 sm:$0xff]   ;;  %v2730_v2 = vld [vmem:[%s3618_s9 + $0x14] ss:$8 sps:$4 sm:$0xff]   ;;  %s461_s20 = scalar_lea.vmem [#allocation8], %s2331_s14  ;;  %s2888_s14 = sshll.u32 %s2976_s27, 4  ;;  %s2889_s14 = int_to_ptr.vmem [resolvable:$false] %s2888_s14 }
 0x54c   : > { %s2239_s22 = sshll.u32 %s461_s20, 4  ;;  %s2890_s17 = scalar_lea.vmem %s2889_s14, 512  ;;  %s3565_s22 = int_to_ptr.vmem [resolvable:$true] %s2239_s22 }
 0x54d   : > { %1991 = vmatpush1.bf16.msra.mxu1 %v2725_v13  ;;  %s2884_s16 = scalar_lea.vmem %s3565_s22, 256  ;;  %p2891_p8 = scmp.lt.s32.totalorder %s3565_s22, %s2889_s14 }
 0x54e   : > { %1992 = vmatprep.subr.bf16.mxu1 %v2730_v2  ;;  %p2885_p12 = scmp.ne.s32.totalorder %s3565_s22, %s2884_s16  ;;  %p2892_p11 = scmp.lt.s32.totalorder %s2890_s17, %s2884_s16 }
 0x550   : > { %p2886_p4 = pnand %p2885_p12, %p3642_p13  ;;  %p2893_p0 = por %p2892_p11, %p2891_p8 }
 0x551   : > { %1993 = vmatpush1.bf16.msra.mxu1 %v2728_v15 }
 0x552   : > { %1994 = vmatprep.subr.bf16.mxu1 %v2733_v17  ;;  %p2887_p7 = pneg %p2886_p4 }
 0x554   : > { %p2894_p1 = pnand %p2893_p0, %p2887_p7 }
 0x568   : > { %v1717_v18 = vpop.permute.xlu1 %1716 }
 0x569   : > { %v1770_v36 = vsel %vm748_vm2, %v862_v32, %v1717_v18  ;;  %v2975_v18 = vmov 0  }
 0x56a   : > { %2012 = vmatprep.mubr.bf16.mxu1 %v2975_v18 }
 0x56c   : > { %v1719_v24 = vpop.permute.xlu0 %1718 }
 0x56d   : > { %v1771_v0 = vsel %vm748_vm2, %v863_v43, %v1719_v24 }
 0x570   : > { %v1725_v19 = vpop.permute.xlu1 %1724 }
 0x571   : > { %v1772_v38 = vsel %vm796_vm4, %v1770_v36, %v1725_v19  ;;  %v2731_v19 = vld [vmem:[%s3618_s9] ss:$8 sps:$4 sm:$0xff]  }
 0x572   : > { %1995 = vmatpush1.bf16.msra.mxu1 %v2731_v19 }
 0x574   : > { %v1727_v9 = vpop.permute.xlu1 %1726 }
 0x575   : > { %v1773_v22 = vsel %vm796_vm4, %v1771_v0, %v1727_v9  ;;  %v2735_v0 = vld [vmem:[%s3620_s11 + $0x38] sm:$0xff]  }
 0x578   : > { %v1733_v25 = vpop.permute.xlu1 %1732 }
 0x579   : > { %v1775_v44 = vsel %vm1774_vm5, %v1772_v38, %v1733_v25  ;;  %v2373_v38 = vld [vmem:[%s3617_s8] ss:$0 sm:$0xff] }
 0x57c   : > { %v1735_v27 = vpop.permute.xlu0 %1734 }
 0x57d   : > { %v1776_v35 = vsel %vm1774_vm5, %v1773_v22, %v1735_v27  ;;  %v2737_v22 = vld [vmem:[%s3620_s11 + $0x30] sm:$0xff]  }
 0x58b   : > { %v1741_v16 = vpop.permute.xlu1 %1740 }
 0x58c   : > { %v1778_v46 = vsel %vm1777_vm6, %v1775_v44, %v1741_v16 }
 0x58f   : > { %v1743_v31 = vpop.permute.xlu0 %1742 }
 0x590   : > { %v1779_v49 = vsel %vm1777_vm6, %v1776_v35, %v1743_v31  ;;  %v2741_v35 = vld [vmem:[%s3620_s11 + $0x20] sm:$0xff]  }
 0x5a4   : > { %v1749_v14 = vpop.permute.xlu1 %1748 }
 0x5a5   : > { %v1781_v23 = vsel %vm1780_vm7, %v1778_v46, %v1749_v14  ;;  %v2372_v14 = vld [vmem:[%s3616_s7] ss:$0 sm:$0xff]  ;;  %v2734_v46 = vld [vmem:[%s3620_s11 + $0x78] sm:$0xff]  }
 0x5a6   : > { %2459 = vmatprep.subr.bf16.mxu0 %v2734_v46 }
 0x5a8   : > { %v1751_v40 = vpop.permute.xlu0 %1750 }
 0x5a9   : > { %v1782_v52 = vsel %vm1780_vm7, %v1779_v49, %v1751_v40  ;;  %v2743_v49 = vld [vmem:[%s3620_s11 + $0x18] sm:$0xff]  }
 0x5b1   : > { %v1757_v42 = vpop.permute.xlu1 %1756 }
 0x5b2   : > { %v1784_v47 = vsel %vm1783_vm8, %v1781_v23, %v1757_v42  ;;  %v2736_v23 = vld [vmem:[%s3620_s11 + $0x70] sm:$0xff]  }
 0x5b5   : > { %v1759_v48 = vpop.permute.xlu0 %1758 }
 0x5b6   : > { %v1785_v54 = vsel %vm1783_vm8, %v1782_v52, %v1759_v48  ;;  %v2739_v48 = vld [vmem:[%s3620_s11 + $0x28] sm:$0xff]   ;;  %v2744_v52 = vld [vmem:[%s3620_s11 + $0x50] sm:$0xff]  }
 0x5b9   : > { %v1765_v50 = vpop.permute.xlu1 %1764 }
 0x5ba   : > { %v1787_v51 = vsel %vm1786_vm9, %v1784_v47, %v1765_v50  ;;  %v2738_v47 = vld [vmem:[%s3620_s11 + $0x68] sm:$0xff]   ;;  %v2740_v50 = vld [vmem:[%s3620_s11 + $0x60] sm:$0xff]  }
 0x5bb   : > { %1789 = vst.msk [vmem:[#allocation2] sm:$0xff] %vm472_vm0, %v1787_v51  ;;  %v2742_v51 = vld [vmem:[%s3620_s11 + $0x58] sm:$0xff]  }
 0x5bd   : > { %v1767_v55 = vpop.permute.xlu0 %1766 }
 0x5be   : > { %v1788_v61 = vsel %vm1786_vm9, %v1785_v54, %v1767_v55  ;;  %v2745_v54 = vld [vmem:[%s3620_s11 + $0x10] sm:$0xff]   ;;  %v2746_v55 = vld [vmem:[%s3620_s11 + $0x48] sm:$0xff]  }
 0x5bf   : > { %1790 = vst.msk [vmem:[#allocation2 + $0x8] sm:$0xff] %vm472_vm0, %v1788_v61  ;;  %v2747_v61 = vld [vmem:[%s3620_s11 + $0x8] sm:$0xff]  }
 0x5c2   : > { %v1791_v33 = vld [vmem:[#allocation2] sm:$0xff] }
 0x5c6   : > { %v1792_v56 = vld [vmem:[#allocation2 + $0x8] sm:$0xff] }
 0x5c7   : > { %v1793_v57 = vpack.c.bf16 %v1792_v56, %v1791_v33  ;;  %v2748_v33 = vld [vmem:[%s3620_s11 + $0x40] sm:$0xff]  }
 0x5c8   : > { %v2749_v56 = vld [vmem:[%s3620_s11] sm:$0xff]  }
 0x5c9   : > { %2622 = vmatmul.mubr.msk.bf16.vlgmr.msra.gmra.mxu0 %vm472_vm0, %v1793_v57  ;;  %v1928_v57 = vshrl.u32 %v744_v20, 7 }
 0x5ca   : > { %2460 = vmatpush3.bf16.msra.mxu0 %v2735_v0 }
 0x5cb   : > { %2461 = vmatprep.subr.bf16.mxu0 %v2736_v23 }
 0x5ce   : > { %2462 = vmatpush3.bf16.msra.mxu0 %v2737_v22 }
 0x5cf   : > { %2463 = vmatprep.subr.bf16.mxu0 %v2738_v47 }
 0x5d2   : > { %2464 = vmatpush3.bf16.msra.mxu0 %v2739_v48 }
 0x5d3   : > { %2465 = vmatprep.subr.bf16.mxu0 %v2740_v50 }
 0x5d6   : > { %2466 = vmatpush3.bf16.msra.mxu0 %v2741_v35 }
 0x5d7   : > { %2467 = vmatprep.subr.bf16.mxu0 %v2742_v51 }
 0x5da   : > { %2468 = vmatpush3.bf16.msra.mxu0 %v2743_v49 }
 0x5db   : > { %2469 = vmatprep.subr.bf16.mxu0 %v2744_v52 }
 0x5de   : > { %2470 = vmatpush3.bf16.msra.mxu0 %v2745_v54 }
 0x5df   : > { %2471 = vmatprep.subr.bf16.mxu0 %v2746_v55 }
 0x5e2   : > { %2472 = vmatpush3.bf16.msra.mxu0 %v2747_v61 }
 0x5e3   : > { %2473 = vmatprep.subr.bf16.mxu0 %v2748_v33 }
 0x5e6   : > { %2474 = vmatpush3.bf16.msra.mxu0 %v2749_v56 }
 0x689   : > { %v1863_v59 = vpop.f32.mrf.mxu0 }
 0x68a   : > { %v3456_v28 = vadd.f32 %v2830_v37, %v1863_v59  ;;  %v1929_v59 = vsub.s32 0, %v1928_v57  ;;  %v1925_v37 = vld [vmem:[%s3619_s10] sm:$0x3] }
 0x68b   : > { %v2623_v29 = vpop.f32.mrf.mxu0 }
 0x68c   : > { %v1874_v39 = vsel %vm472_vm0, %v3456_v28, 0.0  ;;  %v1933_v29 = vsub.s32 1, %v1928_v57 }
 0x68d   : > { %1875 = vadd.xlane.f32.xlu1 %v1874_v39  ;;  %v1866_v62 = vpop.f32.mrf.mxu0  ;;  %v1930_v39 = vrot.slane %v1925_v37, %v1929_v59 }
 0x68e   : > { %v3461_v63 = vadd.f32 %v2831_v41, %v1866_v62  ;;  %v1934_v62 = vrot.slane %v1925_v37, %v1933_v29 }
 0x68f   : > { %v2624_v1 = vpop.f32.mrf.mxu0 }
 0x690   : > { %v1877_v45 = vsel %vm472_vm0, %v3461_v63, 0.0 }
 0x691   : > { %1878 = vadd.xlane.f32.xlu0 %v1877_v45 }
 0x716   : > { %v1876_v3 = vpop.xlane.xlu1 %1875 }
 0x717   : > { %v1880_v4 = vmul.f32 0.015625, %v1876_v3 }
 0x719   : > { %v1882_v53 = vsub.f32 %v3456_v28, %v1880_v4 }
 0x71a   : > { %v1879_v5 = vpop.xlane.xlu0 %1878 }
 0x71b   : > { %v1881_v6 = vmul.f32 0.015625, %v1879_v5  ;;  %v1884_v7 = vmul.f32 %v1882_v53, %v1882_v53 }
 0x71d   : > { %v1883_v58 = vsub.f32 %v3461_v63, %v1881_v6  ;;  %v1886_v8 = vsel %vm472_vm0, %v1884_v7, 0.0 }
 0x71e   : > { %1887 = vadd.xlane.f32.xlu0 %v1886_v8 }
 0x71f   : > { %v1885_v10 = vmul.f32 %v1883_v58, %v1883_v58 }
 0x721   : > { %v1889_v26 = vsel %vm472_vm0, %v1885_v10, 0.0 }
 0x722   : > { %1890 = vadd.xlane.f32.xlu0 %v1889_v26 }
 0x7a7   : > { %v1888_v21 = vpop.xlane.xlu0 %1887 }
 0x7a8   : > { %v1892_v9 = vmul.f32 0.015625, %v1888_v21 }
 0x7aa   : > { %v1894_v24 = vadd.f32 1e-05, %v1892_v9 }
 0x7ab   : > { %v1891_v25 = vpop.xlane.xlu0 %1890 }
 0x7ac   : > { %2818 = vrsqrt.f32 %v1894_v24  ;;  %v1893_v27 = vmul.f32 0.015625, %v1891_v25 }
 0x7ae   : > { %v1895_v16 = vadd.f32 1e-05, %v1893_v27 }
 0x7b0   : > { %2820 = vrsqrt.f32 %v1895_v16 }
 0x7b9   : > { %v2819_v30 = vpop.eup %2818 }
 0x7ba   : > { %v1898_v31 = vmul.f32 %v2819_v30, %v1882_v53 }
 0x7bc   : > { %v1906_v36 = vmul.f32 %v2372_v14, %v1898_v31 }
 0x7bd   : > { %v2821_v32 = vpop.eup %2820 }
 0x7be   : > { %v1899_v34 = vmul.f32 %v2821_v32, %v1883_v58  ;;  %v1914_v42 = vadd.f32 %v2373_v38, %v1906_v36 }
 0x7c0   : > { %v1907_v40 = vmul.f32 %v2372_v14, %v1899_v34  ;;  %v2383_v14 = vld [vmem:[%s3621_s12] ss:$0 sm:$0xff] }
 0x7c2   : > { %v1915_v43 = vadd.f32 %v2373_v38, %v1907_v40 }
 0x7c4   : > { %v1916_v44 = vpack.c.bf16 %v1915_v43, %v1914_v42 }
 0x7c6   : > { %2382 = vmatmul.mubr.msk.bf16.vlgmr.msra.gmra.mxu1 %vm472_vm0, %v1916_v44 }
 0x886   : > { %v2014_v41 = vpop.f32.mrf.mxu1 }
 0x887   : > { %v2015_v1 = vadd.f32 %v2014_v41, %v1930_v39 }
 0x888   : > { %v2016_v45 = vpop.f32.mrf.mxu1 }
 0x889   : > { %v2017_v3 = vadd.f32 %v2016_v45, %v1934_v62  ;;  %v2027_v4 = vmul.f32 0.70710677, %v2015_v1  ;;  %v2023_v21 = vmul.f32 0.5, %v2015_v1 }
 0x88a   : > { %v2018_v53 = vpop.f32.mrf.mxu1 }
 0x88b   : > { %v2028_v5 = vmul.f32 0.70710677, %v2017_v3  ;;  %v2019_v6 = vadd.f32 %v2018_v53, %v1930_v39  ;;  %v2024_v17 = vmul.f32 0.5, %v2017_v3 }
 0x88c   : > { %v2020_v7 = vpop.f32.mrf.mxu1 }
 0x88d   : > { %2822 = verf.f32 %v2028_v5  ;;  %v2029_v58 = vmul.f32 0.70710677, %v2019_v6  ;;  %v2021_v20 = vadd.f32 %v2020_v7, %v1934_v62  ;;  %v2025_v2 = vmul.f32 0.5, %v2019_v6 }
 0x88e   : > { %2824 = verf.f32 %v2027_v4 }
 0x88f   : > { %2826 = verf.f32 %v2029_v58  ;;  %v2030_v8 = vmul.f32 0.70710677, %v2021_v20  ;;  %v2026_v18 = vmul.f32 0.5, %v2021_v20 }
 0x891   : > { %2828 = verf.f32 %v2030_v8 }
 0x89a   : > { %v2823_v10 = vpop.eup %2822 }
 0x89b   : > { %v2825_v26 = vpop.eup %2824  ;;  %v2036_v11 = vadd.f32 1.0, %v2823_v10 }
 0x89c   : > { %v2827_v60 = vpop.eup %2826  ;;  %v2035_v15 = vadd.f32 1.0, %v2825_v26 }
 0x89d   : > { %v2037_v12 = vadd.f32 1.0, %v2827_v60  ;;  %v2040_v24 = vmul.f32 %v2036_v11, %v2024_v17 }
 0x89e   : > { %v2829_v13 = vpop.eup %2828  ;;  %v2039_v27 = vmul.f32 %v2035_v15, %v2023_v21 }
 0x89f   : > { %v2038_v19 = vadd.f32 1.0, %v2829_v13  ;;  %v2041_v9 = vmul.f32 %v2037_v12, %v2025_v2 }
 0x8a1   : > { %v2042_v25 = vmul.f32 %v2038_v19, %v2026_v18  ;;  %v2043_v30 = vpack.c.bf16 %v2041_v9, %v2039_v27 }
 0x8a3   : > { %v2044_v16 = vpack.c.bf16 %v2042_v25, %v2040_v24 }
 0x8a5   : > { %2212 = vmatprep.mubr.bf16.mxu0 %v2044_v16 }
 0x8a6   : > { %2213 = vmatmul.mubr.bf16.vlgmr.msra.gmra.mxu0 %v2043_v30 }
 0x966   : > { %v2475_v31 = vpop.f32.mrf.mxu0 }
 0x968   : > { %v2476_v32 = vpop.f32.mrf.mxu0 }
 0x969   : > { %v2477_v34 = vadd.f32 %v2476_v32, %v2475_v31 }
 0x96a   : > { %v2478_v36 = vpop.f32.mrf.mxu0 }
 0x96b   : > { %v2215_v38 = vadd.f32 %v2477_v34, %v2383_v14 }
 0x96c   : > { %v2479_v40 = vpop.f32.mrf.mxu0 }
 0x96d   : > { %v2221_v42 = vadd.f32 %v2215_v38, %v3456_v28  ;;  %v2480_v43 = vadd.f32 %v2479_v40, %v2478_v36 }
 0x96f   : > { %2223 = vst.msk [vmem:[%s461_s20] sm:$0xff] %vm472_vm0, %v2221_v42  ;;  %v2218_v44 = vadd.f32 %v2480_v43, %v2383_v14 }
 0x971   : > { %v2222_v46 = vadd.f32 %v2218_v44, %v3461_v63 }
 0x973   : > { %2224 = vst.msk [vmem:[%s461_s20 + $0x8] sm:$0xff] %vm472_vm0, %v2222_v46 }
 0x974   : > { %2897 = shalt.err (!%p2894_p1)
}
 0x975   : > { %s2898_s15 = scalar_lea.hbm %s3562_s21, 256  ;;  %s2902_s30 = scalar_lea.hbm %s3622_s13, 512 }
 0x976   : > { %p2899_p2 = scmp.ne.s32.totalorder %s3562_s21, %s2898_s15  ;;  %p2903_p5 = scmp.lt.s32.totalorder %s3562_s21, %s3622_s13 }
 0x977   : > { %p2904_p6 = scmp.lt.s32.totalorder %s2902_s30, %s2898_s15 }
 0x978   : > { %p2900_p3 = pnand %p2899_p2, %p3642_p13 }
 0x979   : > { %p2905_p10 = por %p2904_p6, %p2903_p5 }
 0x97a   : > { %p2901_p9 = pneg %p2900_p3 }
 0x97c   : > { %p2906_p12 = pnand %p2905_p10, %p2901_p9 }
 0x97e   : > { %2909 = shalt.err (!%p2906_p12)
}
 0x97f   : > { %s2977_s16 = smov 128   ;;  %s3643_s14 = smov 8  }
 0x980   : > { %2633 = dma.vmem_to_hbm [thread:$0]  (%p3642_p13), %s3565_s22, 256, %s3562_s21, %s3568_s29, %s2977_s16, %s2977_s16, %s3643_s14  }
 0x981 PF: > { %p2650_p4 = scmp.ge.s32.totalorder %s2952_s28, 2  ;;  %s2254_s17 = sand.u32 1, %s2940_s25  }
 0x982   : > { %p3644_p7 = scmp.ne.s32.totalorder %s3634_s19, 0  ;;  %s2255_s23 = scalar_lea.sflag [#allocation5], %s2254_s17 }
 0x984   : > { %p2643_p8 = pnand %p2650_p4, %p3644_p7 }
 0x986   : > { %p2644_p11 = pneg %p2643_p8 }
 0x988   : > { %2935 = dma.done.wait (%p2644_p11), %s2255_s23, 256  }
 0x989   : > { %2937 = vsyncadd (%p2644_p11), %s2255_s23, 4294967040  ;;  %s3645_s28 = sld [smem:[#allocation13_spill]]  ;;  %s3648_s25 = smov %s2944_s26 }
 0x98a   : > { %s3646_s18 = sld [smem:[#allocation12_spill]] }
 0x98b   : > { %s3647_s27 = sld [smem:[#allocation14_spill]] }
 0x98f   : > { %p25_p0 = scmp.ge.s32.totalorder %s3645_s28, 4  }
 0x990   : > { %s3649_s26 = smov %s3646_s18 }
 0x991   :  { %27 = sbr.rel (!%p25_p0) target bundleno = 5 (0x5), region = 116 }
 0x996   :  { %2260 = vsyncpa [#allocation4], 1 }
 0x997   :  { %2262 = vsyncpa [#allocation4 + $0x1], 1 }
 0x998   :  { %2263 = vsyncpa [#allocation7], 1 }
 0x999   :  { %2264 = vsyncpa [#allocation5], 1 }
 0x99a   :  { %2266 = vsyncpa [#allocation5 + $0x1], 1 }

</bundles_post_ra>
